<compile_context>
chip_gen: v7x
topology: tpu7x:2x2x1
jax: 0.10.0
libtpu: 0.0.40
codegen_flags: <defaults>
</compile_context>

<pallas_src>
import functools

import jax
import jax.numpy as jnp
from jax.experimental import pallas as pl
from jax.experimental.pallas import tpu as pltpu


# ----------------------------- fused Pallas kernel ---------------------------

def _fused_inv2d_kernel(xf_ref, xs_ref, wr_ref, br_ref, ws_ref, bs_ref,
                        o_ref, kerscr_ref, astk_ref, wstk_ref, *, K, S, Cg, G):
    """One batch item per grid step; everything below happens in VMEM.

    xf_ref : (1, C, S*S)        bf16   input, pixels on lanes (conv branch)
    xs_ref : (1, G, Hp, Wp*Cg)  bf16   padded input, group-interleaved slab:
                                       xs[0, g, p, q*Cg + c] = x_pad[g*Cg + c, p, q]
    wr_ref : (Cr, C)            bf16   reduce 1x1-conv weight (torch (Cout, Cin))
    br_ref : (Cr, 1)            f32
    ws_ref : (K2G, Cr)          bf16   span 1x1-conv weight
    bs_ref : (K2G, 1)           f32
    o_ref  : (1, G, S, S*Cg)           out[0, g, i, j*Cg + c]   (lane-dense, 256 wide)
    kerscr_ref : (S, K2G, S)    bf16   scratch: kerscr[i, d, m] = ker[d, i*S + m]
    astk_ref   : (S, K2*S)      bf16   scratch: stacked kernel LHS for one group
    wstk_ref   : (K2*S, S*Cg)   bf16   scratch: stacked unfold windows for one group
    """
    K2 = K * K

    # --- kernel-generating branch: ker = span(reduce(x)); never leaves VMEM ---
    x = xf_ref[0]                                                   # (C, S*S) bf16
    red = jnp.dot(wr_ref[...], x,
                  preferred_element_type=jnp.float32) + br_ref[...]
    ker = jnp.dot(ws_ref[...], red.astype(jnp.bfloat16),
                  preferred_element_type=jnp.float32) + bs_ref[...]  # (K2G, S*S) f32
    kerb = ker.astype(jnp.bfloat16)

    # --- unflatten ker columns once: kerscr[i, d, m] = ker[d, i*S + m] --------
    for i in range(S):                                  # static unroll (S small)
        kerscr_ref[i] = kerb[:, i * S:(i + 1) * S]      # (K2G, S)

    # --- involution: per group, ONE (S, K2*S) @ (K2*S, S*Cg) deep matmul ------
    for g in range(G):
        for k in range(K2):                             # single pack pass
            ki, kj = divmod(k, K)
            # stacked unfold windows: wstk[k*S + m, j*Cg + c] = x_pad[gCg+c, m+ki, j+kj]
            wstk_ref[k * S:(k + 1) * S, :] = \
                xs_ref[0, g, ki:ki + S, kj * Cg:(kj + S) * Cg]
            # stacked kernel map:      astk[i, k*S + m]  = ker[g, k, i, m]
            astk_ref[:, k * S:(k + 1) * S] = kerscr_ref[:, g * K2 + k, :]
        out_g = jnp.dot(astk_ref[...], wstk_ref[...],
                        preferred_element_type=jnp.float32)          # (S, S*Cg) f32
        o_ref[0, g] = out_g.astype(o_ref.dtype)


def fused_inv2d_pallas(x_flat, x_slab, w_reduce, b_reduce, w_span, b_span,
                       *, K, S, Cg, G, out_dtype):
    B, C, HW = x_flat.shape
    _, _, Hp, WpCg = x_slab.shape
    Cr = w_reduce.shape[0]
    K2 = K * K
    K2G = K2 * G

    flops = 2 * B * HW * (Cr * C + K2G * Cr) + 2 * B * G * K2 * S * S * S * Cg
    bytes_accessed = (x_flat.size * 2 + x_slab.size * 2
                      + (Cr * C + K2G * Cr) * 2 + (Cr + K2G) * 4
                      + B * G * S * S * Cg * jnp.dtype(out_dtype).itemsize)

    kern = functools.partial(_fused_inv2d_kernel, K=K, S=S, Cg=Cg, G=G)
    return pl.pallas_call(
        kern,
        out_shape=jax.ShapeDtypeStruct((B, G, S, S * Cg), out_dtype),
        grid=(B,),
        in_specs=[
            pl.BlockSpec((1, C, HW), lambda b: (b, 0, 0)),
            pl.BlockSpec((1, G, Hp, WpCg), lambda b: (b, 0, 0, 0)),
            pl.BlockSpec((Cr, C), lambda b: (0, 0)),
            pl.BlockSpec((Cr, 1), lambda b: (0, 0)),
            pl.BlockSpec((K2G, Cr), lambda b: (0, 0)),
            pl.BlockSpec((K2G, 1), lambda b: (0, 0)),
        ],
        out_specs=pl.BlockSpec((1, G, S, S * Cg), lambda b: (b, 0, 0, 0)),
        scratch_shapes=[
            pltpu.VMEM((S, K2G, S), jnp.bfloat16),       # kerscr
            pltpu.VMEM((S, K2 * S), jnp.bfloat16),       # astk
            pltpu.VMEM((K2 * S, S * Cg), jnp.bfloat16),  # wstk
        ],
        compiler_params=pltpu.CompilerParams(
            dimension_semantics=("parallel",)),
        cost_estimate=pl.CostEstimate(flops=flops, transcendentals=0,
                                      bytes_accessed=bytes_accessed),
    )(x_flat, x_slab,
      w_reduce.astype(jnp.bfloat16),
      b_reduce.reshape(Cr, 1).astype(jnp.float32),
      w_span.astype(jnp.bfloat16),
      b_span.reshape(K2G, 1).astype(jnp.float32))


# ------------------------------- JAX glue ------------------------------------

def avg_pool_nchw(x, s):
    # nn.AvgPool2d(s, s); identity for s == 1
    if s == 1:
        return x
    B, C, H, W = x.shape
    Ho, Wo = H // s, W // s
    x = x[:, :, :Ho * s, :Wo * s].reshape(B, C, Ho, s, Wo, s)
    return x.mean(axis=(3, 5))


def unfold_nchw(x, K, pad, stride):
    # nn.Unfold(K, dilation=1, padding=pad, stride) -> (B, C, K*K, Ho, Wo); reference only.
    B, C, H, W = x.shape
    xp = jnp.pad(x, ((0, 0), (0, 0), (pad, pad), (pad, pad)))
    Ho = (H + 2 * pad - K) // stride + 1
    Wo = (W + 2 * pad - K) // stride + 1
    patches = []
    for ki in range(K):
        for kj in range(K):
            patches.append(
                xp[:, :, ki:ki + stride * Ho:stride, kj:kj + stride * Wo:stride])
    return jnp.stack(patches, axis=2)


def inv2d_forward(x, params, *, kernel_size, stride, group_ch, red_ratio):
    del red_ratio  # implied by the param shapes
    B, C, H, W = x.shape
    Cg = group_ch
    G = C // Cg
    K = kernel_size
    pad = (K - 1) // 2

    # TODO(synk): stride > 1 needs a strided in-kernel window gather; only the module's
    # stride == 1 hot config is wired into the Pallas packing below.
    assert stride == 1, "Pallas Inv2d path implemented for stride == 1"

    pooled = avg_pool_nchw(x, stride)                     # identity at stride == 1
    _, _, h, w = pooled.shape
    assert h == w, "torch's `kernel @ x_unfolded` contracts spatial dims; needs h == w"
    S = h

    # conv-branch view: pixels on lanes (free reshape of NCHW).
    x_flat = pooled.reshape(B, C, h * w).astype(jnp.bfloat16)

    # involution slab: pad once, interleave channels into lanes (no 9x unfold in HBM):
    #   x_slab[b, g, p, q*Cg + c] = x_pad[b, g*Cg + c, p, q]
    xp = jnp.pad(x, ((0, 0), (0, 0), (pad, pad), (pad, pad)))
    Hp, Wp = xp.shape[2], xp.shape[3]
    x_slab = (xp.reshape(B, G, Cg, Hp, Wp)
                .transpose(0, 1, 3, 4, 2)
                .reshape(B, G, Hp, Wp * Cg)
                .astype(jnp.bfloat16))

    out_l = fused_inv2d_pallas(x_flat, x_slab,
                               params["w_reduce"], params["b_reduce"],
                               params["w_span"], params["b_span"],
                               K=K, S=S, Cg=Cg, G=G, out_dtype=x.dtype)

    # out_l[b, g, i, j*Cg + c] -> NCHW.
    # TODO(synk): this final NCHW relayout is one (small) output-sized XLA pass; folding it
    # into the kernel epilogue needs an in-VMEM (i, j, c) -> (c, i, j) transpose.
    out = (out_l.reshape(B, G, S, S, Cg)
                .transpose(0, 1, 4, 2, 3)
                .reshape(B, C, S, S))
    return out


def inv2d_reference(x, params, *, kernel_size, stride, group_ch, red_ratio):
    # Plain-JAX replica of the torch forward, mirroring the kernel's dtype policy
    # (bf16 MXU operands, f32 accumulation) so the comparison isolates packing/indexing.
    del red_ratio
    B, C, H, W = x.shape
    G = C // group_ch
    K = kernel_size
    K2 = K * K
    pad = (K - 1) // 2
    pooled = avg_pool_nchw(x, stride).astype(jnp.bfloat16)
    red = jnp.einsum("bchw,dc->bdhw", pooled, params["w_reduce"].astype(jnp.bfloat16),
                     preferred_element_type=jnp.float32)
    red = red + params["b_reduce"][None, :, None, None]
    ker = jnp.einsum("bchw,dc->bdhw", red.astype(jnp.bfloat16),
                     params["w_span"].astype(jnp.bfloat16),
                     preferred_element_type=jnp.float32)
    ker = (ker + params["b_span"][None, :, None, None]).astype(jnp.bfloat16)
    _, _, h, w = ker.shape
    ker = ker.reshape(B, G, K2, h, w)
    xu = unfold_nchw(x, K, pad, stride).reshape(B, G, group_ch, K2, h, w)
    xu = xu.astype(jnp.bfloat16)
    # torch: (kernel.unsqueeze(2) @ x_unfolded).sum(dim=3)
    out = jnp.einsum("bgkim,bgckmj->bgcij", ker, xu,
                     preferred_element_type=jnp.float32)
    return out.reshape(B, C, h, w).astype(x.dtype)


# --------------------------------- main ---------------------------------------

if __name__ == "__main__":
    # Module config: channels=32, kernel_size=3, stride=1, group_ch=16, red_ratio=2
    B, C, H, W = 2, 32, 16, 16
    kernel_size, stride, group_ch, red_ratio = 3, 1, 16, 2
    G = C // group_ch
    Cr = C // red_ratio
    K2 = kernel_size * kernel_size

    key = jax.random.PRNGKey(0)
    kx, k1, k2, k3, k4 = jax.random.split(key, 5)
    x = jax.random.normal(kx, (B, C, H, W), dtype=jnp.float32)
    params = {
        # torch Conv2d weight layout (Cout, Cin) for the 1x1 convs
        "w_reduce": 0.1 * jax.random.normal(k1, (Cr, C), dtype=jnp.float32),
        "b_reduce": 0.1 * jax.random.normal(k2, (Cr,), dtype=jnp.float32),
        "w_span": 0.1 * jax.random.normal(k3, (K2 * G, Cr), dtype=jnp.float32),
        "b_span": 0.1 * jax.random.normal(k4, (K2 * G,), dtype=jnp.float32),
    }

    fwd = functools.partial(inv2d_forward, kernel_size=kernel_size, stride=stride,
                            group_ch=group_ch, red_ratio=red_ratio)
    out = jax.jit(fwd)(x, params)
    out = jax.block_until_ready(out)

    ref = inv2d_reference(x, params, kernel_size=kernel_size, stride=stride,
                          group_ch=group_ch, red_ratio=red_ratio)
    assert out.shape == (B, C, H, W), out.shape
    # Tolerance covers accumulation-order differences only (reference mirrors the bf16
    # operand / f32 accumulate policy of the kernel).
    assert jnp.allclose(out, ref, rtol=1e-2, atol=1e-2), \
        float(jnp.max(jnp.abs(out - ref)))
    print("KERNEL_OK")
</pallas_src>

<mosaic_0001>
module attributes {stable_mosaic.version = 11 : i64} {
  func.func @_fused_inv2d_kernel(%arg0: i32, %arg1: memref<1x32x256xbf16, #tpu.memory_space<vmem>>, %arg2: memref<1x2x18x288xbf16, #tpu.memory_space<vmem>>, %arg3: memref<16x32xbf16, #tpu.memory_space<vmem>>, %arg4: memref<16x1xf32, #tpu.memory_space<vmem>>, %arg5: memref<18x16xbf16, #tpu.memory_space<vmem>>, %arg6: memref<18x1xf32, #tpu.memory_space<vmem>>, %arg7: memref<1x2x16x256xf32, #tpu.memory_space<vmem>>, %arg8: memref<16x18x16xbf16, #tpu.memory_space<vmem>>, %arg9: memref<16x144xbf16, #tpu.memory_space<vmem>>, %arg10: memref<144x256xbf16, #tpu.memory_space<vmem>>) attributes {dimension_semantics = [#tpu.dimension_semantics<parallel>], iteration_bounds = array<i64: 2>, scalar_prefetch = 0 : i64, scratch_operands = 3 : i64, tpu.core_type = #tpu.core_type<tc>, window_params = [{transform_indices = @transform_0, window_bounds = array<i64: 1, 32, 256>}, {transform_indices = @transform_1, window_bounds = array<i64: 1, 2, 18, 288>}, {pipeline_mode = #tpu.pipeline_mode<synchronous>, transform_indices = @transform_2, window_bounds = array<i64: 16, 32>}, {pipeline_mode = #tpu.pipeline_mode<synchronous>, transform_indices = @transform_3, window_bounds = array<i64: 16, 1>}, {pipeline_mode = #tpu.pipeline_mode<synchronous>, transform_indices = @transform_4, window_bounds = array<i64: 18, 16>}, {pipeline_mode = #tpu.pipeline_mode<synchronous>, transform_indices = @transform_5, window_bounds = array<i64: 18, 1>}, {transform_indices = @transform_6, window_bounds = array<i64: 1, 2, 16, 256>}]} {
    %c0 = arith.constant 0 : index
    %c0_0 = arith.constant 0 : index
    %c0_1 = arith.constant 0 : index
    %0 = vector.load %arg1[%c0, %c0_0, %c0_1] : memref<1x32x256xbf16, #tpu.memory_space<vmem>>, vector<1x32x256xbf16>
    %1 = vector.shape_cast %0 : vector<1x32x256xbf16> to vector<32x256xbf16>
    %c0_2 = arith.constant 0 : index
    %c0_3 = arith.constant 0 : index
    %2 = vector.load %arg3[%c0_2, %c0_3] : memref<16x32xbf16, #tpu.memory_space<vmem>>, vector<16x32xbf16>
    %cst = arith.constant dense<0.000000e+00> : vector<16x256xf32>
    %3 = tpu.matmul %2, %1, %cst {dimension_numbers = #tpu.dot_dimension_numbers<[1], [0], [0], [1], [0, 0, 1, 1], [], []>} : vector<16x32xbf16>, vector<32x256xbf16>, vector<16x256xf32> -> vector<16x256xf32>
    %c0_4 = arith.constant 0 : index
    %c0_5 = arith.constant 0 : index
    %4 = vector.load %arg4[%c0_4, %c0_5] : memref<16x1xf32, #tpu.memory_space<vmem>>, vector<16x1xf32>
    %5 = vector.broadcast %4 : vector<16x1xf32> to vector<16x256xf32>
    %6 = arith.addf %3, %5 : vector<16x256xf32>
    %c0_6 = arith.constant 0 : index
    %c0_7 = arith.constant 0 : index
    %7 = vector.load %arg5[%c0_6, %c0_7] : memref<18x16xbf16, #tpu.memory_space<vmem>>, vector<18x16xbf16>
    %8 = arith.truncf %6 : vector<16x256xf32> to vector<16x256xbf16>
    %cst_8 = arith.constant dense<0.000000e+00> : vector<18x256xf32>
    %9 = tpu.matmul %7, %8, %cst_8 {dimension_numbers = #tpu.dot_dimension_numbers<[1], [0], [0], [1], [0, 0, 1, 1], [], []>} : vector<18x16xbf16>, vector<16x256xbf16>, vector<18x256xf32> -> vector<18x256xf32>
    %c0_9 = arith.constant 0 : index
    %c0_10 = arith.constant 0 : index
    %10 = vector.load %arg6[%c0_9, %c0_10] : memref<18x1xf32, #tpu.memory_space<vmem>>, vector<18x1xf32>
    %11 = vector.broadcast %10 : vector<18x1xf32> to vector<18x256xf32>
    %12 = arith.addf %9, %11 : vector<18x256xf32>
    %13 = arith.truncf %12 : vector<18x256xf32> to vector<18x256xbf16>
    %14 = vector.extract_strided_slice %13 {offsets = [0, 0], sizes = [18, 16], strides = [1, 1]} : vector<18x256xbf16> to vector<18x16xbf16>
    %c0_11 = arith.constant 0 : index
    %c0_12 = arith.constant 0 : index
    %c0_13 = arith.constant 0 : index
    %15 = vector.load %arg8[%c0_11, %c0_12, %c0_13] : memref<16x18x16xbf16, #tpu.memory_space<vmem>>, vector<1x18x16xbf16>
    %16 = vector.shape_cast %15 : vector<1x18x16xbf16> to vector<18x16xbf16>
    %17 = vector.shape_cast %14 : vector<18x16xbf16> to vector<1x18x16xbf16>
    tpu.vector_store %arg8[%c0_11, %c0_12, %c0_13], %17 {strides = array<i32>} : memref<16x18x16xbf16, #tpu.memory_space<vmem>>, vector<1x18x16xbf16>,
    %18 = vector.extract_strided_slice %13 {offsets = [0, 16], sizes = [18, 16], strides = [1, 1]} : vector<18x256xbf16> to vector<18x16xbf16>
    %c1 = arith.constant 1 : index
    %c0_14 = arith.constant 0 : index
    %c0_15 = arith.constant 0 : index
    %19 = vector.load %arg8[%c1, %c0_14, %c0_15] : memref<16x18x16xbf16, #tpu.memory_space<vmem>>, vector<1x18x16xbf16>
    %20 = vector.shape_cast %19 : vector<1x18x16xbf16> to vector<18x16xbf16>
    %21 = vector.shape_cast %18 : vector<18x16xbf16> to vector<1x18x16xbf16>
    tpu.vector_store %arg8[%c1, %c0_14, %c0_15], %21 {strides = array<i32>} : memref<16x18x16xbf16, #tpu.memory_space<vmem>>, vector<1x18x16xbf16>,
    %22 = vector.extract_strided_slice %13 {offsets = [0, 32], sizes = [18, 16], strides = [1, 1]} : vector<18x256xbf16> to vector<18x16xbf16>
    %c2 = arith.constant 2 : index
    %c0_16 = arith.constant 0 : index
    %c0_17 = arith.constant 0 : index
    %23 = vector.load %arg8[%c2, %c0_16, %c0_17] : memref<16x18x16xbf16, #tpu.memory_space<vmem>>, vector<1x18x16xbf16>
    %24 = vector.shape_cast %23 : vector<1x18x16xbf16> to vector<18x16xbf16>
    %25 = vector.shape_cast %22 : vector<18x16xbf16> to vector<1x18x16xbf16>
    tpu.vector_store %arg8[%c2, %c0_16, %c0_17], %25 {strides = array<i32>} : memref<16x18x16xbf16, #tpu.memory_space<vmem>>, vector<1x18x16xbf16>,
    %26 = vector.extract_strided_slice %13 {offsets = [0, 48], sizes = [18, 16], strides = [1, 1]} : vector<18x256xbf16> to vector<18x16xbf16>
    %c3 = arith.constant 3 : index
    %c0_18 = arith.constant 0 : index
    %c0_19 = arith.constant 0 : index
    %27 = vector.load %arg8[%c3, %c0_18, %c0_19] : memref<16x18x16xbf16, #tpu.memory_space<vmem>>, vector<1x18x16xbf16>
    %28 = vector.shape_cast %27 : vector<1x18x16xbf16> to vector<18x16xbf16>
    %29 = vector.shape_cast %26 : vector<18x16xbf16> to vector<1x18x16xbf16>
    tpu.vector_store %arg8[%c3, %c0_18, %c0_19], %29 {strides = array<i32>} : memref<16x18x16xbf16, #tpu.memory_space<vmem>>, vector<1x18x16xbf16>,
    %30 = vector.extract_strided_slice %13 {offsets = [0, 64], sizes = [18, 16], strides = [1, 1]} : vector<18x256xbf16> to vector<18x16xbf16>
    %c4 = arith.constant 4 : index
    %c0_20 = arith.constant 0 : index
    %c0_21 = arith.constant 0 : index
    %31 = vector.load %arg8[%c4, %c0_20, %c0_21] : memref<16x18x16xbf16, #tpu.memory_space<vmem>>, vector<1x18x16xbf16>
    %32 = vector.shape_cast %31 : vector<1x18x16xbf16> to vector<18x16xbf16>
    %33 = vector.shape_cast %30 : vector<18x16xbf16> to vector<1x18x16xbf16>
    tpu.vector_store %arg8[%c4, %c0_20, %c0_21], %33 {strides = array<i32>} : memref<16x18x16xbf16, #tpu.memory_space<vmem>>, vector<1x18x16xbf16>,
    %34 = vector.extract_strided_slice %13 {offsets = [0, 80], sizes = [18, 16], strides = [1, 1]} : vector<18x256xbf16> to vector<18x16xbf16>
    %c5 = arith.constant 5 : index
    %c0_22 = arith.constant 0 : index
    %c0_23 = arith.constant 0 : index
    %35 = vector.load %arg8[%c5, %c0_22, %c0_23] : memref<16x18x16xbf16, #tpu.memory_space<vmem>>, vector<1x18x16xbf16>
    %36 = vector.shape_cast %35 : vector<1x18x16xbf16> to vector<18x16xbf16>
    %37 = vector.shape_cast %34 : vector<18x16xbf16> to vector<1x18x16xbf16>
    tpu.vector_store %arg8[%c5, %c0_22, %c0_23], %37 {strides = array<i32>} : memref<16x18x16xbf16, #tpu.memory_space<vmem>>, vector<1x18x16xbf16>,
    %38 = vector.extract_strided_slice %13 {offsets = [0, 96], sizes = [18, 16], strides = [1, 1]} : vector<18x256xbf16> to vector<18x16xbf16>
    %c6 = arith.constant 6 : index
    %c0_24 = arith.constant 0 : index
    %c0_25 = arith.constant 0 : index
    %39 = vector.load %arg8[%c6, %c0_24, %c0_25] : memref<16x18x16xbf16, #tpu.memory_space<vmem>>, vector<1x18x16xbf16>
    %40 = vector.shape_cast %39 : vector<1x18x16xbf16> to vector<18x16xbf16>
    %41 = vector.shape_cast %38 : vector<18x16xbf16> to vector<1x18x16xbf16>
    tpu.vector_store %arg8[%c6, %c0_24, %c0_25], %41 {strides = array<i32>} : memref<16x18x16xbf16, #tpu.memory_space<vmem>>, vector<1x18x16xbf16>,
    %42 = vector.extract_strided_slice %13 {offsets = [0, 112], sizes = [18, 16], strides = [1, 1]} : vector<18x256xbf16> to vector<18x16xbf16>
    %c7 = arith.constant 7 : index
    %c0_26 = arith.constant 0 : index
    %c0_27 = arith.constant 0 : index
    %43 = vector.load %arg8[%c7, %c0_26, %c0_27] : memref<16x18x16xbf16, #tpu.memory_space<vmem>>, vector<1x18x16xbf16>
    %44 = vector.shape_cast %43 : vector<1x18x16xbf16> to vector<18x16xbf16>
    %45 = vector.shape_cast %42 : vector<18x16xbf16> to vector<1x18x16xbf16>
    tpu.vector_store %arg8[%c7, %c0_26, %c0_27], %45 {strides = array<i32>} : memref<16x18x16xbf16, #tpu.memory_space<vmem>>, vector<1x18x16xbf16>,
    %46 = vector.extract_strided_slice %13 {offsets = [0, 128], sizes = [18, 16], strides = [1, 1]} : vector<18x256xbf16> to vector<18x16xbf16>
    %c8 = arith.constant 8 : index
    %c0_28 = arith.constant 0 : index
    %c0_29 = arith.constant 0 : index
    %47 = vector.load %arg8[%c8, %c0_28, %c0_29] : memref<16x18x16xbf16, #tpu.memory_space<vmem>>, vector<1x18x16xbf16>
    %48 = vector.shape_cast %47 : vector<1x18x16xbf16> to vector<18x16xbf16>
    %49 = vector.shape_cast %46 : vector<18x16xbf16> to vector<1x18x16xbf16>
    tpu.vector_store %arg8[%c8, %c0_28, %c0_29], %49 {strides = array<i32>} : memref<16x18x16xbf16, #tpu.memory_space<vmem>>, vector<1x18x16xbf16>,
    %50 = vector.extract_strided_slice %13 {offsets = [0, 144], sizes = [18, 16], strides = [1, 1]} : vector<18x256xbf16> to vector<18x16xbf16>
    %c9 = arith.constant 9 : index
    %c0_30 = arith.constant 0 : index
    %c0_31 = arith.constant 0 : index
    %51 = vector.load %arg8[%c9, %c0_30, %c0_31] : memref<16x18x16xbf16, #tpu.memory_space<vmem>>, vector<1x18x16xbf16>
    %52 = vector.shape_cast %51 : vector<1x18x16xbf16> to vector<18x16xbf16>
    %53 = vector.shape_cast %50 : vector<18x16xbf16> to vector<1x18x16xbf16>
    tpu.vector_store %arg8[%c9, %c0_30, %c0_31], %53 {strides = array<i32>} : memref<16x18x16xbf16, #tpu.memory_space<vmem>>, vector<1x18x16xbf16>,
    %54 = vector.extract_strided_slice %13 {offsets = [0, 160], sizes = [18, 16], strides = [1, 1]} : vector<18x256xbf16> to vector<18x16xbf16>
    %c10 = arith.constant 10 : index
    %c0_32 = arith.constant 0 : index
    %c0_33 = arith.constant 0 : index
    %55 = vector.load %arg8[%c10, %c0_32, %c0_33] : memref<16x18x16xbf16, #tpu.memory_space<vmem>>, vector<1x18x16xbf16>
    %56 = vector.shape_cast %55 : vector<1x18x16xbf16> to vector<18x16xbf16>
    %57 = vector.shape_cast %54 : vector<18x16xbf16> to vector<1x18x16xbf16>
    tpu.vector_store %arg8[%c10, %c0_32, %c0_33], %57 {strides = array<i32>} : memref<16x18x16xbf16, #tpu.memory_space<vmem>>, vector<1x18x16xbf16>,
    %58 = vector.extract_strided_slice %13 {offsets = [0, 176], sizes = [18, 16], strides = [1, 1]} : vector<18x256xbf16> to vector<18x16xbf16>
    %c11 = arith.constant 11 : index
    %c0_34 = arith.constant 0 : index
    %c0_35 = arith.constant 0 : index
    %59 = vector.load %arg8[%c11, %c0_34, %c0_35] : memref<16x18x16xbf16, #tpu.memory_space<vmem>>, vector<1x18x16xbf16>
    %60 = vector.shape_cast %59 : vector<1x18x16xbf16> to vector<18x16xbf16>
    %61 = vector.shape_cast %58 : vector<18x16xbf16> to vector<1x18x16xbf16>
    tpu.vector_store %arg8[%c11, %c0_34, %c0_35], %61 {strides = array<i32>} : memref<16x18x16xbf16, #tpu.memory_space<vmem>>, vector<1x18x16xbf16>,
    %62 = vector.extract_strided_slice %13 {offsets = [0, 192], sizes = [18, 16], strides = [1, 1]} : vector<18x256xbf16> to vector<18x16xbf16>
    %c12 = arith.constant 12 : index
    %c0_36 = arith.constant 0 : index
    %c0_37 = arith.constant 0 : index
    %63 = vector.load %arg8[%c12, %c0_36, %c0_37] : memref<16x18x16xbf16, #tpu.memory_space<vmem>>, vector<1x18x16xbf16>
    %64 = vector.shape_cast %63 : vector<1x18x16xbf16> to vector<18x16xbf16>
    %65 = vector.shape_cast %62 : vector<18x16xbf16> to vector<1x18x16xbf16>
    tpu.vector_store %arg8[%c12, %c0_36, %c0_37], %65 {strides = array<i32>} : memref<16x18x16xbf16, #tpu.memory_space<vmem>>, vector<1x18x16xbf16>,
    %66 = vector.extract_strided_slice %13 {offsets = [0, 208], sizes = [18, 16], strides = [1, 1]} : vector<18x256xbf16> to vector<18x16xbf16>
    %c13 = arith.constant 13 : index
    %c0_38 = arith.constant 0 : index
    %c0_39 = arith.constant 0 : index
    %67 = vector.load %arg8[%c13, %c0_38, %c0_39] : memref<16x18x16xbf16, #tpu.memory_space<vmem>>, vector<1x18x16xbf16>
    %68 = vector.shape_cast %67 : vector<1x18x16xbf16> to vector<18x16xbf16>
    %69 = vector.shape_cast %66 : vector<18x16xbf16> to vector<1x18x16xbf16>
    tpu.vector_store %arg8[%c13, %c0_38, %c0_39], %69 {strides = array<i32>} : memref<16x18x16xbf16, #tpu.memory_space<vmem>>, vector<1x18x16xbf16>,
    %70 = vector.extract_strided_slice %13 {offsets = [0, 224], sizes = [18, 16], strides = [1, 1]} : vector<18x256xbf16> to vector<18x16xbf16>
    %c14 = arith.constant 14 : index
    %c0_40 = arith.constant 0 : index
    %c0_41 = arith.constant 0 : index
    %71 = vector.load %arg8[%c14, %c0_40, %c0_41] : memref<16x18x16xbf16, #tpu.memory_space<vmem>>, vector<1x18x16xbf16>
    %72 = vector.shape_cast %71 : vector<1x18x16xbf16> to vector<18x16xbf16>
    %73 = vector.shape_cast %70 : vector<18x16xbf16> to vector<1x18x16xbf16>
    tpu.vector_store %arg8[%c14, %c0_40, %c0_41], %73 {strides = array<i32>} : memref<16x18x16xbf16, #tpu.memory_space<vmem>>, vector<1x18x16xbf16>,
    %74 = vector.extract_strided_slice %13 {offsets = [0, 240], sizes = [18, 16], strides = [1, 1]} : vector<18x256xbf16> to vector<18x16xbf16>
    %c15 = arith.constant 15 : index
    %c0_42 = arith.constant 0 : index
    %c0_43 = arith.constant 0 : index
    %75 = vector.load %arg8[%c15, %c0_42, %c0_43] : memref<16x18x16xbf16, #tpu.memory_space<vmem>>, vector<1x18x16xbf16>
    %76 = vector.shape_cast %75 : vector<1x18x16xbf16> to vector<18x16xbf16>
    %77 = vector.shape_cast %74 : vector<18x16xbf16> to vector<1x18x16xbf16>
    tpu.vector_store %arg8[%c15, %c0_42, %c0_43], %77 {strides = array<i32>} : memref<16x18x16xbf16, #tpu.memory_space<vmem>>, vector<1x18x16xbf16>,
    %c0_44 = arith.constant 0 : index
    %c0_45 = arith.constant 0 : index
    %c0_46 = arith.constant 0 : index
    %c0_47 = arith.constant 0 : index
    %78 = vector.load %arg2[%c0_44, %c0_45, %c0_46, %c0_47] : memref<1x2x18x288xbf16, #tpu.memory_space<vmem>>, vector<1x1x16x256xbf16>
    %79 = vector.shape_cast %78 : vector<1x1x16x256xbf16> to vector<16x256xbf16>
    %c0_48 = arith.constant 0 : index
    %c0_49 = arith.constant 0 : index
    %80 = vector.load %arg10[%c0_48, %c0_49] : memref<144x256xbf16, #tpu.memory_space<vmem>>, vector<16x256xbf16>
    tpu.vector_store %arg10[%c0_48, %c0_49], %79 {strides = array<i32>} : memref<144x256xbf16, #tpu.memory_space<vmem>>, vector<16x256xbf16>,
    %c0_50 = arith.constant 0 : index
    %c0_51 = arith.constant 0 : index
    %c0_52 = arith.constant 0 : index
    %81 = vector.load %arg8[%c0_50, %c0_51, %c0_52] : memref<16x18x16xbf16, #tpu.memory_space<vmem>>, vector<16x1x16xbf16>
    %82 = vector.shape_cast %81 : vector<16x1x16xbf16> to vector<16x16xbf16>
    %c0_53 = arith.constant 0 : index
    %c0_54 = arith.constant 0 : index
    %83 = vector.load %arg9[%c0_53, %c0_54] : memref<16x144xbf16, #tpu.memory_space<vmem>>, vector<16x16xbf16>
    tpu.vector_store %arg9[%c0_53, %c0_54], %82 {strides = array<i32>} : memref<16x144xbf16, #tpu.memory_space<vmem>>, vector<16x16xbf16>,
    %c0_55 = arith.constant 0 : index
    %c0_56 = arith.constant 0 : index
    %c0_57 = arith.constant 0 : index
    %c16 = arith.constant 16 : index
    %84 = vector.load %arg2[%c0_55, %c0_56, %c0_57, %c16] : memref<1x2x18x288xbf16, #tpu.memory_space<vmem>>, vector<1x1x16x256xbf16>
    %85 = vector.shape_cast %84 : vector<1x1x16x256xbf16> to vector<16x256xbf16>
    %c16_58 = arith.constant 16 : index
    %c0_59 = arith.constant 0 : index
    %86 = vector.load %arg10[%c16_58, %c0_59] : memref<144x256xbf16, #tpu.memory_space<vmem>>, vector<16x256xbf16>
    tpu.vector_store %arg10[%c16_58, %c0_59], %85 {strides = array<i32>} : memref<144x256xbf16, #tpu.memory_space<vmem>>, vector<16x256xbf16>,
    %c0_60 = arith.constant 0 : index
    %c1_61 = arith.constant 1 : index
    %c0_62 = arith.constant 0 : index
    %87 = vector.load %arg8[%c0_60, %c1_61, %c0_62] : memref<16x18x16xbf16, #tpu.memory_space<vmem>>, vector<16x1x16xbf16>
    %88 = vector.shape_cast %87 : vector<16x1x16xbf16> to vector<16x16xbf16>
    %c0_63 = arith.constant 0 : index
    %c16_64 = arith.constant 16 : index
    %89 = vector.load %arg9[%c0_63, %c16_64] : memref<16x144xbf16, #tpu.memory_space<vmem>>, vector<16x16xbf16>
    tpu.vector_store %arg9[%c0_63, %c16_64], %88 {strides = array<i32>} : memref<16x144xbf16, #tpu.memory_space<vmem>>, vector<16x16xbf16>,
    %c0_65 = arith.constant 0 : index
    %c0_66 = arith.constant 0 : index
    %c0_67 = arith.constant 0 : index
    %c32 = arith.constant 32 : index
    %90 = vector.load %arg2[%c0_65, %c0_66, %c0_67, %c32] : memref<1x2x18x288xbf16, #tpu.memory_space<vmem>>, vector<1x1x16x256xbf16>
    %91 = vector.shape_cast %90 : vector<1x1x16x256xbf16> to vector<16x256xbf16>
    %c32_68 = arith.constant 32 : index
    %c0_69 = arith.constant 0 : index
    %92 = vector.load %arg10[%c32_68, %c0_69] : memref<144x256xbf16, #tpu.memory_space<vmem>>, vector<16x256xbf16>
    tpu.vector_store %arg10[%c32_68, %c0_69], %91 {strides = array<i32>} : memref<144x256xbf16, #tpu.memory_space<vmem>>, vector<16x256xbf16>,
    %c0_70 = arith.constant 0 : index
    %c2_71 = arith.constant 2 : index
    %c0_72 = arith.constant 0 : index
    %93 = vector.load %arg8[%c0_70, %c2_71, %c0_72] : memref<16x18x16xbf16, #tpu.memory_space<vmem>>, vector<16x1x16xbf16>
    %94 = vector.shape_cast %93 : vector<16x1x16xbf16> to vector<16x16xbf16>
    %c0_73 = arith.constant 0 : index
    %c32_74 = arith.constant 32 : index
    %95 = vector.load %arg9[%c0_73, %c32_74] : memref<16x144xbf16, #tpu.memory_space<vmem>>, vector<16x16xbf16>
    tpu.vector_store %arg9[%c0_73, %c32_74], %94 {strides = array<i32>} : memref<16x144xbf16, #tpu.memory_space<vmem>>, vector<16x16xbf16>,
    %c0_75 = arith.constant 0 : index
    %c0_76 = arith.constant 0 : index
    %c1_77 = arith.constant 1 : index
    %c0_78 = arith.constant 0 : index
    %96 = vector.load %arg2[%c0_75, %c0_76, %c1_77, %c0_78] : memref<1x2x18x288xbf16, #tpu.memory_space<vmem>>, vector<1x1x16x256xbf16>
    %97 = vector.shape_cast %96 : vector<1x1x16x256xbf16> to vector<16x256xbf16>
    %c48 = arith.constant 48 : index
    %c0_79 = arith.constant 0 : index
    %98 = vector.load %arg10[%c48, %c0_79] : memref<144x256xbf16, #tpu.memory_space<vmem>>, vector<16x256xbf16>
    tpu.vector_store %arg10[%c48, %c0_79], %97 {strides = array<i32>} : memref<144x256xbf16, #tpu.memory_space<vmem>>, vector<16x256xbf16>,
    %c0_80 = arith.constant 0 : index
    %c3_81 = arith.constant 3 : index
    %c0_82 = arith.constant 0 : index
    %99 = vector.load %arg8[%c0_80, %c3_81, %c0_82] : memref<16x18x16xbf16, #tpu.memory_space<vmem>>, vector<16x1x16xbf16>
    %100 = vector.shape_cast %99 : vector<16x1x16xbf16> to vector<16x16xbf16>
    %c0_83 = arith.constant 0 : index
    %c48_84 = arith.constant 48 : index
    %101 = vector.load %arg9[%c0_83, %c48_84] : memref<16x144xbf16, #tpu.memory_space<vmem>>, vector<16x16xbf16>
    tpu.vector_store %arg9[%c0_83, %c48_84], %100 {strides = array<i32>} : memref<16x144xbf16, #tpu.memory_space<vmem>>, vector<16x16xbf16>,
    %c0_85 = arith.constant 0 : index
    %c0_86 = arith.constant 0 : index
    %c1_87 = arith.constant 1 : index
    %c16_88 = arith.constant 16 : index
    %102 = vector.load %arg2[%c0_85, %c0_86, %c1_87, %c16_88] : memref<1x2x18x288xbf16, #tpu.memory_space<vmem>>, vector<1x1x16x256xbf16>
    %103 = vector.shape_cast %102 : vector<1x1x16x256xbf16> to vector<16x256xbf16>
    %c64 = arith.constant 64 : index
    %c0_89 = arith.constant 0 : index
    %104 = vector.load %arg10[%c64, %c0_89] : memref<144x256xbf16, #tpu.memory_space<vmem>>, vector<16x256xbf16>
    tpu.vector_store %arg10[%c64, %c0_89], %103 {strides = array<i32>} : memref<144x256xbf16, #tpu.memory_space<vmem>>, vector<16x256xbf16>,
    %c0_90 = arith.constant 0 : index
    %c4_91 = arith.constant 4 : index
    %c0_92 = arith.constant 0 : index
    %105 = vector.load %arg8[%c0_90, %c4_91, %c0_92] : memref<16x18x16xbf16, #tpu.memory_space<vmem>>, vector<16x1x16xbf16>
    %106 = vector.shape_cast %105 : vector<16x1x16xbf16> to vector<16x16xbf16>
    %c0_93 = arith.constant 0 : index
    %c64_94 = arith.constant 64 : index
    %107 = vector.load %arg9[%c0_93, %c64_94] : memref<16x144xbf16, #tpu.memory_space<vmem>>, vector<16x16xbf16>
    tpu.vector_store %arg9[%c0_93, %c64_94], %106 {strides = array<i32>} : memref<16x144xbf16, #tpu.memory_space<vmem>>, vector<16x16xbf16>,
    %c0_95 = arith.constant 0 : index
    %c0_96 = arith.constant 0 : index
    %c1_97 = arith.constant 1 : index
    %c32_98 = arith.constant 32 : index
    %108 = vector.load %arg2[%c0_95, %c0_96, %c1_97, %c32_98] : memref<1x2x18x288xbf16, #tpu.memory_space<vmem>>, vector<1x1x16x256xbf16>
    %109 = vector.shape_cast %108 : vector<1x1x16x256xbf16> to vector<16x256xbf16>
    %c80 = arith.constant 80 : index
    %c0_99 = arith.constant 0 : index
    %110 = vector.load %arg10[%c80, %c0_99] : memref<144x256xbf16, #tpu.memory_space<vmem>>, vector<16x256xbf16>
    tpu.vector_store %arg10[%c80, %c0_99], %109 {strides = array<i32>} : memref<144x256xbf16, #tpu.memory_space<vmem>>, vector<16x256xbf16>,
    %c0_100 = arith.constant 0 : index
    %c5_101 = arith.constant 5 : index
    %c0_102 = arith.constant 0 : index
    %111 = vector.load %arg8[%c0_100, %c5_101, %c0_102] : memref<16x18x16xbf16, #tpu.memory_space<vmem>>, vector<16x1x16xbf16>
    %112 = vector.shape_cast %111 : vector<16x1x16xbf16> to vector<16x16xbf16>
    %c0_103 = arith.constant 0 : index
    %c80_104 = arith.constant 80 : index
    %113 = vector.load %arg9[%c0_103, %c80_104] : memref<16x144xbf16, #tpu.memory_space<vmem>>, vector<16x16xbf16>
    tpu.vector_store %arg9[%c0_103, %c80_104], %112 {strides = array<i32>} : memref<16x144xbf16, #tpu.memory_space<vmem>>, vector<16x16xbf16>,
    %c0_105 = arith.constant 0 : index
    %c0_106 = arith.constant 0 : index
    %c2_107 = arith.constant 2 : index
    %c0_108 = arith.constant 0 : index
    %114 = vector.load %arg2[%c0_105, %c0_106, %c2_107, %c0_108] : memref<1x2x18x288xbf16, #tpu.memory_space<vmem>>, vector<1x1x16x256xbf16>
    %115 = vector.shape_cast %114 : vector<1x1x16x256xbf16> to vector<16x256xbf16>
    %c96 = arith.constant 96 : index
    %c0_109 = arith.constant 0 : index
    %116 = vector.load %arg10[%c96, %c0_109] : memref<144x256xbf16, #tpu.memory_space<vmem>>, vector<16x256xbf16>
    tpu.vector_store %arg10[%c96, %c0_109], %115 {strides = array<i32>} : memref<144x256xbf16, #tpu.memory_space<vmem>>, vector<16x256xbf16>,
    %c0_110 = arith.constant 0 : index
    %c6_111 = arith.constant 6 : index
    %c0_112 = arith.constant 0 : index
    %117 = vector.load %arg8[%c0_110, %c6_111, %c0_112] : memref<16x18x16xbf16, #tpu.memory_space<vmem>>, vector<16x1x16xbf16>
    %118 = vector.shape_cast %117 : vector<16x1x16xbf16> to vector<16x16xbf16>
    %c0_113 = arith.constant 0 : index
    %c96_114 = arith.constant 96 : index
    %119 = vector.load %arg9[%c0_113, %c96_114] : memref<16x144xbf16, #tpu.memory_space<vmem>>, vector<16x16xbf16>
    tpu.vector_store %arg9[%c0_113, %c96_114], %118 {strides = array<i32>} : memref<16x144xbf16, #tpu.memory_space<vmem>>, vector<16x16xbf16>,
    %c0_115 = arith.constant 0 : index
    %c0_116 = arith.constant 0 : index
    %c2_117 = arith.constant 2 : index
    %c16_118 = arith.constant 16 : index
    %120 = vector.load %arg2[%c0_115, %c0_116, %c2_117, %c16_118] : memref<1x2x18x288xbf16, #tpu.memory_space<vmem>>, vector<1x1x16x256xbf16>
    %121 = vector.shape_cast %120 : vector<1x1x16x256xbf16> to vector<16x256xbf16>
    %c112 = arith.constant 112 : index
    %c0_119 = arith.constant 0 : index
    %122 = vector.load %arg10[%c112, %c0_119] : memref<144x256xbf16, #tpu.memory_space<vmem>>, vector<16x256xbf16>
    tpu.vector_store %arg10[%c112, %c0_119], %121 {strides = array<i32>} : memref<144x256xbf16, #tpu.memory_space<vmem>>, vector<16x256xbf16>,
    %c0_120 = arith.constant 0 : index
    %c7_121 = arith.constant 7 : index
    %c0_122 = arith.constant 0 : index
    %123 = vector.load %arg8[%c0_120, %c7_121, %c0_122] : memref<16x18x16xbf16, #tpu.memory_space<vmem>>, vector<16x1x16xbf16>
    %124 = vector.shape_cast %123 : vector<16x1x16xbf16> to vector<16x16xbf16>
    %c0_123 = arith.constant 0 : index
    %c112_124 = arith.constant 112 : index
    %125 = vector.load %arg9[%c0_123, %c112_124] : memref<16x144xbf16, #tpu.memory_space<vmem>>, vector<16x16xbf16>
    tpu.vector_store %arg9[%c0_123, %c112_124], %124 {strides = array<i32>} : memref<16x144xbf16, #tpu.memory_space<vmem>>, vector<16x16xbf16>,
    %c0_125 = arith.constant 0 : index
    %c0_126 = arith.constant 0 : index
    %c2_127 = arith.constant 2 : index
    %c32_128 = arith.constant 32 : index
    %126 = vector.load %arg2[%c0_125, %c0_126, %c2_127, %c32_128] : memref<1x2x18x288xbf16, #tpu.memory_space<vmem>>, vector<1x1x16x256xbf16>
    %127 = vector.shape_cast %126 : vector<1x1x16x256xbf16> to vector<16x256xbf16>
    %c128 = arith.constant 128 : index
    %c0_129 = arith.constant 0 : index
    %128 = vector.load %arg10[%c128, %c0_129] : memref<144x256xbf16, #tpu.memory_space<vmem>>, vector<16x256xbf16>
    tpu.vector_store %arg10[%c128, %c0_129], %127 {strides = array<i32>} : memref<144x256xbf16, #tpu.memory_space<vmem>>, vector<16x256xbf16>,
    %c0_130 = arith.constant 0 : index
    %c8_131 = arith.constant 8 : index
    %c0_132 = arith.constant 0 : index
    %129 = vector.load %arg8[%c0_130, %c8_131, %c0_132] : memref<16x18x16xbf16, #tpu.memory_space<vmem>>, vector<16x1x16xbf16>
    %130 = vector.shape_cast %129 : vector<16x1x16xbf16> to vector<16x16xbf16>
    %c0_133 = arith.constant 0 : index
    %c128_134 = arith.constant 128 : index
    %131 = vector.load %arg9[%c0_133, %c128_134] : memref<16x144xbf16, #tpu.memory_space<vmem>>, vector<16x16xbf16>
    tpu.vector_store %arg9[%c0_133, %c128_134], %130 {strides = array<i32>} : memref<16x144xbf16, #tpu.memory_space<vmem>>, vector<16x16xbf16>,
    %c0_135 = arith.constant 0 : index
    %c0_136 = arith.constant 0 : index
    %132 = vector.load %arg9[%c0_135, %c0_136] : memref<16x144xbf16, #tpu.memory_space<vmem>>, vector<16x144xbf16>
    %c0_137 = arith.constant 0 : index
    %c0_138 = arith.constant 0 : index
    %133 = vector.load %arg10[%c0_137, %c0_138] : memref<144x256xbf16, #tpu.memory_space<vmem>>, vector<144x256xbf16>
    %cst_139 = arith.constant dense<0.000000e+00> : vector<16x256xf32>
    %134 = tpu.matmul %132, %133, %cst_139 {dimension_numbers = #tpu.dot_dimension_numbers<[1], [0], [0], [1], [0, 0, 1, 1], [], []>} : vector<16x144xbf16>, vector<144x256xbf16>, vector<16x256xf32> -> vector<16x256xf32>
    %c0_140 = arith.constant 0 : index
    %c0_141 = arith.constant 0 : index
    %c0_142 = arith.constant 0 : index
    %c0_143 = arith.constant 0 : index
    %135 = vector.load %arg7[%c0_140, %c0_141, %c0_142, %c0_143] : memref<1x2x16x256xf32, #tpu.memory_space<vmem>>, vector<1x1x16x256xf32>
    %136 = vector.shape_cast %135 : vector<1x1x16x256xf32> to vector<16x256xf32>
    %137 = vector.shape_cast %134 : vector<16x256xf32> to vector<1x1x16x256xf32>
    tpu.vector_store %arg7[%c0_140, %c0_141, %c0_142, %c0_143], %137 {strides = array<i32>} : memref<1x2x16x256xf32, #tpu.memory_space<vmem>>, vector<1x1x16x256xf32>,
    %c0_144 = arith.constant 0 : index
    %c1_145 = arith.constant 1 : index
    %c0_146 = arith.constant 0 : index
    %c0_147 = arith.constant 0 : index
    %138 = vector.load %arg2[%c0_144, %c1_145, %c0_146, %c0_147] : memref<1x2x18x288xbf16, #tpu.memory_space<vmem>>, vector<1x1x16x256xbf16>
    %139 = vector.shape_cast %138 : vector<1x1x16x256xbf16> to vector<16x256xbf16>
    %c0_148 = arith.constant 0 : index
    %c0_149 = arith.constant 0 : index
    %140 = vector.load %arg10[%c0_148, %c0_149] : memref<144x256xbf16, #tpu.memory_space<vmem>>, vector<16x256xbf16>
    tpu.vector_store %arg10[%c0_148, %c0_149], %139 {strides = array<i32>} : memref<144x256xbf16, #tpu.memory_space<vmem>>, vector<16x256xbf16>,
    %c0_150 = arith.constant 0 : index
    %c9_151 = arith.constant 9 : index
    %c0_152 = arith.constant 0 : index
    %141 = vector.load %arg8[%c0_150, %c9_151, %c0_152] : memref<16x18x16xbf16, #tpu.memory_space<vmem>>, vector<16x1x16xbf16>
    %142 = vector.shape_cast %141 : vector<16x1x16xbf16> to vector<16x16xbf16>
    %c0_153 = arith.constant 0 : index
    %c0_154 = arith.constant 0 : index
    %143 = vector.load %arg9[%c0_153, %c0_154] : memref<16x144xbf16, #tpu.memory_space<vmem>>, vector<16x16xbf16>
    tpu.vector_store %arg9[%c0_153, %c0_154], %142 {strides = array<i32>} : memref<16x144xbf16, #tpu.memory_space<vmem>>, vector<16x16xbf16>,
    %c0_155 = arith.constant 0 : index
    %c1_156 = arith.constant 1 : index
    %c0_157 = arith.constant 0 : index
    %c16_158 = arith.constant 16 : index
    %144 = vector.load %arg2[%c0_155, %c1_156, %c0_157, %c16_158] : memref<1x2x18x288xbf16, #tpu.memory_space<vmem>>, vector<1x1x16x256xbf16>
    %145 = vector.shape_cast %144 : vector<1x1x16x256xbf16> to vector<16x256xbf16>
    %c16_159 = arith.constant 16 : index
    %c0_160 = arith.constant 0 : index
    %146 = vector.load %arg10[%c16_159, %c0_160] : memref<144x256xbf16, #tpu.memory_space<vmem>>, vector<16x256xbf16>
    tpu.vector_store %arg10[%c16_159, %c0_160], %145 {strides = array<i32>} : memref<144x256xbf16, #tpu.memory_space<vmem>>, vector<16x256xbf16>,
    %c0_161 = arith.constant 0 : index
    %c10_162 = arith.constant 10 : index
    %c0_163 = arith.constant 0 : index
    %147 = vector.load %arg8[%c0_161, %c10_162, %c0_163] : memref<16x18x16xbf16, #tpu.memory_space<vmem>>, vector<16x1x16xbf16>
    %148 = vector.shape_cast %147 : vector<16x1x16xbf16> to vector<16x16xbf16>
    %c0_164 = arith.constant 0 : index
    %c16_165 = arith.constant 16 : index
    %149 = vector.load %arg9[%c0_164, %c16_165] : memref<16x144xbf16, #tpu.memory_space<vmem>>, vector<16x16xbf16>
    tpu.vector_store %arg9[%c0_164, %c16_165], %148 {strides = array<i32>} : memref<16x144xbf16, #tpu.memory_space<vmem>>, vector<16x16xbf16>,
    %c0_166 = arith.constant 0 : index
    %c1_167 = arith.constant 1 : index
    %c0_168 = arith.constant 0 : index
    %c32_169 = arith.constant 32 : index
    %150 = vector.load %arg2[%c0_166, %c1_167, %c0_168, %c32_169] : memref<1x2x18x288xbf16, #tpu.memory_space<vmem>>, vector<1x1x16x256xbf16>
    %151 = vector.shape_cast %150 : vector<1x1x16x256xbf16> to vector<16x256xbf16>
    %c32_170 = arith.constant 32 : index
    %c0_171 = arith.constant 0 : index
    %152 = vector.load %arg10[%c32_170, %c0_171] : memref<144x256xbf16, #tpu.memory_space<vmem>>, vector<16x256xbf16>
    tpu.vector_store %arg10[%c32_170, %c0_171], %151 {strides = array<i32>} : memref<144x256xbf16, #tpu.memory_space<vmem>>, vector<16x256xbf16>,
    %c0_172 = arith.constant 0 : index
    %c11_173 = arith.constant 11 : index
    %c0_174 = arith.constant 0 : index
    %153 = vector.load %arg8[%c0_172, %c11_173, %c0_174] : memref<16x18x16xbf16, #tpu.memory_space<vmem>>, vector<16x1x16xbf16>
    %154 = vector.shape_cast %153 : vector<16x1x16xbf16> to vector<16x16xbf16>
    %c0_175 = arith.constant 0 : index
    %c32_176 = arith.constant 32 : index
    %155 = vector.load %arg9[%c0_175, %c32_176] : memref<16x144xbf16, #tpu.memory_space<vmem>>, vector<16x16xbf16>
    tpu.vector_store %arg9[%c0_175, %c32_176], %154 {strides = array<i32>} : memref<16x144xbf16, #tpu.memory_space<vmem>>, vector<16x16xbf16>,
    %c0_177 = arith.constant 0 : index
    %c1_178 = arith.constant 1 : index
    %c1_179 = arith.constant 1 : index
    %c0_180 = arith.constant 0 : index
    %156 = vector.load %arg2[%c0_177, %c1_178, %c1_179, %c0_180] : memref<1x2x18x288xbf16, #tpu.memory_space<vmem>>, vector<1x1x16x256xbf16>
    %157 = vector.shape_cast %156 : vector<1x1x16x256xbf16> to vector<16x256xbf16>
    %c48_181 = arith.constant 48 : index
    %c0_182 = arith.constant 0 : index
    %158 = vector.load %arg10[%c48_181, %c0_182] : memref<144x256xbf16, #tpu.memory_space<vmem>>, vector<16x256xbf16>
    tpu.vector_store %arg10[%c48_181, %c0_182], %157 {strides = array<i32>} : memref<144x256xbf16, #tpu.memory_space<vmem>>, vector<16x256xbf16>,
    %c0_183 = arith.constant 0 : index
    %c12_184 = arith.constant 12 : index
    %c0_185 = arith.constant 0 : index
    %159 = vector.load %arg8[%c0_183, %c12_184, %c0_185] : memref<16x18x16xbf16, #tpu.memory_space<vmem>>, vector<16x1x16xbf16>
    %160 = vector.shape_cast %159 : vector<16x1x16xbf16> to vector<16x16xbf16>
    %c0_186 = arith.constant 0 : index
    %c48_187 = arith.constant 48 : index
    %161 = vector.load %arg9[%c0_186, %c48_187] : memref<16x144xbf16, #tpu.memory_space<vmem>>, vector<16x16xbf16>
    tpu.vector_store %arg9[%c0_186, %c48_187], %160 {strides = array<i32>} : memref<16x144xbf16, #tpu.memory_space<vmem>>, vector<16x16xbf16>,
    %c0_188 = arith.constant 0 : index
    %c1_189 = arith.constant 1 : index
    %c1_190 = arith.constant 1 : index
    %c16_191 = arith.constant 16 : index
    %162 = vector.load %arg2[%c0_188, %c1_189, %c1_190, %c16_191] : memref<1x2x18x288xbf16, #tpu.memory_space<vmem>>, vector<1x1x16x256xbf16>
    %163 = vector.shape_cast %162 : vector<1x1x16x256xbf16> to vector<16x256xbf16>
    %c64_192 = arith.constant 64 : index
    %c0_193 = arith.constant 0 : index
    %164 = vector.load %arg10[%c64_192, %c0_193] : memref<144x256xbf16, #tpu.memory_space<vmem>>, vector<16x256xbf16>
    tpu.vector_store %arg10[%c64_192, %c0_193], %163 {strides = array<i32>} : memref<144x256xbf16, #tpu.memory_space<vmem>>, vector<16x256xbf16>,
    %c0_194 = arith.constant 0 : index
    %c13_195 = arith.constant 13 : index
    %c0_196 = arith.constant 0 : index
    %165 = vector.load %arg8[%c0_194, %c13_195, %c0_196] : memref<16x18x16xbf16, #tpu.memory_space<vmem>>, vector<16x1x16xbf16>
    %166 = vector.shape_cast %165 : vector<16x1x16xbf16> to vector<16x16xbf16>
    %c0_197 = arith.constant 0 : index
    %c64_198 = arith.constant 64 : index
    %167 = vector.load %arg9[%c0_197, %c64_198] : memref<16x144xbf16, #tpu.memory_space<vmem>>, vector<16x16xbf16>
    tpu.vector_store %arg9[%c0_197, %c64_198], %166 {strides = array<i32>} : memref<16x144xbf16, #tpu.memory_space<vmem>>, vector<16x16xbf16>,
    %c0_199 = arith.constant 0 : index
    %c1_200 = arith.constant 1 : index
    %c1_201 = arith.constant 1 : index
    %c32_202 = arith.constant 32 : index
    %168 = vector.load %arg2[%c0_199, %c1_200, %c1_201, %c32_202] : memref<1x2x18x288xbf16, #tpu.memory_space<vmem>>, vector<1x1x16x256xbf16>
    %169 = vector.shape_cast %168 : vector<1x1x16x256xbf16> to vector<16x256xbf16>
    %c80_203 = arith.constant 80 : index
    %c0_204 = arith.constant 0 : index
    %170 = vector.load %arg10[%c80_203, %c0_204] : memref<144x256xbf16, #tpu.memory_space<vmem>>, vector<16x256xbf16>
    tpu.vector_store %arg10[%c80_203, %c0_204], %169 {strides = array<i32>} : memref<144x256xbf16, #tpu.memory_space<vmem>>, vector<16x256xbf16>,
    %c0_205 = arith.constant 0 : index
    %c14_206 = arith.constant 14 : index
    %c0_207 = arith.constant 0 : index
    %171 = vector.load %arg8[%c0_205, %c14_206, %c0_207] : memref<16x18x16xbf16, #tpu.memory_space<vmem>>, vector<16x1x16xbf16>
    %172 = vector.shape_cast %171 : vector<16x1x16xbf16> to vector<16x16xbf16>
    %c0_208 = arith.constant 0 : index
    %c80_209 = arith.constant 80 : index
    %173 = vector.load %arg9[%c0_208, %c80_209] : memref<16x144xbf16, #tpu.memory_space<vmem>>, vector<16x16xbf16>
    tpu.vector_store %arg9[%c0_208, %c80_209], %172 {strides = array<i32>} : memref<16x144xbf16, #tpu.memory_space<vmem>>, vector<16x16xbf16>,
    %c0_210 = arith.constant 0 : index
    %c1_211 = arith.constant 1 : index
    %c2_212 = arith.constant 2 : index
    %c0_213 = arith.constant 0 : index
    %174 = vector.load %arg2[%c0_210, %c1_211, %c2_212, %c0_213] : memref<1x2x18x288xbf16, #tpu.memory_space<vmem>>, vector<1x1x16x256xbf16>
    %175 = vector.shape_cast %174 : vector<1x1x16x256xbf16> to vector<16x256xbf16>
    %c96_214 = arith.constant 96 : index
    %c0_215 = arith.constant 0 : index
    %176 = vector.load %arg10[%c96_214, %c0_215] : memref<144x256xbf16, #tpu.memory_space<vmem>>, vector<16x256xbf16>
    tpu.vector_store %arg10[%c96_214, %c0_215], %175 {strides = array<i32>} : memref<144x256xbf16, #tpu.memory_space<vmem>>, vector<16x256xbf16>,
    %c0_216 = arith.constant 0 : index
    %c15_217 = arith.constant 15 : index
    %c0_218 = arith.constant 0 : index
    %177 = vector.load %arg8[%c0_216, %c15_217, %c0_218] : memref<16x18x16xbf16, #tpu.memory_space<vmem>>, vector<16x1x16xbf16>
    %178 = vector.shape_cast %177 : vector<16x1x16xbf16> to vector<16x16xbf16>
    %c0_219 = arith.constant 0 : index
    %c96_220 = arith.constant 96 : index
    %179 = vector.load %arg9[%c0_219, %c96_220] : memref<16x144xbf16, #tpu.memory_space<vmem>>, vector<16x16xbf16>
    tpu.vector_store %arg9[%c0_219, %c96_220], %178 {strides = array<i32>} : memref<16x144xbf16, #tpu.memory_space<vmem>>, vector<16x16xbf16>,
    %c0_221 = arith.constant 0 : index
    %c1_222 = arith.constant 1 : index
    %c2_223 = arith.constant 2 : index
    %c16_224 = arith.constant 16 : index
    %180 = vector.load %arg2[%c0_221, %c1_222, %c2_223, %c16_224] : memref<1x2x18x288xbf16, #tpu.memory_space<vmem>>, vector<1x1x16x256xbf16>
    %181 = vector.shape_cast %180 : vector<1x1x16x256xbf16> to vector<16x256xbf16>
    %c112_225 = arith.constant 112 : index
    %c0_226 = arith.constant 0 : index
    %182 = vector.load %arg10[%c112_225, %c0_226] : memref<144x256xbf16, #tpu.memory_space<vmem>>, vector<16x256xbf16>
    tpu.vector_store %arg10[%c112_225, %c0_226], %181 {strides = array<i32>} : memref<144x256xbf16, #tpu.memory_space<vmem>>, vector<16x256xbf16>,
    %c0_227 = arith.constant 0 : index
    %c16_228 = arith.constant 16 : index
    %c0_229 = arith.constant 0 : index
    %183 = vector.load %arg8[%c0_227, %c16_228, %c0_229] : memref<16x18x16xbf16, #tpu.memory_space<vmem>>, vector<16x1x16xbf16>
    %184 = vector.shape_cast %183 : vector<16x1x16xbf16> to vector<16x16xbf16>
    %c0_230 = arith.constant 0 : index
    %c112_231 = arith.constant 112 : index
    %185 = vector.load %arg9[%c0_230, %c112_231] : memref<16x144xbf16, #tpu.memory_space<vmem>>, vector<16x16xbf16>
    tpu.vector_store %arg9[%c0_230, %c112_231], %184 {strides = array<i32>} : memref<16x144xbf16, #tpu.memory_space<vmem>>, vector<16x16xbf16>,
    %c0_232 = arith.constant 0 : index
    %c1_233 = arith.constant 1 : index
    %c2_234 = arith.constant 2 : index
    %c32_235 = arith.constant 32 : index
    %186 = vector.load %arg2[%c0_232, %c1_233, %c2_234, %c32_235] : memref<1x2x18x288xbf16, #tpu.memory_space<vmem>>, vector<1x1x16x256xbf16>
    %187 = vector.shape_cast %186 : vector<1x1x16x256xbf16> to vector<16x256xbf16>
    %c128_236 = arith.constant 128 : index
    %c0_237 = arith.constant 0 : index
    %188 = vector.load %arg10[%c128_236, %c0_237] : memref<144x256xbf16, #tpu.memory_space<vmem>>, vector<16x256xbf16>
    tpu.vector_store %arg10[%c128_236, %c0_237], %187 {strides = array<i32>} : memref<144x256xbf16, #tpu.memory_space<vmem>>, vector<16x256xbf16>,
    %c0_238 = arith.constant 0 : index
    %c17 = arith.constant 17 : index
    %c0_239 = arith.constant 0 : index
    %189 = vector.load %arg8[%c0_238, %c17, %c0_239] : memref<16x18x16xbf16, #tpu.memory_space<vmem>>, vector<16x1x16xbf16>
    %190 = vector.shape_cast %189 : vector<16x1x16xbf16> to vector<16x16xbf16>
    %c0_240 = arith.constant 0 : index
    %c128_241 = arith.constant 128 : index
    %191 = vector.load %arg9[%c0_240, %c128_241] : memref<16x144xbf16, #tpu.memory_space<vmem>>, vector<16x16xbf16>
    tpu.vector_store %arg9[%c0_240, %c128_241], %190 {strides = array<i32>} : memref<16x144xbf16, #tpu.memory_space<vmem>>, vector<16x16xbf16>,
    %c0_242 = arith.constant 0 : index
    %c0_243 = arith.constant 0 : index
    %192 = vector.load %arg9[%c0_242, %c0_243] : memref<16x144xbf16, #tpu.memory_space<vmem>>, vector<16x144xbf16>
    %c0_244 = arith.constant 0 : index
    %c0_245 = arith.constant 0 : index
    %193 = vector.load %arg10[%c0_244, %c0_245] : memref<144x256xbf16, #tpu.memory_space<vmem>>, vector<144x256xbf16>
    %cst_246 = arith.constant dense<0.000000e+00> : vector<16x256xf32>
    %194 = tpu.matmul %192, %193, %cst_246 {dimension_numbers = #tpu.dot_dimension_numbers<[1], [0], [0], [1], [0, 0, 1, 1], [], []>} : vector<16x144xbf16>, vector<144x256xbf16>, vector<16x256xf32> -> vector<16x256xf32>
    %c0_247 = arith.constant 0 : index
    %c1_248 = arith.constant 1 : index
    %c0_249 = arith.constant 0 : index
    %c0_250 = arith.constant 0 : index
    %195 = vector.load %arg7[%c0_247, %c1_248, %c0_249, %c0_250] : memref<1x2x16x256xf32, #tpu.memory_space<vmem>>, vector<1x1x16x256xf32>
    %196 = vector.shape_cast %195 : vector<1x1x16x256xf32> to vector<16x256xf32>
    %197 = vector.shape_cast %194 : vector<16x256xf32> to vector<1x1x16x256xf32>
    tpu.vector_store %arg7[%c0_247, %c1_248, %c0_249, %c0_250], %197 {strides = array<i32>} : memref<1x2x16x256xf32, #tpu.memory_space<vmem>>, vector<1x1x16x256xf32>,
    return
  }
  func.func @transform_0(%arg0: i32) -> (i32, i32, i32) {
    %c0_i32 = arith.constant 0 : i32
    %c0_i32_0 = arith.constant 0 : i32
    %c0_i32_1 = arith.constant 0 : i32
    return %arg0, %c0_i32, %c0_i32_0 : i32, i32, i32
  }
  func.func @transform_1(%arg0: i32) -> (i32, i32, i32, i32) {
    %c0_i32 = arith.constant 0 : i32
    %c0_i32_0 = arith.constant 0 : i32
    %c0_i32_1 = arith.constant 0 : i32
    %c0_i32_2 = arith.constant 0 : i32
    return %arg0, %c0_i32, %c0_i32_0, %c0_i32_1 : i32, i32, i32, i32
  }
  func.func @transform_2(%arg0: i32) -> (i32, i32) {
    %c0_i32 = arith.constant 0 : i32
    %c0_i32_0 = arith.constant 0 : i32
    %c0_i32_1 = arith.constant 0 : i32
    return %c0_i32, %c0_i32_0 : i32, i32
  }
  func.func @transform_3(%arg0: i32) -> (i32, i32) {
    %c0_i32 = arith.constant 0 : i32
    %c0_i32_0 = arith.constant 0 : i32
    %c0_i32_1 = arith.constant 0 : i32
    return %c0_i32, %c0_i32_0 : i32, i32
  }
  func.func @transform_4(%arg0: i32) -> (i32, i32) {
    %c0_i32 = arith.constant 0 : i32
    %c0_i32_0 = arith.constant 0 : i32
    %c0_i32_1 = arith.constant 0 : i32
    return %c0_i32, %c0_i32_0 : i32, i32
  }
  func.func @transform_5(%arg0: i32) -> (i32, i32) {
    %c0_i32 = arith.constant 0 : i32
    %c0_i32_0 = arith.constant 0 : i32
    %c0_i32_1 = arith.constant 0 : i32
    return %c0_i32, %c0_i32_0 : i32, i32
  }
  func.func @transform_6(%arg0: i32) -> (i32, i32, i32, i32) {
    %c0_i32 = arith.constant 0 : i32
    %c0_i32_0 = arith.constant 0 : i32
    %c0_i32_1 = arith.constant 0 : i32
    %c0_i32_2 = arith.constant 0 : i32
    return %arg0, %c0_i32, %c0_i32_0, %c0_i32_1 : i32, i32, i32, i32
  }
}

</mosaic_0001>

<bundles_post_ra>
// kernel: inv2d_forward.1
= control target key start
LH: loop header
LB: loop body
LE: loop exit
PB: predicated region body
PF: predicated region fallthrough
CT: control target
= control target key end

     0   :  { %s4566_s21 = smov 0   ;;  %s5646_s0 = inlined_call_operand.vmem [shape: bf16[2,32,256], index: 0, kind: input, shape index: {}]   ;;  %s5647_s1 = inlined_call_operand.vmem [shape: bf16[2,2,18,288], index: 1, kind: input, shape index: {}]   ;;  %s5648_s2 = inlined_call_operand.vmem [shape: bf16[16,32], index: 2, kind: input, shape index: {}]   ;;  %s5649_s3 = inlined_call_operand.vmem [shape: f32[16,1], index: 3, kind: input, shape index: {}]   ;;  %s5650_s4 = inlined_call_operand.vmem [shape: bf16[18,16], index: 4, kind: input, shape index: {}]   ;;  %s5651_s5 = inlined_call_operand.vmem [shape: f32[18,1], index: 5, kind: input, shape index: {}]   ;;  %s5652_s6 = inlined_call_operand.vmem [shape: f32[2,2,16,256], index: 6, kind: output, shape index: {}]  }
   0x1 LB: > { %s3698_s22 = sadd.s32 4294967295, %s4521_s21   ;;  %p3702_p0 = scmp.ge.s32.totalorder %s4521_s21, 1  ;;  %s4521_s21 = sphi %s4566_s21, %s16_s21  }
   0x2   : > { %p222_p1 = scmp.lt.s32.totalorder %s4521_s21, 3 }
   0x4   : > { %p223_p2 = pnand %p3702_p0, %p222_p1 }
   0x6   : > { %226 = sbr.rel (%p223_p2) target bundleno = 1134 (0x46e), region = 44 }
   0xd   : > { %p257_p3 = scmp.lt.s32.totalorder %s3698_s22, 1  ;;  %v4523_v0 = vmov 0   ;;  %v279_v1 = vld [vmem:[%s5649_s3] sm:$0xff]  ;;  %v280_v2 = vld [vmem:[%s5649_s3 + $0x8] sm:$0xff]  ;;  %v370_v3 = vld [vmem:[%s5651_s5 + $0x10] sm:$0x3] }
   0xe   : > { %352 = vmatprep.mubr.bf16.mxu0 %v4523_v0  ;;  %4165 = vset.pattern.permute.xlu0 %v4523_v0  ;;  %vm316_vm0 = vcmask 261120   ;;  %v4173_v8 = vld [vmem:[%s5648_s2] sm:$0xff]   ;;  %v369_v10 = vld [vmem:[%s5651_s5 + $0x8] sm:$0xff]  ;;  %s4524_s19 = smov 112   ;;  %vm394_vm1 = vcmask 130048   ;;  %s4525_s26 = smov 96  }
   0xf   : > { %s5665_s22 = smov (!%p257_p3, %s3698_s22), 1  ;;  %283 = vperm.xlu0 %4165, %v279_v1   ;;  %433 = vmatprep.mubr.bf16.mxu1 %v4523_v0  ;;  %v368_v9 = vld [vmem:[%s5651_s5] sm:$0xff]  ;;  %v4175_v34 = vld [vmem:[%s5650_s4 + $0x8] ss:$0 sps:$4 sm:$0x11]   ;;  %vm824_vm2 = vcmask 916480  }
  0x10   : > { %4166 = vset.pattern.permute.xlu1 %v4523_v0  ;;  %s4140_s27 = sshll.u32 %s5665_s22, 5  ;;  %s4148_s28 = smul.u32 72, %s5665_s22  ;;  %v4174_v33 = vld [vmem:[%s5650_s4] sm:$0xff]   ;;  %vm467_vm3 = vcmask 125952   ;;  %vm470_vm4 = vcmask 122880   ;;  %vm1642_vm6 = vcmask 1046528  }
  0x11   : > { %s261_s7 = scalar_lea.vmem %s5646_s0, %s4140_s27  ;;  %373 = vperm.xlu1 %4166, %v368_v9   ;;  %s4526_s27 = smov 80   ;;  %vm1105_vm5 = vsmask.f32 7424  ;;  %vm764_vm7 = vcmask 1041409   ;;  %vm767_vm8 = vcmask 1042434   ;;  %vm770_vm9 = vcmask 1043459  }
  0x12   : > { %v4167_v4 = vld [vmem:[%s261_s7 + $0x4] ss:$8 sps:$4 sm:$0xff]   ;;  %s4597_s12 = scalar_lea.vmem %s5647_s1, %s4148_s28  ;;  %v4169_v5 = vld [vmem:[%s261_s7] ss:$8 sps:$4 sm:$0xff]   ;;  %v4170_v6 = vld [vmem:[%s261_s7 + $0x14] ss:$8 sps:$4 sm:$0xff]  }
  0x13   : > { %288 = vperm.xlu0 %4165, %v280_v2   ;;  %320 = vmatprep.subr.bf16.mxu0 %v4167_v4  ;;  %v4172_v7 = vld [vmem:[%s261_s7 + $0x10] ss:$8 sps:$4 sm:$0xff]   ;;  %v4177_v11 = vld [vmem:[%s4597_s12 + $0x8] ss:$12 sps:$4 sm:$0xff]   ;;  %v801_v13 = vld [vmem:[%s4597_s12] sm:$0xff]  ;;  %s4527_s28 = smov 64  }
  0x14   : > { %321 = vmatpush1.bf16.msra.mxu0 %v4169_v5  ;;  %v3929_v12 = vld [vmem:[%s4597_s12 + $0x24] sm:$0xff]  ;;  %v4612_v14 = vld [vmem:[%s4597_s12 + $0xc] sm:$0xff]  ;;  %s4528_s29 = smov 48   ;;  %s4529_s30 = smov 32   ;;  %vm773_vm10 = vcmask 1044484   ;;  %vm776_vm11 = vcmask 1045509  }
  0x15   : > { %322 = vmatprep.subr.bf16.mxu0 %v4170_v6  ;;  %v4615_v15 = vld [vmem:[%s4597_s12 + $0x30] sm:$0xff]  ;;  %v4179_v17 = vld [vmem:[%s4597_s12 + $0x2c] ss:$12 sps:$4 sm:$0xff]   ;;  %378 = vperm.xlu1 %4166, %v369_v10   ;;  %v4626_v19 = vcombine.high %v801_v13, %v4612_v14  ;;  %v4638_v20 = vcombine.low %v801_v13, %v4612_v14  ;;  %s4530_s7 = smov 16   ;;  %vm779_vm12 = vcmask 1046534   ;;  %vm5654_vm13 = vcmask 1047559  }
  0x16   : > { %v4619_v16 = vcombine.high %v3929_v12, %v4615_v15  ;;  %v4623_v18 = vcombine.low %v3929_v12, %v4615_v15  ;;  %v4184_v4 = vld [vmem:[%s4597_s12 + $0x8] ss:$12 sps:$4 sm:$0xff]   ;;  %v4185_v6 = vld [vmem:[%s4597_s12 + $0x20] ss:$0 sps:$4 sm:$0x11]   ;;  %vm5653_vm14 = vcmask 785408  }
  0x17   : > { %383 = vperm.xlu0 %4165, %v370_v3   ;;  %v1302_v5 = vshll.u32 %v4184_v4, 16  ;;  %v1300_v9 = vshrl.u32 %v4184_v4, 16  ;;  %v4188_v13 = vld [vmem:[%s4597_s12 + $0x44] ss:$0 sps:$4 sm:$0x11]   ;;  %vm943_vm15 = vcmask 261248  }
  0x18   : > { %323 = vmatpush1.bf16.msra.mxu0 %v4172_v7  ;;  %v1252_v7 = vld [vmem:[%s4597_s12 + $0x18] sm:$0x11]  ;;  %s4141_s8 = sshll.u32 %s5665_s22, 6 }
  0x19   : > { %3583 = vmatprep.subr.bf16.mxu0 %v4619_v16  ;;  %820 = vrot.lane.b32.xlu1 %v4626_v19, %s4524_s19  ;;  %v1304_v10 = vrot.slane %v1302_v5, 1  ;;  %v3804_v12 = vcombine.high %v1252_v7, %v1252_v7  ;;  %s271_s11 = scalar_lea.vmem %s5652_s6, %s4141_s8 }
  0x1b   : > { %3713 = vmatmul.mubr.msk.bf16.vlgmr.msra.gmra.mrb[0].mxu0 %vm316_vm0, %v4173_v8  ;;  %822 = vrot.lane.b32.xlu0 %v4177_v11, %s4524_s19  ;;  %v4187_v8 = vld [vmem:[%s4597_s12 + $0x2c] ss:$12 sps:$4 sm:$0xff]   ;;  %v1307_v11 = vshll.u32 %v4185_v6, 16  ;;  %vm1087_vm0 = vcmask 392448  }
  0x1c   : > { %3584 = vmatpush1.bf16.msra.mxu0 %v4623_v18 }
  0x1d   : > { %2303 = vrot.lane.b32.xlu1 %v4619_v16, %s4524_s19 }
  0x1f   : > { %2305 = vrot.lane.b32.xlu0 %v4179_v17, %s4524_s19  ;;  %v1290_v17 = vshll.u32 %v4626_v19, 16 }
  0x21   : > { %818 = vrot.lane.b32.xlu1 %v4638_v20, %s4524_s19 }
  0x23   : > { %2301 = vrot.lane.b32.xlu0 %v4623_v18, %s4524_s19 }
  0x27   : > { %964 = vrot.lane.b32.xlu0 %v4626_v19, %s4525_s26 }
  0x8e   : > { %v284_v21 = vpop.permute.xlu0 %283 }
  0x90   : > { %v374_v35 = vpop.permute.xlu1 %373 }
  0x92   : > { %v289_v24 = vpop.permute.xlu0 %288 }
  0x94   : > { %v379_v37 = vpop.permute.xlu1 %378 }
  0x96   : > { %v384_v36 = vpop.permute.xlu0 %383 }
  0x98   : > { %v821_v38 = vpop.permute.xlu1 %820 }
  0x9a   : > { %v823_v39 = vpop.permute.xlu0 %822 }
  0x9b   : > { %v826_v40 = vsel %vm824_vm2, %v821_v38, %v823_v39 }
  0x9c   : > { %v2304_v41 = vpop.permute.xlu1 %2303 }
  0x9e   : > { %v2306_v42 = vpop.permute.xlu0 %2305 }
  0x9f   : > { %v2308_v43 = vsel %vm824_vm2, %v2304_v41, %v2306_v42  ;;  %v4191_v42 = vld [vmem:[%s4597_s12 + $0x20] ss:$0 sps:$4 sm:$0x11]  }
  0xa0   : > { %3585 = vmatprep.subr.bf16.mxu0 %v2308_v43  ;;  %v819_v44 = vpop.permute.xlu1 %818 }
  0xa1   : > { %v825_v46 = vsel %vm824_vm2, %v819_v44, %v821_v38  ;;  %v1278_v38 = vshll.u32 %v4638_v20, 16 }
  0xa2   : > { %v2302_v45 = vpop.permute.xlu0 %2301 }
  0xa3   : > { %v2307_v47 = vsel %vm824_vm2, %v2302_v45, %v2304_v41  ;;  %v2765_v45 = vshrl.u32 %v4619_v16, 16 }
  0xa4   : > { %3586 = vmatpush1.bf16.msra.mxu0 %v2307_v47  ;;  %v1441_v47 = vld [vmem:[%s4597_s12 + $0x18] sm:$0x11] }
  0xee   : > { %v354_v22 = vpop.f32.mrb[0].mxu0 }
  0xef   : > { %v356_v23 = vpop.f32.mrb[1].mxu0  ;;  %v355_v26 = vadd.f32 %v354_v22, %v284_v21  ;;  %v4182_v22 = vld [vmem:[%s4597_s12 + $0x8] ss:$12 sps:$4 sm:$0xff]  }
  0xf0   : > { %v358_v25 = vpop.f32.mrb[2].mxu0  ;;  %v357_v29 = vadd.f32 %v356_v23, %v284_v21  ;;  %v2779_v21 = vshll.u32 %v4187_v8, 16  ;;  %v1305_v23 = vor.u32 %v1304_v10, %v1300_v9 }
  0xf1   : > { %v359_v27 = vadd.f32 %v358_v25, %v289_v24  ;;  %v360_v28 = vpop.f32.mrb[3].mxu0  ;;  %v1309_v25 = vrot.slane %v1307_v11, 1 }
  0xf2   : > { %v361_v30 = vadd.f32 %v360_v28, %v289_v24  ;;  %v4002_v24 = vld [vmem:[%s4597_s12 + $0x3c] sm:$0x11]  ;;  %v1288_v28 = vshrl.u32 %v4626_v19, 16 }
  0xf3   : > { %v366_v31 = vpack.c.bf16 %v359_v27, %v355_v26  ;;  %v1295_v26 = vshll.u32 %v3804_v12, 16  ;;  %v2784_v27 = vshll.u32 %v4188_v13, 16  ;;  %v1310_v39 = vsel %vm1105_vm5, %v1305_v23, %v1309_v25  ;;  %v4769_v25 = vld [vmem:[%s4597_s12] sm:$0xee] }
  0xf4   : > { %v367_v32 = vpack.c.bf16 %v361_v30, %v357_v29  ;;  %v1292_v29 = vrot.slane %v1290_v17, 1  ;;  %v2777_v30 = vshrl.u32 %v4187_v8, 16 }
  0xf5   : > { %v2786_v41 = vrot.slane %v2784_v27, 1 }
  0xf6   : > { %401 = vmatprep.subr.bf16.mxu1 %v367_v32  ;;  %v4190_v32 = vld [vmem:[%s4597_s12 + $0x8] ss:$12 sps:$4 sm:$0xff]   ;;  %v4736_v43 = vor.u32 %v1292_v29, %v1288_v28  ;;  %v4773_v29 = vld [vmem:[%s4597_s12 + $0x18] sm:$0x11] }
  0xf7   : > { %402 = vmatpush1.bf16.msra.mxu1 %v366_v31  ;;  %v2781_v31 = vrot.slane %v2779_v21, 1 }
  0xf8   : > { %2111 = vmatprep.subr.bf16.mxu1 %v4626_v19  ;;  %v3803_v19 = vcombine.low %v1252_v7, %v1252_v7 }
  0xf9   : > { %v2782_v44 = vor.u32 %v2781_v31, %v2777_v30 }
  0xfa   : > { %3716 = vmatmul.mubr.msk.bf16.vlgmr.msra.gmra.mrb[0].mxu1 %vm394_vm1, %v4174_v33  ;;  %v4183_v33 = vld [vmem:[%s4597_s12 + $0x2c] ss:$12 sps:$4 sm:$0xff]  }
  0xfb   : > { %443 = vmatprep.mubr.bf16.mxu1 %v4523_v0  ;;  %2112 = vmatpush1.bf16.msra.mxu1 %v4638_v20 }
  0xfc   : > { %2113 = vmatprep.subr.bf16.mxu1 %v826_v40  ;;  %v1297_v40 = vrot.slane %v1295_v26, 1 }
  0xff   : > { %2114 = vmatpush1.bf16.msra.mxu1 %v825_v46  ;;  %v1491_v46 = vshll.u32 %v4190_v32, 16 }
 0x102   : > { %3717 = vmatmul.mubr.msk.bf16.gmra.mrb[4].mxu1 %vm394_vm1, %v4175_v34  ;;  %v4008_v34 = vcombine.high %v4002_v24, %v4002_v24 }
 0x1cd   : > { %v435_v48 = vpop.f32.mrb[0].mxu1 }
 0x1ce   : > { %v436_v49 = vadd.f32 %v435_v48, %v374_v35  ;;  %v437_v50 = vpop.f32.mrb[1].mxu1  ;;  %v4193_v48 = vld [vmem:[%s4597_s12 + $0x2c] ss:$12 sps:$4 sm:$0xff]  }
 0x1cf   : > { %v438_v51 = vadd.f32 %v437_v50, %v374_v35  ;;  %v439_v52 = vpop.f32.mrb[2].mxu1  ;;  %v2767_v35 = vshll.u32 %v4619_v16, 16  ;;  %v2772_v50 = vshll.u32 %v4008_v34, 16  ;;  %v2965_v9 = vshrl.u32 %v4193_v48, 16 }
 0x1d0   : > { %v4142_v53 = vpack.c.bf16 %v436_v49, %v436_v49  ;;  %v440_v54 = vadd.f32 %v439_v52, %v379_v37  ;;  %v441_v55 = vpop.f32.mrb[3].mxu1 }
 0x1d1   : > { %v4145_v56 = vpack.c.bf16 %v438_v51, %v438_v51  ;;  %v442_v57 = vadd.f32 %v441_v55, %v379_v37  ;;  %v4007_v37 = vcombine.low %v4002_v24, %v4002_v24  ;;  %v2769_v49 = vrot.slane %v2767_v35, 1 }
 0x1d2   : > { %468 = vst.msk [vmem:[#allocation2] sm:$0xf] %vm467_vm3, %v4142_v53  ;;  %v4143_v58 = vpack.c.bf16 %v440_v54, %v440_v54  ;;  %485 = vrot.lane.b32.xlu0 %v4142_v53, %s4525_s26  ;;  %472 = vrot.lane.b32.xlu1 %v4142_v53, %s4524_s19  ;;  %v2753_v51 = vshrl.u32 %v4623_v18, 16  ;;  %v1276_v54 = vshrl.u32 %v4638_v20, 16  ;;  %v1280_v55 = vrot.slane %v1278_v38, 1 }
 0x1d3   : > { %575 = vst.msk [vmem:[#allocation2 + $0x60] sm:$0xf] %vm467_vm3, %v4145_v56  ;;  %v4146_v59 = vpack.c.bf16 %v442_v57, %v442_v57  ;;  %v1496_v57 = vshll.u32 %v4191_v42, 16  ;;  %v3865_v35 = vcombine.high %v4769_v25, %v4612_v14  ;;  %v4081_v38 = vld [vmem:[%s4597_s12 + $0x3c] sm:$0x11] }
 0x1d4   : > { %469 = vst.msk [vmem:[#allocation2 + $0x4] sm:$0xf] %vm467_vm3, %v4143_v58  ;;  %v4758_v4 = vor.u32 %v1280_v55, %v1276_v54  ;;  %v4796_v42 = vld [vmem:[%s4597_s12 + $0x44] ss:$0 sps:$4 sm:$0x11]  }
 0x1d5   : > { %576 = vst.msk [vmem:[#allocation2 + $0x64] sm:$0xf] %vm467_vm3, %v4146_v59  ;;  %v445_v60 = vpop.f32.mrb[4].mxu1  ;;  %v1498_v7 = vrot.slane %v1496_v57, 1  ;;  %v3274_v54 = vrot.slane %v4796_v42, 1 }
 0x1d6   : > { %v446_v61 = vadd.f32 %v445_v60, %v384_v36  ;;  %v447_v62 = vpop.f32.mrb[5].mxu1  ;;  %591 = vrot.lane.b32.xlu0 %v4145_v56, %s4525_s26  ;;  %498 = vrot.lane.b32.xlu1 %v4142_v53, %s4526_s27  ;;  %v1298_v60 = vsel %vm1105_vm5, %v4736_v43, %v1297_v40 }
 0x1d7   : > { %v448_v63 = vadd.f32 %v447_v62, %v384_v36  ;;  %v449_v0 = vpop.f32.mrb[6].mxu1  ;;  %v2755_v36 = vshll.u32 %v4623_v18, 16  ;;  %v4194_v62 = vld [vmem:[%s4597_s12 + $0x44] ss:$0 sps:$4 sm:$0x11]  }
 0x1d8   : > { %v4144_v1 = vpack.c.bf16 %v446_v61, %v446_v61  ;;  %v450_v2 = vpop.f32.mrb[7].mxu1  ;;  %v1493_v61 = vrot.slane %v1491_v46, 1  ;;  %v2787_v0 = vsel %vm1105_vm5, %v2782_v44, %v2786_v41  ;;  %v2972_v11 = vshll.u32 %v4194_v62, 16  ;;  %v4793_v41 = vld [vmem:[%s4597_s12 + $0x2c] ss:$12 sps:$4 sm:$0xfe]  }
 0x1d9   : > { %v4667_v3 = vpack.c.bf16 %v448_v63, %v448_v63  ;;  %v2757_v52 = vrot.slane %v2755_v36, 1  ;;  %v2967_v63 = vshll.u32 %v4193_v48, 16  ;;  %v4217_v30 = vld [vmem:[#allocation2] ss:$0 sps:$4 sm:$0x11]   ;;  %v1797_v48 = vrot.slane %v3865_v35, 1 }
 0x1da   : > { %471 = vst.msk [vmem:[#allocation2 + $0x8] sm:$0x1] %vm470_vm4, %v4144_v1  ;;  %604 = vrot.lane.b32.xlu0 %v4145_v56, %s4526_s27  ;;  %511 = vrot.lane.b32.xlu1 %v4142_v53, %s4527_s28  ;;  %v2974_v28 = vrot.slane %v2972_v11, 1  ;;  %v4781_v36 = vld [vmem:[%s4597_s12 + $0x8] ss:$12 sps:$4 sm:$0xfe]   ;;  %v895_v46 = vunpack.c.l.b16 %v4217_v30 }
 0x1db   : > { %577 = vst.msk [vmem:[#allocation2 + $0x68] sm:$0x1] %vm470_vm4, %v4667_v3  ;;  %v4756_v2 = vor.u32 %v2757_v52, %v2753_v51  ;;  %v4225_v52 = vld [vmem:[#allocation2 + $0x60] ss:$0 sps:$4 sm:$0x11]  }
 0x1de   : > { %617 = vrot.lane.b32.xlu0 %v4145_v56, %s4527_s28  ;;  %524 = vrot.lane.b32.xlu1 %v4142_v53, %s4528_s29 }
 0x1e2   : > { %630 = vrot.lane.b32.xlu0 %v4145_v56, %s4528_s29  ;;  %537 = vrot.lane.b32.xlu1 %v4142_v53, %s4529_s30 }
 0x1e6   : > { %643 = vrot.lane.b32.xlu0 %v4145_v56, %s4529_s30  ;;  %550 = vrot.lane.b32.xlu1 %v4142_v53, %s4530_s7  ;;  %v2760_v53 = vshll.u32 %v4007_v37, 16  ;;  %v3868_v37 = vcombine.high %v4773_v29, %v4773_v29 }
 0x1ea   : > { %656 = vrot.lane.b32.xlu0 %v4145_v56, %s4530_s7  ;;  %578 = vrot.lane.b32.xlu1 %v4145_v56, %s4524_s19  ;;  %v1489_v56 = vshrl.u32 %v4190_v32, 16  ;;  %v4077_v32 = vld [vmem:[%s4597_s12 + $0x24] sm:$0xee] }
 0x1eb   : > { %v4084_v44 = vcombine.high %v4077_v32, %v4615_v15 }
 0x1ec   : > { %v1494_v10 = vor.u32 %v1493_v61, %v1489_v56  ;;  %v4807_v56 = vpop.permute.xlu0 %964 }
 0x1ed   : > { %v4805_v55 = vrot.slane %v4084_v44, 1 }
 0x1ee   : > { %500 = vrot.lane.b32.xlu0 %v4143_v58, %s4526_s27  ;;  %474 = vrot.lane.b32.xlu1 %v4143_v58, %s4524_s19  ;;  %v1499_v26 = vsel %vm1105_vm5, %v1494_v10, %v1498_v7  ;;  %v3864_v10 = vcombine.low %v4769_v25, %v4612_v14 }
 0x1f2   : > { %552 = vrot.lane.b32.xlu0 %v4143_v58, %s4530_s7  ;;  %487 = vrot.lane.b32.xlu1 %v4143_v58, %s4525_s26 }
 0x1f6   : > { %580 = vrot.lane.b32.xlu0 %v4146_v59, %s4524_s19  ;;  %513 = vrot.lane.b32.xlu1 %v4143_v58, %s4527_s28 }
 0x1fa   : > { %606 = vrot.lane.b32.xlu0 %v4146_v59, %s4526_s27  ;;  %526 = vrot.lane.b32.xlu1 %v4143_v58, %s4528_s29 }
 0x1fe   : > { %619 = vrot.lane.b32.xlu0 %v4146_v59, %s4527_s28  ;;  %539 = vrot.lane.b32.xlu1 %v4143_v58, %s4529_s30  ;;  %v3826_v58 = vcombine.high %v1441_v47, %v1441_v47 }
 0x200   : > { %v1484_v8 = vshll.u32 %v3826_v58, 16  ;;  %v4083_v58 = vcombine.low %v4077_v32, %v4615_v15  ;;  %v903_v15 = vunpack.c.l.b16 %v4225_v52 }
 0x202   : > { %632 = vrot.lane.b32.xlu0 %v4146_v59, %s4528_s29  ;;  %593 = vrot.lane.b32.xlu1 %v4146_v59, %s4525_s26  ;;  %v1486_v24 = vrot.slane %v1484_v8, 1  ;;  %v4270_v8 = vld [vmem:[#allocation2] ss:$0 sps:$4 sm:$0x88]   ;;  %v4840_v25 = vrot.slane %v903_v15, 1 }
 0x206   : > { %645 = vrot.lane.b32.xlu0 %v4146_v59, %s4529_s30  ;;  %476 = vrot.lane.b32.xlu1 %v4144_v1, %s4524_s19 }
 0x20a   : > { %658 = vrot.lane.b32.xlu0 %v4146_v59, %s4530_s7  ;;  %489 = vrot.lane.b32.xlu1 %v4144_v1, %s4525_s26  ;;  %v4030_v59 = vld [vmem:[%s4597_s12 + $0x3c] sm:$0x11] }
 0x20b   : > { %v4036_v6 = vcombine.high %v4030_v59, %v4030_v59  ;;  %v4035_v12 = vcombine.low %v4030_v59, %v4030_v59  ;;  %v4243_v59 = vld [vmem:[#allocation2 + $0x60] ss:$0 sps:$4 sm:$0x44]  }
 0x20d   : > { %v2960_v21 = vshll.u32 %v4036_v6, 16  ;;  %v2948_v31 = vshll.u32 %v4035_v12, 16  ;;  %v4268_v6 = vld [vmem:[#allocation2 + $0x8] ss:$0 sps:$4 sm:$0x11]  }
 0x20e   : > { %2445 = vrot.lane.b32.xlu0 %v4619_v16, %s4525_s26  ;;  %502 = vrot.lane.b32.xlu1 %v4144_v1, %s4526_s27  ;;  %v1283_v16 = vshll.u32 %v3803_v19, 16  ;;  %v4786_v19 = vld [vmem:[%s4597_s12 + $0x20] ss:$0 sps:$4 sm:$0x11]  }
 0x20f   : > { %v1801_v51 = vrot.slane %v4786_v19, 1 }
 0x210   : > { %v1285_v5 = vrot.slane %v1283_v16, 1  ;;  %v4235_v16 = vld [vmem:[#allocation2] ss:$0 sps:$4 sm:$0x44]  }
 0x211   : > { %v1387_v11 = vunpack.c.l.b16 %v4235_v16  ;;  %v4329_v16 = vld [vmem:[#allocation2 + $0x60] ss:$0 sps:$4 sm:$0x88]  }
 0x212   : > { %595 = vrot.lane.b32.xlu0 %v4667_v3, %s4525_s26  ;;  %515 = vrot.lane.b32.xlu1 %v4144_v1, %s4527_s28  ;;  %v1286_v23 = vsel %vm1105_vm5, %v4758_v4, %v1285_v5  ;;  %v4259_v5 = vld [vmem:[#allocation2 + $0x60] ss:$0 sps:$4 sm:$0x22]  }
 0x216   : > { %608 = vrot.lane.b32.xlu0 %v4667_v3, %s4526_s27  ;;  %528 = vrot.lane.b32.xlu1 %v4144_v1, %s4528_s29 }
 0x21a   : > { %621 = vrot.lane.b32.xlu0 %v4667_v3, %s4527_s28  ;;  %541 = vrot.lane.b32.xlu1 %v4144_v1, %s4529_s30 }
 0x21e   : > { %634 = vrot.lane.b32.xlu0 %v4667_v3, %s4528_s29  ;;  %554 = vrot.lane.b32.xlu1 %v4144_v1, %s4530_s7  ;;  %v2774_v1 = vrot.slane %v2772_v50, 1  ;;  %v1798_v50 = vrot.slane %v3868_v37, 1 }
 0x222   : > { %647 = vrot.lane.b32.xlu0 %v4667_v3, %s4529_s30  ;;  %582 = vrot.lane.b32.xlu1 %v4667_v3, %s4524_s19 }
 0x226   : > { %660 = vrot.lane.b32.xlu0 %v4667_v3, %s4530_s7  ;;  %966 = vrot.lane.b32.xlu1 %v4182_v22, %s4525_s26  ;;  %v2762_v3 = vrot.slane %v2760_v53, 1  ;;  %v3825_v22 = vcombine.low %v1441_v47, %v1441_v47  ;;  %v3273_v53 = vrot.slane %v4793_v41, 1 }
 0x228   : > { %v2763_v17 = vsel %vm1105_vm5, %v4756_v2, %v2762_v3  ;;  %v1472_v34 = vshll.u32 %v3825_v22, 16  ;;  %v4820_v3 = vrot.slane %v895_v46, 1  ;;  %v3275_v35 = vsel %vm1642_vm6, %v3273_v53, %v3274_v54 }
 0x22a   : > { %962 = vrot.lane.b32.xlu0 %v4638_v20, %s4525_s26  ;;  %2447 = vrot.lane.b32.xlu1 %v4183_v33, %s4525_s26  ;;  %v4754_v20 = vor.u32 %v2769_v49, %v2765_v45  ;;  %v2962_v33 = vrot.slane %v2960_v21, 1  ;;  %v2950_v45 = vrot.slane %v2948_v31, 1  ;;  %v1474_v47 = vrot.slane %v1472_v34, 1  ;;  %v4286_v34 = vld [vmem:[#allocation2] ss:$0 sps:$4 sm:$0x22]  }
 0x22b   : > { %v4087_v49 = vcombine.high %v4081_v38, %v4081_v38  ;;  %v1794_v31 = vrot.slane %v3864_v10, 1 }
 0x22c   : > { %v2775_v13 = vsel %vm1105_vm5, %v4754_v20, %v2774_v1  ;;  %v2963_v57 = vsel %vm1105_vm5, %v4754_v20, %v2962_v33  ;;  %v2951_v61 = vsel %vm1105_vm5, %v4756_v2, %v2950_v45  ;;  %v1933_v1 = vld [vmem:[%s4597_s12 + $0x18] sm:$0x11]  ;;  %v1475_v7 = vsel %vm1105_vm5, %v4758_v4, %v1474_v47 }
 0x22d   : > { %v4816_v62 = vrot.slane %v4087_v49, 1  ;;  %v1799_v20 = vsel %vm1642_vm6, %v1797_v48, %v1798_v50  ;;  %v3267_v2 = vrot.slane %v4083_v58, 1  ;;  %v4845_v33 = vrot.slane %v1387_v11, 4  ;;  %v4304_v49 = vld [vmem:[#allocation2] ss:$0 sps:$4 sm:$0x44]  }
 0x22e   : > { %2443 = vrot.lane.b32.xlu0 %v4623_v18, %s4525_s26  ;;  %1315 = vrot.lane.b32.xlu1 %v1310_v39, %s4524_s19  ;;  %v2969_v18 = vrot.slane %v2967_v63, 1  ;;  %v1487_v39 = vsel %vm1105_vm5, %v4736_v43, %v1486_v24  ;;  %v1800_v43 = vrot.slane %v4781_v36, 1  ;;  %v4086_v63 = vcombine.low %v4081_v38, %v4081_v38  ;;  %v4836_v24 = vld [vmem:[%s4597_s12 + $0x20] ss:$0 sps:$4 sm:$0x11]  }
 0x22f   : > { %v4294_v38 = vld [vmem:[#allocation2 + $0x60] ss:$0 sps:$4 sm:$0x22]   ;;  %v1963_v42 = vrot.slane %v4836_v24, 1  ;;  %v1198_v50 = vunpack.c.l.b16 %v4286_v34  ;;  %v3272_v52 = vsel %vm1642_vm6, %v4805_v55, %v4816_v62 }
 0x230   : > { %v2970_v27 = vor.u32 %v2969_v18, %v2965_v9  ;;  %v4278_v9 = vld [vmem:[#allocation2 + $0x60] ss:$0 sps:$4 sm:$0x88]   ;;  %v3867_v18 = vcombine.low %v4773_v29, %v4773_v29  ;;  %v3268_v4 = vrot.slane %v4086_v63, 1  ;;  %v1717_v29 = vunpack.c.l.b16 %v4270_v8 }
 0x231   : > { %v1725_v30 = vunpack.c.l.b16 %v4278_v9  ;;  %v1206_v54 = vunpack.c.l.b16 %v4294_v38  ;;  %v4876_v62 = vrot.slane %v1198_v50, 3 }
 0x232   : > { %1313 = vrot.lane.b32.xlu0 %v1298_v60, %s4524_s19  ;;  %2792 = vrot.lane.b32.xlu1 %v2787_v0, %s4524_s19  ;;  %v2975_v40 = vsel %vm1105_vm5, %v2970_v27, %v2974_v28  ;;  %v4251_v60 = vld [vmem:[#allocation2] ss:$0 sps:$4 sm:$0x22]   ;;  %v1929_v0 = vld [vmem:[%s4597_s12] sm:$0xee]  ;;  %v1047_v27 = vunpack.c.l.b16 %v4259_v5  ;;  %v3513_v28 = vunpack.c.l.b16 %v4268_v6  ;;  %v1795_v32 = vrot.slane %v3867_v18, 1 }
 0x233   : > { %v3887_v12 = vcombine.high %v1929_v0, %v4612_v14  ;;  %v1802_v14 = vsel %vm1642_vm6, %v1800_v43, %v1801_v51  ;;  %v4860_v47 = vrot.slane %v1717_v29, 6  ;;  %v4862_v48 = vrot.slane %v1725_v30, 6  ;;  %v4312_v43 = vld [vmem:[#allocation2 + $0x60] ss:$0 sps:$4 sm:$0x44]  }
 0x234   : > { %v4854_v45 = vrot.slane %v1047_v27, 2  ;;  %v4858_v46 = vrot.slane %v3513_v28, 1  ;;  %v4321_v51 = vld [vmem:[#allocation2] ss:$0 sps:$4 sm:$0x88]   ;;  %v3269_v53 = vsel %vm1642_vm6, %v3267_v2, %v3268_v4  ;;  %v1796_v63 = vsel %vm1642_vm6, %v1794_v31, %v1795_v32 }
 0x235   : > { %v1959_v36 = vrot.slane %v3887_v12, 1  ;;  %v1576_v0 = vunpack.c.l.b16 %v4304_v49  ;;  %v4878_v5 = vrot.slane %v1206_v54, 3  ;;  %v1584_v6 = vunpack.c.l.b16 %v4312_v43 }
 0x236   : > { %2790 = vrot.lane.b32.xlu0 %v2775_v13, %s4524_s19  ;;  %2788 = vrot.lane.b32.xlu1 %v2763_v17, %s4524_s19  ;;  %v3890_v13 = vcombine.high %v1933_v1, %v1933_v1  ;;  %v1395_v17 = vunpack.c.l.b16 %v4243_v59  ;;  %5655 = vst [vmem:[#allocation5_spill] sm:$0xff] %v4858_v46  ;;  %v4367_v1 = vld [vmem:[#allocation2 + $0x64] ss:$0 sps:$4 sm:$0x22]  }
 0x237   : > { %v4884_v12 = vrot.slane %v1576_v0, 5  ;;  %v4910_v0 = vld [vmem:[#allocation2 + $0x64] ss:$0 sps:$4 sm:$0x44]  }
 0x238   : > { %v1960_v37 = vrot.slane %v3890_v13, 1  ;;  %v4848_v19 = vrot.slane %v1395_v17, 4  ;;  %v2527_v13 = vunpack.c.l.b16 %v4367_v1 }
 0x23a   : > { %1311 = vrot.lane.b32.xlu0 %v1286_v23, %s4524_s19  ;;  %1504 = vrot.lane.b32.xlu1 %v1499_v26, %s4525_s26  ;;  %v4833_v23 = vld [vmem:[%s4597_s12 + $0x8] ss:$12 sps:$4 sm:$0xfe]   ;;  %v1039_v26 = vunpack.c.l.b16 %v4251_v60  ;;  %v4351_v60 = vld [vmem:[#allocation2 + $0x64] ss:$0 sps:$4 sm:$0x22]   ;;  %v1961_v55 = vsel %vm1642_vm6, %v1959_v36, %v1960_v37 }
 0x23b   : > { %v1962_v41 = vrot.slane %v4833_v23, 1  ;;  %v2385_v18 = vunpack.c.l.b16 %v4351_v60  ;;  %v4902_v36 = vrot.slane %v2527_v13, 3 }
 0x23c   : > { %v4852_v44 = vrot.slane %v1039_v26, 2 }
 0x23d   : > { %v1964_v17 = vsel %vm1642_vm6, %v1962_v41, %v1963_v42  ;;  %v4897_v30 = vrot.slane %v2385_v18, 2 }
 0x23e   : > { %1502 = vrot.lane.b32.xlu0 %v1487_v39, %s4525_s26  ;;  %2980 = vrot.lane.b32.xlu1 %v2975_v40, %s4525_s26 }
 0x242   : > { %2978 = vrot.lane.b32.xlu0 %v2963_v57, %s4525_s26  ;;  %2976 = vrot.lane.b32.xlu1 %v2951_v61, %s4525_s26  ;;  %v4343_v57 = vld [vmem:[#allocation2 + $0x4] ss:$0 sps:$4 sm:$0x22]  }
 0x243   : > { %v4359_v61 = vld [vmem:[#allocation2 + $0x4] ss:$0 sps:$4 sm:$0x22]   ;;  %v2377_v10 = vunpack.c.l.b16 %v4343_v57 }
 0x244   : > { %v486_v21 = vpop.permute.xlu0 %485  ;;  %v473_v22 = vpop.permute.xlu1 %472  ;;  %v2519_v11 = vunpack.c.l.b16 %v4359_v61 }
 0x245   : > { %495 = vst.msk [vmem:[#allocation2 + $0x18] sm:$0xf] %vm467_vm3, %v486_v21  ;;  %482 = vst.msk [vmem:[#allocation2 + $0xc] sm:$0xf] %vm467_vm3, %v473_v22  ;;  %v4887_v22 = vrot.slane %v1584_v6, 5  ;;  %v4895_v29 = vrot.slane %v2377_v10, 2 }
 0x246   : > { %1500 = vrot.lane.b32.xlu0 %v1475_v7, %s4525_s26  ;;  %1805 = vrot.lane.b32.xlu1 %v1799_v20, %s4524_s19  ;;  %v1879_v7 = vunpack.c.l.b16 %v4321_v51  ;;  %v1887_v20 = vunpack.c.l.b16 %v4329_v16 }
 0x248   : > { %v592_v39 = vpop.permute.xlu0 %591  ;;  %v499_v40 = vpop.permute.xlu1 %498  ;;  %v4889_v23 = vrot.slane %v1879_v7, 7  ;;  %v4891_v24 = vrot.slane %v1887_v20, 7  ;;  %v4914_v20 = vld [vmem:[#allocation2 + $0x4] ss:$0 sps:$4 sm:$0x44]  }
 0x249   : > { %601 = vst.msk [vmem:[#allocation2 + $0x78] sm:$0xf] %vm467_vm3, %v592_v39  ;;  %508 = vst.msk [vmem:[#allocation2 + $0x24] sm:$0xf] %vm467_vm3, %v499_v40 }
 0x24a   : > { %1807 = vrot.lane.b32.xlu0 %v1802_v14, %s4524_s19  ;;  %3280 = vrot.lane.b32.xlu1 %v3275_v35, %s4524_s19  ;;  %v4899_v14 = vrot.slane %v2519_v11, 3 }
 0x24c   : > { %v605_v58 = vpop.permute.xlu0 %604  ;;  %v512_v59 = vpop.permute.xlu1 %511  ;;  %v4219_v9 = vld [vmem:[#allocation2 + $0x18] ss:$0 sps:$4 sm:$0x11]   ;;  %v4236_v2 = vld [vmem:[#allocation2 + $0xc] ss:$0 sps:$4 sm:$0x44]  }
 0x24d   : > { %614 = vst.msk [vmem:[#allocation2 + $0x84] sm:$0xf] %vm467_vm3, %v605_v58  ;;  %521 = vst.msk [vmem:[#allocation2 + $0x30] sm:$0xf] %vm467_vm3, %v512_v59  ;;  %v897_v31 = vunpack.c.l.b16 %v4219_v9  ;;  %v1388_v34 = vunpack.c.l.b16 %v4236_v2 }
 0x24e   : > { %3278 = vrot.lane.b32.xlu0 %v3272_v52, %s4524_s19  ;;  %3276 = vrot.lane.b32.xlu1 %v3269_v53, %s4524_s19  ;;  %v4237_v4 = vld [vmem:[#allocation2 + $0x18] ss:$0 sps:$4 sm:$0x44]   ;;  %v4218_v42 = vld [vmem:[#allocation2 + $0xc] ss:$0 sps:$4 sm:$0x11]  }
 0x24f   : > { %v1389_v35 = vunpack.c.l.b16 %v4237_v4  ;;  %v913_v43 = vrot.slane %v897_v31, 7  ;;  %v1404_v51 = vrot.slane %v1388_v34, 3  ;;  %v896_v61 = vunpack.c.l.b16 %v4218_v42 }
 0x250   : > { %v618_v15 = vpop.permute.xlu0 %617  ;;  %v525_v8 = vpop.permute.xlu1 %524  ;;  %v4220_v21 = vld [vmem:[#allocation2 + $0x24] ss:$0 sps:$4 sm:$0x11]   ;;  %v4227_v28 = vld [vmem:[#allocation2 + $0x78] ss:$0 sps:$4 sm:$0x11]  }
 0x251   : > { %627 = vst.msk [vmem:[#allocation2 + $0x90] sm:$0xf] %vm467_vm3, %v618_v15  ;;  %534 = vst.msk [vmem:[#allocation2 + $0x3c] sm:$0xf] %vm467_vm3, %v525_v8  ;;  %v898_v39 = vunpack.c.l.b16 %v4220_v21  ;;  %v905_v50 = vunpack.c.l.b16 %v4227_v28  ;;  %v1406_v52 = vrot.slane %v1389_v35, 2  ;;  %v912_v4 = vsel %vm764_vm7, %v896_v61, %v4820_v3 }
 0x252   : > { %1803 = vrot.lane.b32.xlu0 %v1796_v63, %s4524_s19  ;;  %1967 = vrot.lane.b32.xlu1 %v1961_v55, %s4525_s26  ;;  %v4238_v32 = vld [vmem:[#allocation2 + $0x24] ss:$0 sps:$4 sm:$0x44]   ;;  %v4245_v49 = vld [vmem:[#allocation2 + $0x78] ss:$0 sps:$4 sm:$0x44]   ;;  %v1405_v21 = vsel %vm764_vm7, %v1404_v51, %v4845_v33  ;;  %v2684_v3 = vunpack.c.l.b16 %v4910_v0 }
 0x253   : > { %v915_v16 = vrot.slane %v898_v39, 6  ;;  %v1390_v57 = vunpack.c.l.b16 %v4238_v32  ;;  %v4908_v55 = vld [vmem:[#allocation2 + $0x4] ss:$0 sps:$4 sm:$0x44]   ;;  %v4912_v6 = vrot.slane %v905_v50, 7  ;;  %v1397_v7 = vunpack.c.l.b16 %v4245_v49 }
 0x254   : > { %v631_v26 = vpop.permute.xlu0 %630  ;;  %v538_v27 = vpop.permute.xlu1 %537  ;;  %v4221_v37 = vld [vmem:[#allocation2 + $0x30] ss:$0 sps:$4 sm:$0x11]   ;;  %v4228_v38 = vld [vmem:[#allocation2 + $0x84] ss:$0 sps:$4 sm:$0x11]   ;;  %v2676_v39 = vunpack.c.l.b16 %v4908_v55  ;;  %v914_v49 = vsel %vm767_vm8, %v913_v43, %v912_v4  ;;  %v1407_v33 = vsel %vm767_vm8, %v1406_v52, %v1405_v21  ;;  %v2864_v50 = vunpack.c.l.b16 %v4914_v20 }
 0x255   : > { %640 = vst.msk [vmem:[#allocation2 + $0x9c] sm:$0xf] %vm467_vm3, %v631_v26  ;;  %547 = vst.msk [vmem:[#allocation2 + $0x48] sm:$0xf] %vm467_vm3, %v538_v27  ;;  %v899_v53 = vunpack.c.l.b16 %v4221_v37  ;;  %v906_v54 = vunpack.c.l.b16 %v4228_v38  ;;  %v1408_v2 = vrot.slane %v1390_v57, 1  ;;  %v4926_v35 = vrot.slane %v1397_v7, 2 }
 0x256   : > { %1969 = vrot.lane.b32.xlu0 %v1964_v17, %s4525_s26  ;;  %v4246_v63 = vld [vmem:[#allocation2 + $0x84] ss:$0 sps:$4 sm:$0x44]   ;;  %v4922_v13 = vld [vmem:[#allocation2 + $0x30] ss:$0 sps:$4 sm:$0x44]   ;;  %v916_v57 = vsel %vm770_vm9, %v915_v16, %v914_v49 }
 0x257   : > { %v917_v8 = vrot.slane %v899_v53, 5  ;;  %v4916_v9 = vrot.slane %v906_v54, 6  ;;  %v1398_v34 = vunpack.c.l.b16 %v4246_v63 }
 0x258   : > { %v644_v40 = vpop.permute.xlu0 %643  ;;  %v551_v41 = vpop.permute.xlu1 %550  ;;  %v4222_v60 = vld [vmem:[#allocation2 + $0x3c] ss:$0 sps:$4 sm:$0x11]   ;;  %v4229_v1 = vld [vmem:[#allocation2 + $0x90] ss:$0 sps:$4 sm:$0x11]  }
 0x259   : > { %653 = vst.msk [vmem:[#allocation2 + $0xa8] sm:$0xf] %vm467_vm3, %v644_v40  ;;  %560 = vst.msk [vmem:[#allocation2 + $0x54] sm:$0xf] %vm467_vm3, %v551_v41  ;;  %v900_v27 = vunpack.c.l.b16 %v4222_v60  ;;  %v907_v28 = vunpack.c.l.b16 %v4229_v1  ;;  %v1422_v61 = vrot.slane %v1398_v34, 1  ;;  %v918_v7 = vsel %vm773_vm10, %v917_v8, %v916_v57 }
 0x25a   : > { %v4240_v17 = vld [vmem:[#allocation2 + $0x3c] ss:$0 sps:$4 sm:$0x44]  }
 0x25b   : > { %v919_v60 = vrot.slane %v900_v27, 4  ;;  %v931_v52 = vrot.slane %v907_v28, 5 }
 0x25c   : > { %v657_v58 = vpop.permute.xlu0 %656  ;;  %v579_v59 = vpop.permute.xlu1 %578  ;;  %v4223_v15 = vld [vmem:[#allocation2 + $0x48] ss:$0 sps:$4 sm:$0x11]   ;;  %v4230_v11 = vld [vmem:[#allocation2 + $0x9c] ss:$0 sps:$4 sm:$0x11]  }
 0x25d   : > { %666 = vst.msk [vmem:[#allocation2 + $0xb4] sm:$0xf] %vm467_vm3, %v657_v58  ;;  %588 = vst.msk [vmem:[#allocation2 + $0x6c] sm:$0xf] %vm467_vm3, %v579_v59  ;;  %v901_v42 = vunpack.c.l.b16 %v4223_v15  ;;  %v908_v54 = vunpack.c.l.b16 %v4230_v11  ;;  %v1392_v58 = vunpack.c.l.b16 %v4240_v17  ;;  %v4937_v59 = vsel %vm770_vm9, %v1408_v2, %v1407_v33 }
 0x25e   : > { %v4241_v31 = vld [vmem:[#allocation2 + $0x48] ss:$0 sps:$4 sm:$0x44]   ;;  %v4248_v32 = vld [vmem:[#allocation2 + $0x9c] ss:$0 sps:$4 sm:$0x44]  }
 0x25f   : > { %v921_v16 = vrot.slane %v901_v42, 3  ;;  %v4247_v17 = vld [vmem:[#allocation2 + $0x90] ss:$0 sps:$4 sm:$0x44]   ;;  %v1393_v21 = vunpack.c.l.b16 %v4241_v31  ;;  %v933_v8 = vrot.slane %v908_v54, 4 }
 0x260   : > { %v501_v10 = vpop.permute.xlu0 %500  ;;  %v475_v18 = vpop.permute.xlu1 %474  ;;  %v4224_v26 = vld [vmem:[#allocation2 + $0x54] ss:$0 sps:$4 sm:$0x11]   ;;  %v4231_v37 = vld [vmem:[#allocation2 + $0xa8] ss:$0 sps:$4 sm:$0x11]  }
 0x261   : > { %509 = vst.msk [vmem:[#allocation2 + $0x28] sm:$0xf] %vm467_vm3, %v501_v10  ;;  %483 = vst.msk [vmem:[#allocation2 + $0x10] sm:$0xf] %vm467_vm3, %v475_v18  ;;  %v902_v43 = vunpack.c.l.b16 %v4224_v26  ;;  %v909_v1 = vunpack.c.l.b16 %v4231_v37  ;;  %v1391_v18 = vunpack.c.l.b16 %v4922_v13  ;;  %v920_v13 = vsel %vm776_vm11, %v919_v60, %v918_v7 }
 0x262   : > { %v4242_v38 = vld [vmem:[#allocation2 + $0x54] ss:$0 sps:$4 sm:$0x44]   ;;  %v4249_v10 = vld [vmem:[#allocation2 + $0xa8] ss:$0 sps:$4 sm:$0x44]   ;;  %v922_v7 = vsel %vm779_vm12, %v921_v16, %v920_v13 }
 0x263   : > { %v1394_v2 = vunpack.c.l.b16 %v4242_v38  ;;  %v4945_v37 = vld [vmem:[#allocation2 + $0x64] ss:$0 sps:$4 sm:$0x44]   ;;  %v935_v42 = vrot.slane %v909_v1, 3  ;;  %v1401_v49 = vunpack.c.l.b16 %v4249_v10  ;;  %v1413_v57 = vrot.slane %v1393_v21, 6 }
 0x264   : > { %v553_v40 = vpop.permute.xlu0 %552  ;;  %v488_v41 = vpop.permute.xlu1 %487  ;;  %v4226_v51 = vld [vmem:[#allocation2 + $0x6c] ss:$0 sps:$4 sm:$0x11]   ;;  %v4232_v53 = vld [vmem:[#allocation2 + $0xb4] ss:$0 sps:$4 sm:$0x11]   ;;  %v1399_v10 = vunpack.c.l.b16 %v4247_v17  ;;  %v1410_v16 = vsel %vm773_vm10, %v1391_v18, %v4937_v59 }
 0x265   : > { %561 = vst.msk [vmem:[#allocation2 + $0x58] sm:$0xf] %vm467_vm3, %v553_v40  ;;  %496 = vst.msk [vmem:[#allocation2 + $0x1c] sm:$0xf] %vm467_vm3, %v488_v41  ;;  %v904_v63 = vunpack.c.l.b16 %v4226_v51  ;;  %v1400_v40 = vunpack.c.l.b16 %v4248_v32  ;;  %v910_v26 = vunpack.c.l.b16 %v4232_v53  ;;  %v923_v41 = vrot.slane %v902_v43, 2 }
 0x266   : > { %v4244_v15 = vld [vmem:[#allocation2 + $0x6c] ss:$0 sps:$4 sm:$0x44]   ;;  %v4250_v28 = vld [vmem:[#allocation2 + $0xb4] ss:$0 sps:$4 sm:$0x44]  }
 0x267   : > { %v926_v27 = vsel %vm764_vm7, %v904_v63, %v4840_v25  ;;  %v1396_v34 = vunpack.c.l.b16 %v4244_v15  ;;  %v1411_v32 = vrot.slane %v1392_v58, 7  ;;  %v4410_v51 = vld [vmem:[#allocation2 + $0x68] ss:$0 sps:$4 sm:$0x11]   ;;  %v1415_v63 = vrot.slane %v1394_v2, 5 }
 0x268   : > { %v581_v11 = vpop.permute.xlu0 %580  ;;  %v514_v4 = vpop.permute.xlu1 %513  ;;  %v928_v31 = vsel %vm767_vm8, %v4912_v6, %v926_v27  ;;  %v1425_v15 = vrot.slane %v1400_v40, 7  ;;  %v4412_v60 = vld [vmem:[#allocation2 + $0x4] ss:$0 sps:$4 sm:$0x88]   ;;  %v1402_v58 = vunpack.c.l.b16 %v4250_v28  ;;  %v2872_v40 = vunpack.c.l.b16 %v4945_v37 }
 0x269   : > { %589 = vst.msk [vmem:[#allocation2 + $0x70] sm:$0xf] %vm467_vm3, %v581_v11  ;;  %522 = vst.msk [vmem:[#allocation2 + $0x34] sm:$0xf] %vm467_vm3, %v514_v4  ;;  %v930_v38 = vsel %vm770_vm9, %v4916_v9, %v928_v31  ;;  %v1418_v33 = vrot.slane %v1396_v34, 3  ;;  %v937_v9 = vrot.slane %v910_v26, 2  ;;  %v924_v4 = vsel %vm5654_vm13, %v923_v41, %v922_v7 }
 0x26a   : > { %v932_v54 = vsel %vm773_vm10, %v931_v52, %v930_v38  ;;  %v4196_v43 = vld [vmem:[#allocation2 + $0x28] ss:$0 sps:$4 sm:$0x11]   ;;  %v4198_v26 = vld [vmem:[#allocation2 + $0x10] ss:$0 sps:$4 sm:$0x11]   ;;  %v3521_v13 = vunpack.c.l.b16 %v4410_v51  ;;  %v3052_v18 = vunpack.c.l.b16 %v4412_v60 }
 0x26b   : > { %v934_v6 = vsel %vm776_vm11, %v933_v8, %v932_v54  ;;  %v1419_v1 = vsel %vm764_vm7, %v1418_v33, %v4848_v19  ;;  %v1427_v28 = vrot.slane %v1401_v49, 6  ;;  %v1429_v37 = vrot.slane %v1402_v58, 5 }
 0x26c   : > { %v607_v25 = vpop.permute.xlu0 %606  ;;  %v527_v53 = vpop.permute.xlu1 %526  ;;  %v936_v52 = vsel %vm779_vm12, %v935_v42, %v934_v6  ;;  %v1421_v11 = vsel %vm767_vm8, %v4926_v35, %v1419_v1  ;;  %v4202_v34 = vld [vmem:[#allocation2 + $0x58] ss:$0 sps:$4 sm:$0x11]   ;;  %v1412_v35 = vsel %vm776_vm11, %v1411_v32, %v1410_v16  ;;  %v2044_v41 = vunpack.c.l.b16 %v4196_v43  ;;  %v4203_v51 = vld [vmem:[#allocation2 + $0x1c] ss:$0 sps:$4 sm:$0x11]  }
 0x26d   : > { %615 = vst.msk [vmem:[#allocation2 + $0x88] sm:$0xf] %vm467_vm3, %v607_v25  ;;  %535 = vst.msk [vmem:[#allocation2 + $0x40] sm:$0xf] %vm467_vm3, %v527_v53  ;;  %v938_v21 = vsel %vm5654_vm13, %v937_v9, %v936_v52  ;;  %v1423_v2 = vsel %vm770_vm9, %v1422_v61, %v1421_v11  ;;  %v1414_v31 = vsel %vm779_vm12, %v1413_v57, %v1412_v35  ;;  %v4980_v49 = vrot.slane %v2676_v39, 4 }
 0x26e   : > { %v939_v19 = vpack.c.b16 %v938_v21, %v924_v4  ;;  %v1424_v17 = vsel %vm773_vm10, %v1399_v10, %v1423_v2  ;;  %v1416_v38 = vsel %vm5654_vm13, %v1415_v63, %v1414_v31  ;;  %v4984_v32 = vrot.slane %v2684_v3, 4  ;;  %v4254_v10 = vld [vmem:[#allocation2 + $0x24] ss:$0 sps:$4 sm:$0x22]  }
 0x26f   : > { %v1426_v61 = vsel %vm776_vm11, %v1425_v15, %v1424_v17  ;;  %v2042_v33 = vunpack.c.l.b16 %v4198_v26  ;;  %v4988_v57 = vrot.slane %v2864_v50, 5  ;;  %v2048_v63 = vunpack.c.l.b16 %v4202_v34  ;;  %v4252_v50 = vld [vmem:[#allocation2 + $0xc] ss:$0 sps:$4 sm:$0x22]  }
 0x270   : > { %v620_v27 = vpop.permute.xlu0 %619  ;;  %v540_v8 = vpop.permute.xlu1 %539  ;;  %940 = vrot.lane.b32.xlu1 %v939_v19, %s4530_s7  ;;  %v1428_v59 = vsel %vm779_vm12, %v1427_v28, %v1426_v61  ;;  %v4208_v15 = vld [vmem:[#allocation2 + $0x70] ss:$0 sps:$4 sm:$0x11]   ;;  %v4992_v55 = vrot.slane %v2872_v40, 5  ;;  %v4994_v0 = vrot.slane %v2044_v41, 5  ;;  %v4997_v3 = vrot.slane %v3521_v13, 1 }
 0x271   : > { %628 = vst.msk [vmem:[#allocation2 + $0x94] sm:$0xf] %vm467_vm3, %v620_v27  ;;  %548 = vst.msk [vmem:[#allocation2 + $0x4c] sm:$0xf] %vm467_vm3, %v540_v8  ;;  %v1430_v42 = vsel %vm5654_vm13, %v1429_v37, %v1428_v59  ;;  %v4999_v60 = vrot.slane %v3052_v18, 6  ;;  %v5001_v43 = vrot.slane %v2042_v33, 7  ;;  %v2043_v6 = vunpack.c.l.b16 %v4203_v51 }
 0x272   : > { %v1431_v54 = vpack.c.b16 %v1430_v42, %v1416_v38  ;;  %v4209_v39 = vld [vmem:[#allocation2 + $0x34] ss:$0 sps:$4 sm:$0x11]   ;;  %v5003_v7 = vrot.slane %v2048_v63, 1  ;;  %v2050_v52 = vunpack.c.l.b16 %v4208_v15  ;;  %v1040_v19 = vunpack.c.l.b16 %v4252_v50 }
 0x273   : > { %5656 = vst [vmem:[#allocation6_spill] sm:$0xff] %v4999_v60  ;;  %v4255_v11 = vld [vmem:[#allocation2 + $0x30] ss:$0 sps:$4 sm:$0x22]   ;;  %v5007_v26 = vrot.slane %v2043_v6, 6  ;;  %v2045_v27 = vunpack.c.l.b16 %v4209_v39  ;;  %v1042_v31 = vunpack.c.l.b16 %v4254_v10 }
 0x274   : > { %v633_v25 = vpop.permute.xlu0 %632  ;;  %v594_v53 = vpop.permute.xlu1 %593  ;;  %1432 = vrot.lane.b32.xlu0 %v1431_v54, %s4527_s28  ;;  %v4210_v20 = vld [vmem:[#allocation2 + $0x88] ss:$0 sps:$4 sm:$0x11]   ;;  %v4211_v9 = vld [vmem:[#allocation2 + $0x40] ss:$0 sps:$4 sm:$0x11]   ;;  %v1043_v38 = vunpack.c.l.b16 %v4255_v11 }
 0x275   : > { %641 = vst.msk [vmem:[#allocation2 + $0xa0] sm:$0xf] %vm467_vm3, %v633_v25  ;;  %602 = vst.msk [vmem:[#allocation2 + $0x7c] sm:$0xf] %vm467_vm3, %v594_v53  ;;  %v5009_v28 = vrot.slane %v2050_v52, 7  ;;  %v2052_v34 = vunpack.c.l.b16 %v4210_v20  ;;  %v2046_v37 = vunpack.c.l.b16 %v4211_v9  ;;  %v5013_v33 = vrot.slane %v2045_v27, 4 }
 0x276   : > { %v4256_v4 = vld [vmem:[#allocation2 + $0x3c] ss:$0 sps:$4 sm:$0x22]   ;;  %v4253_v21 = vld [vmem:[#allocation2 + $0x18] ss:$0 sps:$4 sm:$0x22]  }
 0x277   : > { %v4257_v2 = vld [vmem:[#allocation2 + $0x48] ss:$0 sps:$4 sm:$0x22]   ;;  %v4260_v40 = vld [vmem:[#allocation2 + $0x6c] ss:$0 sps:$4 sm:$0x22]   ;;  %v1044_v51 = vunpack.c.l.b16 %v4256_v4  ;;  %v1041_v20 = vunpack.c.l.b16 %v4253_v21 }
 0x278   : > { %v646_v58 = vpop.permute.xlu0 %645  ;;  %v477_v1 = vpop.permute.xlu1 %476  ;;  %v4258_v8 = vld [vmem:[#allocation2 + $0x54] ss:$0 sps:$4 sm:$0x22]   ;;  %v4262_v61 = vld [vmem:[#allocation2 + $0x84] ss:$0 sps:$4 sm:$0x22]   ;;  %v1048_v42 = vunpack.c.l.b16 %v4260_v40  ;;  %v1045_v25 = vunpack.c.l.b16 %v4257_v2 }
 0x279   : > { %654 = vst.msk [vmem:[#allocation2 + $0xac] sm:$0xf] %vm467_vm3, %v646_v58  ;;  %v4215_v35 = vld [vmem:[#allocation2 + $0x94] ss:$0 sps:$4 sm:$0x11]   ;;  %v1056_v53 = vrot.slane %v1040_v19, 1  ;;  %v1046_v50 = vunpack.c.l.b16 %v4258_v8  ;;  %v1050_v6 = vunpack.c.l.b16 %v4262_v61 }
 0x27a   : > { %484 = vst.msk [vmem:[#allocation2 + $0x14] sm:$0x1] %vm470_vm4, %v477_v1  ;;  %v4263_v13 = vld [vmem:[#allocation2 + $0x90] ss:$0 sps:$4 sm:$0x22]   ;;  %v5017_v15 = vrot.slane %v2052_v34, 5  ;;  %v2053_v10 = vunpack.c.l.b16 %v4215_v35 }
 0x27b   : > { %v4264_v41 = vld [vmem:[#allocation2 + $0x9c] ss:$0 sps:$4 sm:$0x22]   ;;  %v4261_v59 = vld [vmem:[#allocation2 + $0x78] ss:$0 sps:$4 sm:$0x22]   ;;  %v1051_v58 = vunpack.c.l.b16 %v4263_v13  ;;  %v1057_v11 = vsel %vm764_vm7, %v1056_v53, %v4852_v44 }
 0x27c   : > { %v659_v16 = vpop.permute.xlu0 %658  ;;  %v490_v17 = vpop.permute.xlu1 %489  ;;  %v4265_v18 = vld [vmem:[#allocation2 + $0xa8] ss:$0 sps:$4 sm:$0x22]   ;;  %v4266_v39 = vld [vmem:[#allocation2 + $0xb4] ss:$0 sps:$4 sm:$0x22]   ;;  %v1052_v1 = vunpack.c.l.b16 %v4264_v41  ;;  %v1049_v40 = vunpack.c.l.b16 %v4261_v59  ;;  %v1058_v44 = vsel %vm767_vm8, %v1041_v20, %v1057_v11 }
 0x27d   : > { %667 = vst.msk [vmem:[#allocation2 + $0xb8] sm:$0xf] %vm467_vm3, %v659_v16  ;;  %v5020_v9 = vrot.slane %v2046_v37, 3  ;;  %v1059_v52 = vrot.slane %v1042_v31, 7  ;;  %v1061_v4 = vrot.slane %v1043_v38, 6  ;;  %v1070_v2 = vrot.slane %v1048_v42, 1 }
 0x27e   : > { %497 = vst.msk [vmem:[#allocation2 + $0x20] sm:$0x1] %vm470_vm4, %v490_v17  ;;  %v1053_v27 = vunpack.c.l.b16 %v4265_v18  ;;  %v1063_v19 = vrot.slane %v1044_v51, 5  ;;  %v1065_v16 = vrot.slane %v1045_v25, 4  ;;  %v1054_v17 = vunpack.c.l.b16 %v4266_v39 }
 0x27f   : > { %v1067_v34 = vrot.slane %v1046_v50, 3  ;;  %v1071_v61 = vsel %vm764_vm7, %v1070_v2, %v4854_v45  ;;  %v1073_v37 = vrot.slane %v1050_v6, 7  ;;  %v1075_v13 = vrot.slane %v1051_v58, 6  ;;  %v4216_v31 = vld [vmem:[#allocation2 + $0x4c] ss:$0 sps:$4 sm:$0x11]  }
 0x280   : > { %v5015_v54 = vpop.permute.xlu0 %2445  ;;  %v503_v63 = vpop.permute.xlu1 %502  ;;  %v1072_v35 = vsel %vm767_vm8, %v1049_v40, %v1071_v61  ;;  %v1077_v41 = vrot.slane %v1052_v1, 5  ;;  %v1060_v59 = vsel %vm770_vm9, %v1059_v52, %v1058_v44  ;;  %v5032_v38 = vld [vmem:[#allocation2 + $0x4] ss:$0 sps:$4 sm:$0x11]   ;;  %v5034_v42 = vrot.slane %v2053_v10, 4 }
 0x281   : > { %510 = vst.msk [vmem:[#allocation2 + $0x2c] sm:$0x1] %vm470_vm4, %v503_v63  ;;  %v1074_v18 = vsel %vm770_vm9, %v1073_v37, %v1072_v35  ;;  %v4234_v45 = vld [vmem:[#allocation2 + $0x7c] ss:$0 sps:$4 sm:$0x11]   ;;  %v1062_v51 = vsel %vm773_vm10, %v1061_v4, %v1060_v59  ;;  %v1079_v53 = vrot.slane %v1053_v27, 4  ;;  %v2047_v35 = vunpack.c.l.b16 %v4216_v31 }
 0x282   : > { %v1076_v25 = vsel %vm773_vm10, %v1075_v13, %v1074_v18  ;;  %v1064_v20 = vsel %vm776_vm11, %v1063_v19, %v1062_v51  ;;  %v1081_v6 = vrot.slane %v1054_v17, 3  ;;  %v4271_v58 = vld [vmem:[#allocation2 + $0xc] ss:$0 sps:$4 sm:$0x88]   ;;  %v2051_v18 = vunpack.c.l.b16 %v4234_v45 }
 0x283   : > { %v1078_v50 = vsel %vm776_vm11, %v1077_v41, %v1076_v25  ;;  %v1066_v1 = vsel %vm779_vm12, %v1065_v16, %v1064_v20  ;;  %v4272_v10 = vld [vmem:[#allocation2 + $0x18] ss:$0 sps:$4 sm:$0x88]   ;;  %v4273_v11 = vld [vmem:[#allocation2 + $0x24] ss:$0 sps:$4 sm:$0x88]   ;;  %v1718_v61 = vunpack.c.l.b16 %v4271_v58 }
 0x284   : > { %v596_v21 = vpop.permute.xlu0 %595  ;;  %v516_v8 = vpop.permute.xlu1 %515  ;;  %v1080_v52 = vsel %vm779_vm12, %v1079_v53, %v1078_v50  ;;  %v5044_v4 = vld [vmem:[#allocation2 + $0x64] ss:$0 sps:$4 sm:$0x11]   ;;  %v1068_v2 = vsel %vm5654_vm13, %v1067_v34, %v1066_v1  ;;  %v4274_v27 = vld [vmem:[#allocation2 + $0x30] ss:$0 sps:$4 sm:$0x88]   ;;  %v1719_v37 = vunpack.c.l.b16 %v4272_v10  ;;  %v1720_v59 = vunpack.c.l.b16 %v4273_v11 }
 0x285   : > { %603 = vst.msk [vmem:[#allocation2 + $0x80] sm:$0x1] %vm470_vm4, %v596_v21  ;;  %523 = vst.msk [vmem:[#allocation2 + $0x38] sm:$0x1] %vm470_vm4, %v516_v8  ;;  %v1082_v40 = vsel %vm5654_vm13, %v1081_v6, %v1080_v52  ;;  %v2041_v34 = vunpack.c.l.b16 %v5032_v38  ;;  %v1721_v53 = vunpack.c.l.b16 %v4274_v27  ;;  %v1734_v11 = vrot.slane %v1718_v61, 5 }
 0x286   : > { %v4275_v19 = vld [vmem:[#allocation2 + $0x3c] ss:$0 sps:$4 sm:$0x88]   ;;  %v5048_v21 = vld [vmem:[#allocation2 + $0xa0] ss:$0 sps:$4 sm:$0x11]   ;;  %v1083_v8 = vpack.c.b16 %v1082_v40, %v1068_v2  ;;  %v2049_v45 = vunpack.c.l.b16 %v5044_v4 }
 0x287   : > { %v4277_v17 = vld [vmem:[#allocation2 + $0x54] ss:$0 sps:$4 sm:$0x88]   ;;  %v4279_v13 = vld [vmem:[#allocation2 + $0x6c] ss:$0 sps:$4 sm:$0x88]   ;;  %v1722_v20 = vunpack.c.l.b16 %v4275_v19  ;;  %v2054_v19 = vunpack.c.l.b16 %v5048_v21  ;;  %v1735_v61 = vsel %vm764_vm7, %v1734_v11, %v4860_v47 }
 0x288   : > { %v609_v63 = vpop.permute.xlu0 %608  ;;  %v529_v39 = vpop.permute.xlu1 %528  ;;  %v4280_v41 = vld [vmem:[#allocation2 + $0x78] ss:$0 sps:$4 sm:$0x88]   ;;  %1084 = vrot.lane.b32.xlu1 %v1083_v8, %s4529_s30  ;;  %v4281_v51 = vld [vmem:[#allocation2 + $0x84] ss:$0 sps:$4 sm:$0x88]   ;;  %v1724_v50 = vunpack.c.l.b16 %v4277_v17  ;;  %v1726_v31 = vunpack.c.l.b16 %v4279_v13  ;;  %v2072_v47 = vsel %vm764_vm7, %v5009_v28, %v2049_v45 }
 0x289   : > { %616 = vst.msk [vmem:[#allocation2 + $0x8c] sm:$0x1] %vm470_vm4, %v609_v63  ;;  %536 = vst.msk [vmem:[#allocation2 + $0x44] sm:$0x1] %vm470_vm4, %v529_v39  ;;  %v1727_v6 = vunpack.c.l.b16 %v4280_v41  ;;  %v1728_v52 = vunpack.c.l.b16 %v4281_v51  ;;  %v1736_v2 = vrot.slane %v1719_v37, 4  ;;  %v5055_v8 = vrot.slane %v2047_v35, 2 }
 0x28a   : > { %v4282_v25 = vld [vmem:[#allocation2 + $0x90] ss:$0 sps:$4 sm:$0x88]   ;;  %v4267_v63 = vld [vmem:[#allocation2 + $0xac] ss:$0 sps:$4 sm:$0x11]  }
 0x28b   : > { %v4283_v39 = vld [vmem:[#allocation2 + $0x9c] ss:$0 sps:$4 sm:$0x88]   ;;  %v4276_v58 = vld [vmem:[#allocation2 + $0x48] ss:$0 sps:$4 sm:$0x88]   ;;  %v1729_v10 = vunpack.c.l.b16 %v4282_v25  ;;  %v1737_v13 = vsel %vm767_vm8, %v1736_v2, %v1735_v61 }
 0x28c   : > { %v622_v44 = vpop.permute.xlu0 %621  ;;  %v542_v16 = vpop.permute.xlu1 %541  ;;  %v4285_v1 = vld [vmem:[#allocation2 + $0xb4] ss:$0 sps:$4 sm:$0x88]   ;;  %v1738_v27 = vrot.slane %v1720_v59, 3  ;;  %v2073_v17 = vrot.slane %v2051_v18, 6  ;;  %v1740_v37 = vrot.slane %v1721_v53, 2  ;;  %v1723_v53 = vunpack.c.l.b16 %v4276_v58 }
 0x28d   : > { %629 = vst.msk [vmem:[#allocation2 + $0x98] sm:$0x1] %vm470_vm4, %v622_v44  ;;  %549 = vst.msk [vmem:[#allocation2 + $0x50] sm:$0x1] %vm470_vm4, %v542_v16  ;;  %v1730_v44 = vunpack.c.l.b16 %v4283_v39  ;;  %v1742_v41 = vrot.slane %v1722_v20, 1  ;;  %v1745_v4 = vrot.slane %v1724_v50, 7  ;;  %v1732_v60 = vunpack.c.l.b16 %v4285_v1 }
 0x28e   : > { %v4284_v16 = vld [vmem:[#allocation2 + $0xa8] ss:$0 sps:$4 sm:$0x88]   ;;  %v1748_v35 = vrot.slane %v1726_v31, 5  ;;  %v1750_v51 = vrot.slane %v1727_v6, 4  ;;  %v1752_v25 = vrot.slane %v1728_v52, 3  ;;  %v1739_v21 = vsel %vm770_vm9, %v1738_v27, %v1737_v13 }
 0x28f   : > { %v1754_v59 = vrot.slane %v1729_v10, 2  ;;  %v1756_v39 = vrot.slane %v1730_v44, 1  ;;  %v1741_v20 = vsel %vm773_vm10, %v1740_v37, %v1739_v21  ;;  %v1731_v1 = vunpack.c.l.b16 %v4284_v16  ;;  %v4287_v52 = vld [vmem:[#allocation2 + $0xc] ss:$0 sps:$4 sm:$0x22]  }
 0x290   : > { %v635_v40 = vpop.permute.xlu0 %634  ;;  %v555_v38 = vpop.permute.xlu1 %554  ;;  %v1749_v18 = vsel %vm764_vm7, %v1748_v35, %v4862_v48  ;;  %v1743_v31 = vsel %vm776_vm11, %v1742_v41, %v1741_v20  ;;  %v2058_v48 = vsel %vm764_vm7, %v5001_v43, %v2041_v34  ;;  %v4288_v10 = vld [vmem:[#allocation2 + $0x18] ss:$0 sps:$4 sm:$0x22]   ;;  %v2079_v28 = vrot.slane %v2054_v19, 3 }
 0x291   : > { %642 = vst.msk [vmem:[#allocation2 + $0xa4] sm:$0x1] %vm470_vm4, %v635_v40  ;;  %562 = vst.msk [vmem:[#allocation2 + $0x5c] sm:$0x1] %vm470_vm4, %v555_v38  ;;  %v2055_v38 = vunpack.c.l.b16 %v4267_v63  ;;  %v1751_v50 = vsel %vm767_vm8, %v1750_v51, %v1749_v18  ;;  %v2074_v63 = vsel %vm767_vm8, %v2073_v17, %v2072_v47  ;;  %v1759_v2 = vrot.slane %v1732_v60, 7 }
 0x292   : > { %v1753_v6 = vsel %vm770_vm9, %v1752_v25, %v1751_v50  ;;  %v4290_v45 = vld [vmem:[#allocation2 + $0x30] ss:$0 sps:$4 sm:$0x22]   ;;  %v2060_v44 = vsel %vm767_vm8, %v5007_v26, %v2058_v48  ;;  %v2076_v27 = vsel %vm770_vm9, %v5017_v15, %v2074_v63  ;;  %v1744_v43 = vsel %vm779_vm12, %v1723_v53, %v1743_v31  ;;  %v4291_v17 = vld [vmem:[#allocation2 + $0x3c] ss:$0 sps:$4 sm:$0x22]  }
 0x293   : > { %v5078_v58 = vrot.slane %v2055_v38, 2  ;;  %v4292_v16 = vld [vmem:[#allocation2 + $0x48] ss:$0 sps:$4 sm:$0x22]   ;;  %v1746_v19 = vsel %vm5654_vm13, %v1745_v4, %v1744_v43  ;;  %v1199_v60 = vunpack.c.l.b16 %v4287_v52  ;;  %v1200_v41 = vunpack.c.l.b16 %v4288_v10 }
 0x294   : > { %v648_v40 = vpop.permute.xlu0 %647  ;;  %v583_v46 = vpop.permute.xlu1 %582  ;;  %v4293_v37 = vld [vmem:[#allocation2 + $0x54] ss:$0 sps:$4 sm:$0x22]   ;;  %v4295_v13 = vld [vmem:[#allocation2 + $0x6c] ss:$0 sps:$4 sm:$0x22]   ;;  %v1202_v25 = vunpack.c.l.b16 %v4290_v45  ;;  %v2062_v15 = vsel %vm770_vm9, %v4994_v0, %v2060_v44  ;;  %v1203_v38 = vunpack.c.l.b16 %v4291_v17  ;;  %v1204_v21 = vunpack.c.l.b16 %v4292_v16 }
 0x295   : > { %655 = vst.msk [vmem:[#allocation2 + $0xb0] sm:$0x1] %vm470_vm4, %v648_v40  ;;  %590 = vst.msk [vmem:[#allocation2 + $0x74] sm:$0x1] %vm470_vm4, %v583_v46  ;;  %v1755_v46 = vsel %vm773_vm10, %v1754_v59, %v1753_v6  ;;  %v1207_v18 = vunpack.c.l.b16 %v4295_v13  ;;  %v2064_v4 = vsel %vm773_vm10, %v5013_v33, %v2062_v15  ;;  %v2078_v47 = vsel %vm773_vm10, %v5034_v42, %v2076_v27 }
 0x296   : > { %v1757_v11 = vsel %vm776_vm11, %v1756_v39, %v1755_v46  ;;  %v4289_v51 = vld [vmem:[#allocation2 + $0x24] ss:$0 sps:$4 sm:$0x22]   ;;  %v4296_v26 = vld [vmem:[#allocation2 + $0x78] ss:$0 sps:$4 sm:$0x22]   ;;  %v1205_v50 = vunpack.c.l.b16 %v4293_v37 }
 0x297   : > { %v1758_v34 = vsel %vm779_vm12, %v1731_v1, %v1757_v11  ;;  %v4297_v59 = vld [vmem:[#allocation2 + $0x84] ss:$0 sps:$4 sm:$0x22]   ;;  %v4298_v39 = vld [vmem:[#allocation2 + $0x90] ss:$0 sps:$4 sm:$0x22]   ;;  %v1208_v63 = vunpack.c.l.b16 %v4296_v26  ;;  %v1201_v46 = vunpack.c.l.b16 %v4289_v51 }
 0x298   : > { %v1760_v61 = vsel %vm5654_vm13, %v1759_v2, %v1758_v34  ;;  %v4299_v40 = vld [vmem:[#allocation2 + $0x9c] ss:$0 sps:$4 sm:$0x22]   ;;  %v4300_v53 = vld [vmem:[#allocation2 + $0xa8] ss:$0 sps:$4 sm:$0x22]   ;;  %v1210_v31 = vunpack.c.l.b16 %v4298_v39  ;;  %v1209_v16 = vunpack.c.l.b16 %v4297_v59 }
 0x299   : > { %v1761_v35 = vpack.c.b16 %v1760_v61, %v1746_v19  ;;  %v4301_v20 = vld [vmem:[#allocation2 + $0xb4] ss:$0 sps:$4 sm:$0x22]   ;;  %v1211_v0 = vunpack.c.l.b16 %v4299_v40  ;;  %v1215_v6 = vrot.slane %v1199_v60, 2  ;;  %v1217_v48 = vrot.slane %v1200_v41, 1 }
 0x29a   : > { %v4302_v1 = vld [vmem:[#allocation2 + $0xb8] ss:$0 sps:$4 sm:$0x11]   ;;  %v1212_v52 = vunpack.c.l.b16 %v4300_v53  ;;  %v1213_v10 = vunpack.c.l.b16 %v4301_v20  ;;  %v1220_v11 = vrot.slane %v1202_v25, 7  ;;  %v1222_v2 = vrot.slane %v1203_v38, 6 }
 0x29b   : > { %1762 = vrot.lane.b32.xlu0 %v1761_v35, %s4525_s26  ;;  %v1216_v33 = vsel %vm764_vm7, %v1215_v6, %v4876_v62  ;;  %v1224_v42 = vrot.slane %v1204_v21, 5  ;;  %v1229_v45 = vrot.slane %v1207_v18, 2  ;;  %v4420_v44 = vld [vmem:[#allocation2 + $0x64] ss:$0 sps:$4 sm:$0x88]   ;;  %v1226_v43 = vrot.slane %v1205_v50, 4 }
 0x29c   : > { %v1218_v27 = vsel %vm767_vm8, %v1217_v48, %v1216_v33  ;;  %v1231_v34 = vrot.slane %v1208_v63, 1  ;;  %v1234_v17 = vrot.slane %v1210_v31, 7  ;;  %v1236_v61 = vrot.slane %v1211_v0, 6  ;;  %v4428_v13 = vld [vmem:[#allocation2 + $0x4] ss:$0 sps:$4 sm:$0x88]  }
 0x29d   : > { %v1230_v19 = vsel %vm764_vm7, %v1229_v45, %v4878_v5  ;;  %v1238_v37 = vrot.slane %v1212_v52, 5  ;;  %v2066_v60 = vsel %vm776_vm11, %v5020_v9, %v2064_v4  ;;  %v2080_v62 = vsel %vm776_vm11, %v2079_v28, %v2078_v47  ;;  %v4436_v15 = vld [vmem:[#allocation2 + $0x64] ss:$0 sps:$4 sm:$0x88]   ;;  %v661_v52 = vpop.permute.xlu0 %660 }
 0x29e   : > { %v1232_v41 = vsel %vm767_vm8, %v1231_v34, %v1230_v19  ;;  %v2056_v35 = vunpack.c.l.b16 %v4302_v1  ;;  %v2068_v51 = vsel %vm779_vm12, %v5055_v8, %v2066_v60  ;;  %v1219_v26 = vsel %vm770_vm9, %v1201_v46, %v1218_v27  ;;  %v4305_v47 = vld [vmem:[#allocation2 + $0xc] ss:$0 sps:$4 sm:$0x44]   ;;  %v4306_v53 = vld [vmem:[#allocation2 + $0x18] ss:$0 sps:$4 sm:$0x44]  }
 0x29f   : > { %v1233_v25 = vsel %vm770_vm9, %v1209_v16, %v1232_v41  ;;  %v1221_v5 = vsel %vm773_vm10, %v1220_v11, %v1219_v26  ;;  %v1240_v39 = vrot.slane %v1213_v10, 4  ;;  %v2082_v9 = vsel %vm779_vm12, %v5078_v58, %v2080_v62  ;;  %v4307_v63 = vld [vmem:[#allocation2 + $0x24] ss:$0 sps:$4 sm:$0x44]   ;;  %668 = vst.msk [vmem:[#allocation2 + $0xbc] sm:$0x1] %vm470_vm4, %v661_v52 }
 0x2a0   : > { %v1235_v59 = vsel %vm773_vm10, %v1234_v17, %v1233_v25  ;;  %v2083_v40 = vrot.slane %v2056_v35, 1  ;;  %v1223_v28 = vsel %vm776_vm11, %v1222_v2, %v1221_v5  ;;  %v3060_v21 = vunpack.c.l.b16 %v4420_v44  ;;  %v4308_v31 = vld [vmem:[#allocation2 + $0x30] ss:$0 sps:$4 sm:$0x44]  }
 0x2a1   : > { %v1237_v38 = vsel %vm776_vm11, %v1236_v61, %v1235_v59  ;;  %v1225_v8 = vsel %vm779_vm12, %v1224_v42, %v1223_v28  ;;  %v2070_v20 = vsel %vm5654_vm13, %v5003_v7, %v2068_v51  ;;  %v3191_v6 = vunpack.c.l.b16 %v4428_v13  ;;  %v5122_v1 = vld [vmem:[#allocation2 + $0x3c] ss:$0 sps:$4 sm:$0x44]   ;;  %v4310_v46 = vld [vmem:[#allocation2 + $0x48] ss:$0 sps:$4 sm:$0x44]   ;;  %v963_v5 = vpop.permute.xlu0 %962 }
 0x2a2   : > { %v1239_v18 = vsel %vm779_vm12, %v1238_v37, %v1237_v38  ;;  %v2084_v4 = vsel %vm5654_vm13, %v2083_v40, %v2082_v9  ;;  %v1227_v50 = vsel %vm5654_vm13, %v1226_v43, %v1225_v8  ;;  %v4311_v10 = vld [vmem:[#allocation2 + $0x54] ss:$0 sps:$4 sm:$0x44]   ;;  %v4313_v11 = vld [vmem:[#allocation2 + $0x6c] ss:$0 sps:$4 sm:$0x44]   ;;  %v1577_v33 = vunpack.c.l.b16 %v4305_v47 }
 0x2a3   : > { %v1241_v58 = vsel %vm5654_vm13, %v1240_v39, %v1239_v18  ;;  %v2085_v0 = vpack.c.b16 %v2084_v4, %v2070_v20  ;;  %v1578_v2 = vunpack.c.l.b16 %v4306_v53  ;;  %v3199_v7 = vunpack.c.l.b16 %v4436_v15  ;;  %v4314_v42 = vld [vmem:[#allocation2 + $0x78] ss:$0 sps:$4 sm:$0x44]   ;;  %v4315_v45 = vld [vmem:[#allocation2 + $0x84] ss:$0 sps:$4 sm:$0x44]   ;;  %v967_v15 = vpop.permute.xlu1 %966 }
 0x2a4   : > { %v1242_v48 = vpack.c.b16 %v1241_v58, %v1227_v50  ;;  %v1579_v44 = vunpack.c.l.b16 %v4307_v63  ;;  %v1580_v27 = vunpack.c.l.b16 %v4308_v31  ;;  %v4316_v43 = vld [vmem:[#allocation2 + $0x90] ss:$0 sps:$4 sm:$0x44]   ;;  %v1582_v34 = vunpack.c.l.b16 %v4310_v46  ;;  %v4318_v61 = vld [vmem:[#allocation2 + $0xa8] ss:$0 sps:$4 sm:$0x44]  }
 0x2a5   : > { %2087 = vst.msk [vmem:[#allocation3 + $0x8] sm:$0xff] %vm394_vm1, %v2085_v0  ;;  %v1585_v17 = vunpack.c.l.b16 %v4313_v11  ;;  %v5127_v16 = vrot.slane %v3060_v21, 6  ;;  %v5129_v19 = vrot.slane %v3191_v6, 7  ;;  %v4319_v37 = vld [vmem:[#allocation2 + $0xb4] ss:$0 sps:$4 sm:$0x44]   ;;  %v1583_v13 = vunpack.c.l.b16 %v4311_v10  ;;  %v2444_v52 = vpop.permute.xlu0 %2443 }
 0x2a6   : > { %1243 = vrot.lane.b32.xlu1 %v1242_v48, %s4528_s29  ;;  %v1586_v60 = vunpack.c.l.b16 %v4314_v42  ;;  %v1587_v62 = vunpack.c.l.b16 %v4315_v45  ;;  %v4317_v41 = vld [vmem:[#allocation2 + $0x9c] ss:$0 sps:$4 sm:$0x44]   ;;  %v1588_v35 = vunpack.c.l.b16 %v4316_v43  ;;  %v1593_v51 = vrot.slane %v1577_v33, 4 }
 0x2a7   : > { %v1595_v26 = vrot.slane %v1578_v2, 3  ;;  %v5131_v25 = vrot.slane %v3199_v7, 7  ;;  %v4303_v59 = vld [vmem:[#allocation2 + $0x20] ss:$0 sps:$4 sm:$0x11]   ;;  %v1581_v39 = vunpack.c.l.b16 %v5122_v1  ;;  %v1590_v40 = vunpack.c.l.b16 %v4318_v61  ;;  %v2448_v46 = vpop.permute.xlu1 %2447 }
 0x2a8   : > { %v1597_v9 = vrot.slane %v1579_v44, 2  ;;  %v1599_v28 = vrot.slane %v1580_v27, 1  ;;  %v1591_v38 = vunpack.c.l.b16 %v4319_v37  ;;  %v1594_v21 = vsel %vm764_vm7, %v1593_v51, %v4884_v12  ;;  %v4320_v2 = vld [vmem:[#allocation2 + $0x2c] ss:$0 sps:$4 sm:$0x11]  }
 0x2a9   : > { %v1602_v8 = vrot.slane %v1582_v34, 7  ;;  %v1607_v18 = vrot.slane %v1585_v17, 4  ;;  %v1596_v4 = vsel %vm767_vm8, %v1595_v26, %v1594_v21  ;;  %v1604_v47 = vrot.slane %v1583_v13, 6  ;;  %v4322_v42 = vld [vmem:[#allocation2 + $0xc] ss:$0 sps:$4 sm:$0x88]  }
 0x2aa   : > { %v1609_v53 = vrot.slane %v1586_v60, 3  ;;  %v1611_v20 = vrot.slane %v1587_v62, 2  ;;  %v1598_v58 = vsel %vm770_vm9, %v1597_v9, %v1596_v4  ;;  %v1613_v31 = vrot.slane %v1588_v35, 1  ;;  %v4323_v45 = vld [vmem:[#allocation2 + $0x18] ss:$0 sps:$4 sm:$0x88]  }
 0x2ab   : > { %v1608_v63 = vsel %vm764_vm7, %v1607_v18, %v4887_v22  ;;  %v1616_v0 = vrot.slane %v1590_v40, 7  ;;  %v1600_v6 = vsel %vm773_vm10, %v1599_v28, %v1598_v58  ;;  %v1589_v48 = vunpack.c.l.b16 %v4317_v41  ;;  %v4324_v17 = vld [vmem:[#allocation2 + $0x24] ss:$0 sps:$4 sm:$0x88]  }
 0x2ac   : > { %v2089_v50 = vld [vmem:[#allocation3 + $0x8] sm:$0xff]  ;;  %v1610_v12 = vsel %vm767_vm8, %v1609_v53, %v1608_v63  ;;  %v3515_v10 = vunpack.c.l.b16 %v4303_v59  ;;  %v1618_v33 = vrot.slane %v1591_v38, 6  ;;  %v1601_v22 = vsel %vm776_vm11, %v1581_v39, %v1600_v6  ;;  %v4325_v61 = vld [vmem:[#allocation2 + $0x30] ss:$0 sps:$4 sm:$0x88]  }
 0x2ad   : > { %3908 = vmatprep.mubr.msk.bf16.mxu1 %vm394_vm1, %v2089_v50  ;;  %v1612_v1 = vsel %vm770_vm9, %v1611_v20, %v1610_v12  ;;  %v970_v44 = vsel %vm5653_vm14, %v4807_v56, %v967_v15  ;;  %v969_v27 = vsel %vm5653_vm14, %v963_v5, %v4807_v56  ;;  %v1603_v43 = vsel %vm779_vm12, %v1602_v8, %v1601_v22  ;;  %v4326_v41 = vld [vmem:[#allocation2 + $0x3c] ss:$0 sps:$4 sm:$0x88]   ;;  %v4327_v35 = vld [vmem:[#allocation2 + $0x48] ss:$0 sps:$4 sm:$0x88]  }
 0x2ae   : > { %v1614_v11 = vsel %vm773_vm10, %v1613_v31, %v1612_v1  ;;  %2115 = vmatprep.subr.bf16.mxu1 %v970_v44  ;;  %v2450_v37 = vsel %vm5653_vm14, %v5015_v54, %v2448_v46  ;;  %v2449_v13 = vsel %vm5653_vm14, %v2444_v52, %v5015_v54  ;;  %v1605_v60 = vsel %vm5654_vm13, %v1604_v47, %v1603_v43  ;;  %v4330_v26 = vld [vmem:[#allocation2 + $0x6c] ss:$0 sps:$4 sm:$0x88]   ;;  %v4331_v59 = vld [vmem:[#allocation2 + $0x78] ss:$0 sps:$4 sm:$0x88]  }
 0x2af   : > { %v1615_v7 = vsel %vm776_vm11, %v1589_v48, %v1614_v11  ;;  %2116 = vmatpush1.bf16.msra.mxu1 %v969_v27  ;;  %3587 = vmatprep.subr.bf16.mxu0 %v2450_v37  ;;  %v5159_v56 = vrot.slane %v3515_v10, 7  ;;  %v1880_v15 = vunpack.c.l.b16 %v4322_v42  ;;  %v1881_v5 = vunpack.c.l.b16 %v4323_v45  ;;  %v4332_v39 = vld [vmem:[#allocation2 + $0x84] ss:$0 sps:$4 sm:$0x88]   ;;  %v4511_v20 = vld [vmem:[%s4597_s12 + $0xc] sm:$0xff] }
 0x2b0   : > { %v1617_v34 = vsel %vm779_vm12, %v1616_v0, %v1615_v7  ;;  %3588 = vmatpush1.bf16.msra.mxu0 %v2449_v13  ;;  %v1882_v54 = vunpack.c.l.b16 %v4324_v17  ;;  %v1883_v40 = vunpack.c.l.b16 %v4325_v61  ;;  %v3516_v9 = vunpack.c.l.b16 %v4320_v2  ;;  %v4333_v28 = vld [vmem:[#allocation2 + $0x90] ss:$0 sps:$4 sm:$0x88]   ;;  %v4334_v38 = vld [vmem:[#allocation2 + $0x9c] ss:$0 sps:$4 sm:$0x88]  }
 0x2b1   : > { %v1619_v62 = vsel %vm5654_vm13, %v1618_v33, %v1617_v34  ;;  %v1884_v21 = vunpack.c.l.b16 %v4326_v41  ;;  %v1888_v8 = vunpack.c.l.b16 %v4330_v26  ;;  %v4328_v18 = vld [vmem:[#allocation2 + $0x54] ss:$0 sps:$4 sm:$0x88]   ;;  %v4335_v4 = vld [vmem:[#allocation2 + $0xa8] ss:$0 sps:$4 sm:$0x88]   ;;  %v1885_v47 = vunpack.c.l.b16 %v4327_v35 }
 0x2b2   : > { %v1620_v51 = vpack.c.b16 %v1619_v62, %v1605_v60  ;;  %v1889_v53 = vunpack.c.l.b16 %v4331_v59  ;;  %v4512_v50 = vld [vmem:[%s4597_s12] sm:$0xee]  ;;  %v1890_v63 = vunpack.c.l.b16 %v4332_v39  ;;  %v1891_v31 = vunpack.c.l.b16 %v4333_v28  ;;  %v4337_v46 = vld [vmem:[#allocation2 + $0x80] ss:$0 sps:$4 sm:$0x11]  }
 0x2b3   : > { %v3886_v58 = vcombine.low %v4512_v50, %v4511_v20  ;;  %v1896_v0 = vrot.slane %v1880_v15, 6  ;;  %v1898_v6 = vrot.slane %v1881_v5, 5  ;;  %v1892_v12 = vunpack.c.l.b16 %v4334_v38  ;;  %v4513_v52 = vld [vmem:[%s4597_s12 + $0x18] sm:$0x11] }
 0x2b4   : > { %1621 = vrot.lane.b32.xlu1 %v1620_v51, %s4526_s27  ;;  %v1900_v48 = vrot.slane %v1882_v54, 4  ;;  %v1902_v1 = vrot.slane %v1883_v40, 3  ;;  %v3889_v10 = vcombine.low %v4513_v52, %v4513_v52  ;;  %v5165_v11 = vrot.slane %v3516_v9, 6  ;;  %v4336_v33 = vld [vmem:[#allocation2 + $0xb4] ss:$0 sps:$4 sm:$0x88]  }
 0x2b5   : > { %v1897_v2 = vsel %vm764_vm7, %v1896_v0, %v4889_v23  ;;  %v1904_v22 = vrot.slane %v1884_v21, 2  ;;  %v1910_v7 = vrot.slane %v1888_v8, 6  ;;  %v4338_v42 = vld [vmem:[#allocation2 + $0x38] ss:$0 sps:$4 sm:$0x11]   ;;  %v1893_v45 = vunpack.c.l.b16 %v4335_v4 }
 0x2b6   : > { %v1899_v44 = vsel %vm767_vm8, %v1898_v6, %v1897_v2  ;;  %v1906_v27 = vrot.slane %v1885_v47, 1  ;;  %v1912_v43 = vrot.slane %v1889_v53, 5  ;;  %v1914_v61 = vrot.slane %v1890_v63, 4  ;;  %v4339_v13 = vld [vmem:[#allocation2 + $0x8c] ss:$0 sps:$4 sm:$0x11]  }
 0x2b7   : > { %v1901_v34 = vsel %vm770_vm9, %v1900_v48, %v1899_v44  ;;  %v1911_v17 = vsel %vm764_vm7, %v1910_v7, %v4891_v24  ;;  %v1916_v37 = vrot.slane %v1891_v31, 3  ;;  %v1886_v60 = vunpack.c.l.b16 %v4328_v18  ;;  %v4340_v35 = vld [vmem:[#allocation2 + $0x44] ss:$0 sps:$4 sm:$0x11]  }
 0x2b8   : > { %v1903_v62 = vsel %vm773_vm10, %v1902_v1, %v1901_v34  ;;  %v1913_v23 = vsel %vm767_vm8, %v1912_v43, %v1911_v17  ;;  %v1918_v41 = vrot.slane %v1892_v12, 2  ;;  %v3523_v15 = vunpack.c.l.b16 %v4337_v46  ;;  %v4341_v59 = vld [vmem:[#allocation2 + $0x98] ss:$0 sps:$4 sm:$0x11]  }
 0x2b9   : > { %v1905_v51 = vsel %vm776_vm11, %v1904_v22, %v1903_v62  ;;  %v1915_v26 = vsel %vm770_vm9, %v1914_v61, %v1913_v23  ;;  %v3517_v5 = vunpack.c.l.b16 %v4338_v42  ;;  %v1920_v54 = vrot.slane %v1893_v45, 1  ;;  %v4344_v6 = vld [vmem:[#allocation2 + $0x10] ss:$0 sps:$4 sm:$0x22]  }
 0x2ba   : > { %v1907_v39 = vsel %vm779_vm12, %v1906_v27, %v1905_v51  ;;  %v1917_v24 = vsel %vm773_vm10, %v1916_v37, %v1915_v26  ;;  %v3524_v40 = vunpack.c.l.b16 %v4339_v13  ;;  %v1894_v9 = vunpack.c.l.b16 %v4336_v33  ;;  %v4345_v12 = vld [vmem:[#allocation2 + $0x1c] ss:$0 sps:$4 sm:$0x22]   ;;  %v4346_v48 = vld [vmem:[#allocation2 + $0x28] ss:$0 sps:$4 sm:$0x22]  }
 0x2bb   : > { %v1919_v28 = vsel %vm776_vm11, %v1918_v41, %v1917_v24  ;;  %v3518_v38 = vunpack.c.l.b16 %v4340_v35  ;;  %v5180_v21 = vrot.slane %v3886_v58, 1  ;;  %v3525_v18 = vunpack.c.l.b16 %v4341_v59  ;;  %v4347_v1 = vld [vmem:[#allocation2 + $0x34] ss:$0 sps:$4 sm:$0x22]  }
 0x2bc   : > { %v1921_v8 = vsel %vm779_vm12, %v1920_v54, %v1919_v28  ;;  %v1908_v4 = vsel %vm5654_vm13, %v1886_v60, %v1907_v39  ;;  %v5185_v53 = vrot.slane %v3523_v15, 7  ;;  %v5187_v20 = vrot.slane %v3517_v5, 5  ;;  %v4348_v46 = vld [vmem:[#allocation2 + $0x40] ss:$0 sps:$4 sm:$0x22]  }
 0x2bd   : > { %v1922_v47 = vsel %vm5654_vm13, %v1894_v9, %v1921_v8  ;;  %v5189_v63 = vrot.slane %v3524_v40, 6  ;;  %v5191_v31 = vrot.slane %v3518_v38, 4  ;;  %v5193_v0 = vrot.slane %v3525_v18, 5  ;;  %v4349_v52 = vld [vmem:[#allocation2 + $0x4c] ss:$0 sps:$4 sm:$0x22]  }
 0x2be   : > { %v1923_v50 = vpack.c.b16 %v1922_v47, %v1908_v4  ;;  %v5195_v58 = vrot.slane %v3889_v10, 1  ;;  %v4350_v33 = vld [vmem:[#allocation2 + $0x58] ss:$0 sps:$4 sm:$0x22]   ;;  %v2378_v22 = vunpack.c.l.b16 %v4344_v6  ;;  %v2380_v7 = vunpack.c.l.b16 %v4346_v48 }
 0x2bf   : > { %v4352_v2 = vld [vmem:[#allocation2 + $0x70] ss:$0 sps:$4 sm:$0x22]   ;;  %v4353_v42 = vld [vmem:[#allocation2 + $0x7c] ss:$0 sps:$4 sm:$0x22]   ;;  %v2381_v44 = vunpack.c.l.b16 %v4347_v1  ;;  %v2382_v27 = vunpack.c.l.b16 %v4348_v46  ;;  %v2383_v10 = vunpack.c.l.b16 %v4349_v52  ;;  %v2384_v17 = vunpack.c.l.b16 %v4350_v33 }
 0x2c0   : > { %1924 = vrot.lane.b32.xlu1 %v1923_v50, %s4524_s19  ;;  %v4354_v45 = vld [vmem:[#allocation2 + $0x88] ss:$0 sps:$4 sm:$0x22]   ;;  %v4355_v43 = vld [vmem:[#allocation2 + $0x94] ss:$0 sps:$4 sm:$0x22]   ;;  %v2386_v61 = vunpack.c.l.b16 %v4352_v2  ;;  %v2379_v60 = vunpack.c.l.b16 %v4345_v12  ;;  %v2387_v62 = vunpack.c.l.b16 %v4353_v42 }
 0x2c1   : > { %v4356_v34 = vld [vmem:[#allocation2 + $0xa0] ss:$0 sps:$4 sm:$0x22]   ;;  %v4357_v37 = vld [vmem:[#allocation2 + $0xac] ss:$0 sps:$4 sm:$0x22]   ;;  %v2388_v23 = vunpack.c.l.b16 %v4354_v45  ;;  %v2389_v41 = vunpack.c.l.b16 %v4355_v43 }
 0x2c2   : > { %v4358_v13 = vld [vmem:[#allocation2 + $0xb8] ss:$0 sps:$4 sm:$0x22]   ;;  %v2390_v35 = vunpack.c.l.b16 %v4356_v34  ;;  %v2394_v51 = vrot.slane %v2378_v22, 1  ;;  %v2397_v26 = vrot.slane %v2380_v7, 7  ;;  %v2391_v15 = vunpack.c.l.b16 %v4357_v37 }
 0x2c3   : > { %v2392_v5 = vunpack.c.l.b16 %v4358_v13  ;;  %v2399_v59 = vrot.slane %v2381_v44, 6  ;;  %v2401_v39 = vrot.slane %v2382_v27, 5  ;;  %v2403_v54 = vrot.slane %v2383_v10, 4  ;;  %v4360_v33 = vld [vmem:[#allocation2 + $0x10] ss:$0 sps:$4 sm:$0x22]  }
 0x2c4   : > { %v2395_v24 = vsel %vm764_vm7, %v2394_v51, %v4895_v29  ;;  %v2405_v40 = vrot.slane %v2384_v17, 3  ;;  %v2408_v9 = vrot.slane %v2386_v61, 1  ;;  %v2411_v38 = vrot.slane %v2388_v23, 7  ;;  %v4361_v2 = vld [vmem:[#allocation2 + $0x1c] ss:$0 sps:$4 sm:$0x22]  }
 0x2c5   : > { %v2396_v28 = vsel %vm767_vm8, %v2379_v60, %v2395_v24  ;;  %v2413_v8 = vrot.slane %v2389_v41, 6  ;;  %v2415_v18 = vrot.slane %v2390_v35, 5  ;;  %v2417_v50 = vrot.slane %v2391_v15, 4  ;;  %v4362_v7 = vld [vmem:[#allocation2 + $0x28] ss:$0 sps:$4 sm:$0x22]  }
 0x2c6   : > { %v2398_v4 = vsel %vm770_vm9, %v2397_v26, %v2396_v28  ;;  %v2409_v47 = vsel %vm764_vm7, %v2408_v9, %v4897_v30  ;;  %v2419_v6 = vrot.slane %v2392_v5, 3  ;;  %v4363_v30 = vld [vmem:[#allocation2 + $0x34] ss:$0 sps:$4 sm:$0x22]   ;;  %v2520_v17 = vunpack.c.l.b16 %v4360_v33 }
 0x2c7   : > { %v2400_v12 = vsel %vm773_vm10, %v2399_v59, %v2398_v4  ;;  %v2410_v48 = vsel %vm767_vm8, %v2387_v62, %v2409_v47  ;;  %v4364_v45 = vld [vmem:[#allocation2 + $0x40] ss:$0 sps:$4 sm:$0x22]   ;;  %v4365_v44 = vld [vmem:[#allocation2 + $0x4c] ss:$0 sps:$4 sm:$0x22]   ;;  %v2521_v61 = vunpack.c.l.b16 %v4361_v2  ;;  %v2523_v62 = vunpack.c.l.b16 %v4363_v30 }
 0x2c8   : > { %v2402_v29 = vsel %vm776_vm11, %v2401_v39, %v2400_v12  ;;  %v2412_v1 = vsel %vm770_vm9, %v2411_v38, %v2410_v48  ;;  %v4366_v34 = vld [vmem:[#allocation2 + $0x58] ss:$0 sps:$4 sm:$0x22]   ;;  %v4368_v10 = vld [vmem:[#allocation2 + $0x70] ss:$0 sps:$4 sm:$0x22]   ;;  %v2524_v35 = vunpack.c.l.b16 %v4364_v45  ;;  %v2525_v51 = vunpack.c.l.b16 %v4365_v44 }
 0x2c9   : > { %v2404_v46 = vsel %vm779_vm12, %v2403_v54, %v2402_v29  ;;  %v2414_v52 = vsel %vm773_vm10, %v2413_v8, %v2412_v1  ;;  %v4369_v13 = vld [vmem:[#allocation2 + $0x7c] ss:$0 sps:$4 sm:$0x22]   ;;  %v4370_v60 = vld [vmem:[#allocation2 + $0x88] ss:$0 sps:$4 sm:$0x22]   ;;  %v2528_v26 = vunpack.c.l.b16 %v4368_v10  ;;  %v2522_v59 = vunpack.c.l.b16 %v4362_v7 }
 0x2ca   : > { %v2416_v22 = vsel %vm776_vm11, %v2415_v18, %v2414_v52  ;;  %v2406_v27 = vsel %vm5654_vm13, %v2405_v40, %v2404_v46  ;;  %v4371_v23 = vld [vmem:[#allocation2 + $0x94] ss:$0 sps:$4 sm:$0x22]   ;;  %v4372_v41 = vld [vmem:[#allocation2 + $0xa0] ss:$0 sps:$4 sm:$0x22]   ;;  %v2526_v39 = vunpack.c.l.b16 %v4366_v34  ;;  %v2529_v24 = vunpack.c.l.b16 %v4369_v13 }
 0x2cb   : > { %v2418_v42 = vsel %vm779_vm12, %v2417_v50, %v2416_v22  ;;  %v4373_v15 = vld [vmem:[#allocation2 + $0xac] ss:$0 sps:$4 sm:$0x22]   ;;  %v4374_v5 = vld [vmem:[#allocation2 + $0xb8] ss:$0 sps:$4 sm:$0x22]   ;;  %v2531_v54 = vunpack.c.l.b16 %v4371_v23  ;;  %v2532_v40 = vunpack.c.l.b16 %v4372_v41  ;;  %v2530_v38 = vunpack.c.l.b16 %v4370_v60 }
 0x2cc   : > { %v2420_v43 = vsel %vm5654_vm13, %v2419_v6, %v2418_v42  ;;  %v2536_v9 = vrot.slane %v2520_v17, 2  ;;  %v2538_v28 = vrot.slane %v2521_v61, 1  ;;  %v2533_v8 = vunpack.c.l.b16 %v4373_v15  ;;  %v5218_v48 = vld [vmem:[%s4597_s12] sm:$0xff]  ;;  %v5221_v29 = vld [vmem:[%s4597_s12 + $0xc] sm:$0xff] }
 0x2cd   : > { %v2421_v37 = vpack.c.b16 %v2420_v43, %v2406_v27  ;;  %v2534_v18 = vunpack.c.l.b16 %v4374_v5  ;;  %v2541_v4 = vrot.slane %v2523_v62, 7  ;;  %v2543_v50 = vrot.slane %v2524_v35, 6  ;;  %v4342_v2 = vld [vmem:[#allocation2 + $0x50] ss:$0 sps:$4 sm:$0x11]  }
 0x2ce   : > { %v2537_v47 = vsel %vm764_vm7, %v2536_v9, %v4899_v14  ;;  %v2545_v6 = vrot.slane %v2525_v51, 5  ;;  %v2550_v12 = vrot.slane %v2528_v26, 2  ;;  %v2552_v46 = vrot.slane %v2529_v24, 1  ;;  %v4378_v13 = vld [vmem:[#allocation2 + $0x10] ss:$0 sps:$4 sm:$0x44]  }
 0x2cf   : > { %2422 = vrot.lane.b32.xlu0 %v2421_v37, %s4530_s7  ;;  %v2539_v1 = vsel %vm767_vm8, %v2538_v28, %v2537_v47  ;;  %v2555_v52 = vrot.slane %v2531_v54, 7  ;;  %v2557_v33 = vrot.slane %v2532_v40, 6  ;;  %v2559_v30 = vrot.slane %v2533_v8, 5  ;;  %v4379_v60 = vld [vmem:[#allocation2 + $0x1c] ss:$0 sps:$4 sm:$0x44]  }
 0x2d0   : > { %v2540_v22 = vsel %vm770_vm9, %v2522_v59, %v2539_v1  ;;  %v2551_v7 = vsel %vm764_vm7, %v2550_v12, %v4902_v36  ;;  %v2561_v14 = vrot.slane %v2534_v18, 4  ;;  %v5231_v44 = vcombine.high %v5218_v48, %v5221_v29  ;;  %v4380_v35 = vld [vmem:[#allocation2 + $0x28] ss:$0 sps:$4 sm:$0x44]  }
 0x2d1   : > { %v2542_v42 = vsel %vm773_vm10, %v2541_v4, %v2540_v22  ;;  %v2553_v45 = vsel %vm767_vm8, %v2552_v46, %v2551_v7  ;;  %v2547_v10 = vrot.slane %v2526_v39, 4  ;;  %v3519_v62 = vunpack.c.l.b16 %v4342_v2  ;;  %v4381_v51 = vld [vmem:[#allocation2 + $0x34] ss:$0 sps:$4 sm:$0x44]  }
 0x2d2   : > { %v2544_v27 = vsel %vm776_vm11, %v2543_v50, %v2542_v42  ;;  %v2554_v43 = vsel %vm770_vm9, %v2530_v38, %v2553_v45  ;;  %v1119_v36 = vshrl.u32 %v5231_v44, 16  ;;  %v4382_v15 = vld [vmem:[#allocation2 + $0x40] ss:$0 sps:$4 sm:$0x44]   ;;  %v2677_v24 = vunpack.c.l.b16 %v4378_v13 }
 0x2d3   : > { %v2546_v34 = vsel %vm779_vm12, %v2545_v6, %v2544_v27  ;;  %v2556_v17 = vsel %vm773_vm10, %v2555_v52, %v2554_v43  ;;  %v4383_v5 = vld [vmem:[#allocation2 + $0x4c] ss:$0 sps:$4 sm:$0x44]   ;;  %v4384_v59 = vld [vmem:[#allocation2 + $0x58] ss:$0 sps:$4 sm:$0x44]   ;;  %v2678_v54 = vunpack.c.l.b16 %v4379_v60  ;;  %v2679_v28 = vunpack.c.l.b16 %v4380_v35 }
 0x2d4   : > { %v2558_v61 = vsel %vm776_vm11, %v2557_v33, %v2556_v17  ;;  %v2548_v23 = vsel %vm5654_vm13, %v2547_v10, %v2546_v34  ;;  %v4386_v39 = vld [vmem:[#allocation2 + $0x70] ss:$0 sps:$4 sm:$0x44]   ;;  %v4387_v40 = vld [vmem:[#allocation2 + $0x7c] ss:$0 sps:$4 sm:$0x44]   ;;  %v2681_v38 = vunpack.c.l.b16 %v4382_v15  ;;  %v2682_v4 = vunpack.c.l.b16 %v4383_v5 }
 0x2d5   : > { %v2560_v37 = vsel %vm779_vm12, %v2559_v30, %v2558_v61  ;;  %v4388_v9 = vld [vmem:[#allocation2 + $0x88] ss:$0 sps:$4 sm:$0x44]   ;;  %v5243_v8 = vrot.slane %v3519_v62, 3  ;;  %v2683_v47 = vunpack.c.l.b16 %v4384_v59  ;;  %v2685_v50 = vunpack.c.l.b16 %v4386_v39 }
 0x2d6   : > { %v2562_v41 = vsel %vm5654_vm13, %v2561_v14, %v2560_v37  ;;  %v4390_v18 = vld [vmem:[#allocation2 + $0xa0] ss:$0 sps:$4 sm:$0x44]   ;;  %v4389_v6 = vld [vmem:[#allocation2 + $0x94] ss:$0 sps:$4 sm:$0x44]   ;;  %v2686_v46 = vunpack.c.l.b16 %v4387_v40  ;;  %v2687_v52 = vunpack.c.l.b16 %v4388_v9  ;;  %v2680_v33 = vunpack.c.l.b16 %v4381_v51 }
 0x2d7   : > { %v2563_v26 = vpack.c.b16 %v2562_v41, %v2548_v23  ;;  %v4391_v12 = vld [vmem:[#allocation2 + $0xac] ss:$0 sps:$4 sm:$0x44]   ;;  %v4392_v1 = vld [vmem:[#allocation2 + $0xb8] ss:$0 sps:$4 sm:$0x44]   ;;  %v2689_v2 = vunpack.c.l.b16 %v4390_v18  ;;  %v2688_v51 = vunpack.c.l.b16 %v4389_v6 }
 0x2d8   : > { %v2693_v22 = vrot.slane %v2677_v24, 3  ;;  %v2695_v7 = vrot.slane %v2678_v54, 2  ;;  %v2690_v30 = vunpack.c.l.b16 %v4391_v12  ;;  %v2691_v14 = vunpack.c.l.b16 %v4392_v1  ;;  %v4375_v27 = vld [vmem:[#allocation2 + $0xa4] ss:$0 sps:$4 sm:$0x11]  }
 0x2d9   : > { %2564 = vrot.lane.b32.xlu1 %v2563_v26, %s4529_s30  ;;  %v2697_v42 = vrot.slane %v2679_v28, 1  ;;  %v2700_v45 = vrot.slane %v2681_v38, 7  ;;  %v2702_v34 = vrot.slane %v2682_v4, 6  ;;  %v2704_v10 = vrot.slane %v2683_v47, 5 }
 0x2da   : > { %v2694_v43 = vsel %vm764_vm7, %v2693_v22, %v4980_v49  ;;  %v2707_v17 = vrot.slane %v2685_v50, 3  ;;  %v2709_v37 = vrot.slane %v2686_v46, 2  ;;  %v2711_v13 = vrot.slane %v2687_v52, 1  ;;  %v5255_v59 = vld [vmem:[#allocation2 + $0x5c] ss:$0 sps:$4 sm:$0x11]  }
 0x2db   : > { %v2696_v61 = vsel %vm767_vm8, %v2695_v7, %v2694_v43  ;;  %v2714_v60 = vrot.slane %v2689_v2, 7  ;;  %v2716_v41 = vrot.slane %v2690_v30, 6  ;;  %v2718_v35 = vrot.slane %v2691_v14, 5  ;;  %v4394_v54 = vld [vmem:[#allocation2 + $0x10] ss:$0 sps:$4 sm:$0x44]  }
 0x2dc   : > { %v2698_v62 = vsel %vm770_vm9, %v2697_v42, %v2696_v61  ;;  %v2708_v23 = vsel %vm764_vm7, %v2707_v17, %v4984_v32  ;;  %v4395_v40 = vld [vmem:[#allocation2 + $0x1c] ss:$0 sps:$4 sm:$0x44]   ;;  %v3526_v32 = vunpack.c.l.b16 %v4375_v27  ;;  %v4396_v28 = vld [vmem:[#allocation2 + $0x28] ss:$0 sps:$4 sm:$0x44]   ;;  %v2865_v46 = vunpack.c.l.b16 %v4394_v54 }
 0x2dd   : > { %v2699_v26 = vsel %vm773_vm10, %v2680_v33, %v2698_v62  ;;  %v2710_v49 = vsel %vm767_vm8, %v2709_v37, %v2708_v23  ;;  %v4397_v38 = vld [vmem:[#allocation2 + $0x34] ss:$0 sps:$4 sm:$0x44]   ;;  %v4398_v4 = vld [vmem:[#allocation2 + $0x40] ss:$0 sps:$4 sm:$0x44]   ;;  %v2866_v52 = vunpack.c.l.b16 %v4395_v40  ;;  %v2867_v42 = vunpack.c.l.b16 %v4396_v28 }
 0x2de   : > { %v2701_v15 = vsel %vm776_vm11, %v2700_v45, %v2699_v26  ;;  %v2712_v5 = vsel %vm770_vm9, %v2711_v13, %v2710_v49  ;;  %v4399_v47 = vld [vmem:[#allocation2 + $0x4c] ss:$0 sps:$4 sm:$0x44]   ;;  %v4400_v12 = vld [vmem:[#allocation2 + $0x58] ss:$0 sps:$4 sm:$0x44]   ;;  %v2868_v7 = vunpack.c.l.b16 %v4397_v38  ;;  %v3520_v43 = vunpack.c.l.b16 %v5255_v59 }
 0x2df   : > { %v2703_v39 = vsel %vm779_vm12, %v2702_v34, %v2701_v15  ;;  %v2713_v24 = vsel %vm773_vm10, %v2688_v51, %v2712_v5  ;;  %v4402_v1 = vld [vmem:[#allocation2 + $0x70] ss:$0 sps:$4 sm:$0x44]   ;;  %v4403_v2 = vld [vmem:[#allocation2 + $0x7c] ss:$0 sps:$4 sm:$0x44]   ;;  %v2870_v45 = vunpack.c.l.b16 %v4399_v47  ;;  %v2869_v37 = vunpack.c.l.b16 %v4398_v4  ;;  %v5273_v4 = vpop.permute.xlu1 %1315 }
 0x2e0   : > { %v2715_v9 = vsel %vm776_vm11, %v2714_v60, %v2713_v24  ;;  %v2705_v50 = vsel %vm5654_vm13, %v2704_v10, %v2703_v39  ;;  %v4404_v22 = vld [vmem:[#allocation2 + $0x88] ss:$0 sps:$4 sm:$0x44]   ;;  %v5263_v30 = vrot.slane %v3526_v32, 4  ;;  %v2873_v27 = vunpack.c.l.b16 %v4402_v1 }
 0x2e1   : > { %v2717_v18 = vsel %vm779_vm12, %v2716_v41, %v2715_v9  ;;  %v4405_v14 = vld [vmem:[#allocation2 + $0x94] ss:$0 sps:$4 sm:$0x44]   ;;  %v4407_v34 = vld [vmem:[#allocation2 + $0xac] ss:$0 sps:$4 sm:$0x44]   ;;  %v2874_v17 = vunpack.c.l.b16 %v4403_v2  ;;  %v2875_v61 = vunpack.c.l.b16 %v4404_v22  ;;  %v2871_v41 = vunpack.c.l.b16 %v4400_v12 }
 0x2e2   : > { %v2719_v6 = vsel %vm5654_vm13, %v2718_v35, %v2717_v18  ;;  %v4408_v10 = vld [vmem:[#allocation2 + $0xb8] ss:$0 sps:$4 sm:$0x44]   ;;  %v2876_v13 = vunpack.c.l.b16 %v4405_v14  ;;  %v2881_v60 = vrot.slane %v2865_v46, 4  ;;  %v2883_v62 = vrot.slane %v2866_v52, 3 }
 0x2e3   : > { %v2720_v33 = vpack.c.b16 %v2719_v6, %v2705_v50  ;;  %v4406_v23 = vld [vmem:[#allocation2 + $0xa0] ss:$0 sps:$4 sm:$0x44]   ;;  %v2878_v35 = vunpack.c.l.b16 %v4407_v34  ;;  %v2879_v51 = vunpack.c.l.b16 %v4408_v10  ;;  %v2887_v26 = vrot.slane %v2868_v7, 1 }
 0x2e4   : > { %v2882_v49 = vsel %vm764_vm7, %v2881_v60, %v4988_v57  ;;  %v2885_v15 = vrot.slane %v2867_v42, 2  ;;  %v2890_v5 = vrot.slane %v2870_v45, 7  ;;  %v2895_v59 = vrot.slane %v2873_v27, 4  ;;  %v4411_v39 = vld [vmem:[#allocation2 + $0x74] ss:$0 sps:$4 sm:$0x11]  }
 0x2e5   : > { %2721 = vrot.lane.b32.xlu0 %v2720_v33, %s4528_s29  ;;  %v2884_v24 = vsel %vm767_vm8, %v2883_v62, %v2882_v49  ;;  %v2897_v54 = vrot.slane %v2874_v17, 3  ;;  %v2899_v40 = vrot.slane %v2875_v61, 2  ;;  %v2901_v32 = vrot.slane %v2876_v13, 1  ;;  %v4409_v50 = vld [vmem:[#allocation2 + $0xb0] ss:$0 sps:$4 sm:$0x11]   ;;  %v5291_v61 = vpop.permute.xlu0 %1313 }
 0x2e6   : > { %v2886_v9 = vsel %vm770_vm9, %v2885_v15, %v2884_v24  ;;  %v2896_v28 = vsel %vm764_vm7, %v2895_v59, %v4992_v55  ;;  %v2904_v38 = vrot.slane %v2878_v35, 7  ;;  %v2906_v18 = vrot.slane %v2879_v51, 6  ;;  %v5283_v22 = vld [vmem:[#allocation2 + $0x14] ss:$0 sps:$4 sm:$0x11]  }
 0x2e7   : > { %v2888_v57 = vsel %vm773_vm10, %v2887_v26, %v2886_v9  ;;  %v2898_v47 = vsel %vm767_vm8, %v2897_v54, %v2896_v28  ;;  %v3522_v6 = vunpack.c.l.b16 %v4411_v39  ;;  %v2877_v12 = vunpack.c.l.b16 %v4406_v23  ;;  %v4413_v45 = vld [vmem:[#allocation2 + $0x10] ss:$0 sps:$4 sm:$0x88]   ;;  %v4414_v27 = vld [vmem:[#allocation2 + $0x1c] ss:$0 sps:$4 sm:$0x88]  }
 0x2e8   : > { %v2889_v1 = vsel %vm776_vm11, %v2869_v37, %v2888_v57  ;;  %v2900_v46 = vsel %vm770_vm9, %v2899_v40, %v2898_v47  ;;  %v5279_v52 = vrot.slane %v3520_v43, 2  ;;  %v2892_v55 = vrot.slane %v2871_v41, 6  ;;  %v4415_v10 = vld [vmem:[#allocation2 + $0x28] ss:$0 sps:$4 sm:$0x88]   ;;  %v5293_v37 = vpop.permute.xlu1 %2792 }
 0x2e9   : > { %v2891_v33 = vsel %vm779_vm12, %v2890_v5, %v2889_v1  ;;  %v2902_v2 = vsel %vm773_vm10, %v2901_v32, %v2900_v46  ;;  %v3544_v42 = vsel %vm764_vm7, %v3522_v6, %v4997_v3  ;;  %v4416_v17 = vld [vmem:[#allocation2 + $0x34] ss:$0 sps:$4 sm:$0x88]   ;;  %v3527_v60 = vunpack.c.l.b16 %v4409_v50  ;;  %v4417_v62 = vld [vmem:[#allocation2 + $0x40] ss:$0 sps:$4 sm:$0x88]   ;;  %v5303_v1 = vpop.permute.xlu0 %2790 }
 0x2ea   : > { %v2903_v7 = vsel %vm776_vm11, %v2877_v12, %v2902_v2  ;;  %v2893_v34 = vsel %vm5654_vm13, %v2892_v55, %v2891_v33  ;;  %v4418_v23 = vld [vmem:[#allocation2 + $0x4c] ss:$0 sps:$4 sm:$0x88]   ;;  %v3546_v41 = vsel %vm767_vm8, %v5185_v53, %v3544_v42  ;;  %v4419_v3 = vld [vmem:[#allocation2 + $0x58] ss:$0 sps:$4 sm:$0x88]   ;;  %v3053_v51 = vunpack.c.l.b16 %v4413_v45 }
 0x2eb   : > { %v2905_v14 = vsel %vm779_vm12, %v2904_v38, %v2903_v7  ;;  %v4421_v35 = vld [vmem:[#allocation2 + $0x70] ss:$0 sps:$4 sm:$0x88]   ;;  %v3054_v26 = vunpack.c.l.b16 %v4414_v27  ;;  %v4422_v49 = vld [vmem:[#allocation2 + $0x7c] ss:$0 sps:$4 sm:$0x88]   ;;  %v3055_v5 = vunpack.c.l.b16 %v4415_v10  ;;  %v3056_v59 = vunpack.c.l.b16 %v4416_v17 }
 0x2ec   : > { %v2907_v43 = vsel %vm5654_vm13, %v2906_v18, %v2905_v14  ;;  %v4423_v15 = vld [vmem:[#allocation2 + $0x88] ss:$0 sps:$4 sm:$0x88]   ;;  %v3514_v39 = vunpack.c.l.b16 %v5283_v22  ;;  %v4424_v24 = vld [vmem:[#allocation2 + $0x94] ss:$0 sps:$4 sm:$0x88]   ;;  %v3057_v40 = vunpack.c.l.b16 %v4417_v62  ;;  %v3059_v32 = vunpack.c.l.b16 %v4419_v3  ;;  %v5305_v46 = vpop.permute.xlu1 %2788 }
 0x2ed   : > { %v2908_v13 = vpack.c.b16 %v2907_v43, %v2893_v34  ;;  %v4425_v54 = vld [vmem:[#allocation2 + $0xa0] ss:$0 sps:$4 sm:$0x88]   ;;  %v3061_v9 = vunpack.c.l.b16 %v4421_v35  ;;  %v5299_v28 = vrot.slane %v3527_v60, 3  ;;  %v3548_v53 = vsel %vm770_vm9, %v5189_v63, %v3546_v41  ;;  %v5657_v14 = vld [vmem:[#allocation6_spill] sm:$0xff] }
 0x2ee   : > { %v4427_v38 = vld [vmem:[#allocation2 + $0xb8] ss:$0 sps:$4 sm:$0x88]   ;;  %v3062_v18 = vunpack.c.l.b16 %v4422_v49  ;;  %v3063_v57 = vunpack.c.l.b16 %v4423_v15  ;;  %v3064_v47 = vunpack.c.l.b16 %v4424_v24  ;;  %v3065_v50 = vunpack.c.l.b16 %v4425_v54  ;;  %v4426_v33 = vld [vmem:[#allocation2 + $0xac] ss:$0 sps:$4 sm:$0x88]   ;;  %v5321_v15 = vpop.permute.xlu0 %1311 }
 0x2ef   : > { %2909 = vrot.lane.b32.xlu1 %v2908_v13, %s4527_s28  ;;  %v3069_v6 = vrot.slane %v3053_v51, 5  ;;  %v3071_v12 = vrot.slane %v3054_v26, 4  ;;  %v3058_v55 = vunpack.c.l.b16 %v4418_v23  ;;  %v3067_v2 = vunpack.c.l.b16 %v4427_v38  ;;  %v5310_v13 = vld [vmem:[#allocation2 + $0x8] ss:$0 sps:$4 sm:$0x11]  }
 0x2f0   : > { %v3073_v22 = vrot.slane %v3055_v5, 3  ;;  %v3075_v7 = vrot.slane %v3056_v59, 2  ;;  %v3077_v63 = vrot.slane %v3057_v40, 1  ;;  %v3080_v45 = vrot.slane %v3059_v32, 7  ;;  %v5323_v5 = vpop.permute.xlu1 %1504  ;;  %v5658_v32 = vld [vmem:[#allocation5_spill] sm:$0xff] }
 0x2f1   : > { %v3070_v42 = vsel %vm764_vm7, %v3069_v6, %v5657_v14  ;;  %v3083_v27 = vrot.slane %v3061_v9, 5  ;;  %v3085_v43 = vrot.slane %v3062_v18, 4  ;;  %v3087_v10 = vrot.slane %v3063_v57, 3  ;;  %v4429_v54 = vld [vmem:[#allocation2 + $0x10] ss:$0 sps:$4 sm:$0x88]  }
 0x2f2   : > { %v3072_v34 = vsel %vm767_vm8, %v3071_v12, %v3070_v42  ;;  %v3089_v17 = vrot.slane %v3064_v47, 2  ;;  %v3091_v23 = vrot.slane %v3065_v50, 1  ;;  %v3094_v41 = vrot.slane %v3067_v2, 7  ;;  %v4430_v40 = vld [vmem:[#allocation2 + $0x1c] ss:$0 sps:$4 sm:$0x88]  }
 0x2f3   : > { %v3074_v60 = vsel %vm770_vm9, %v3073_v22, %v3072_v34  ;;  %v3084_v62 = vsel %vm764_vm7, %v3083_v27, %v5127_v16  ;;  %v3550_v51 = vsel %vm773_vm10, %v5193_v0, %v3548_v53  ;;  %v3066_v59 = vunpack.c.l.b16 %v4426_v33  ;;  %v4431_v53 = vld [vmem:[#allocation2 + $0x28] ss:$0 sps:$4 sm:$0x88]   ;;  %v4432_v38 = vld [vmem:[#allocation2 + $0x34] ss:$0 sps:$4 sm:$0x88]  }
 0x2f4   : > { %v3076_v3 = vsel %vm773_vm10, %v3075_v7, %v3074_v60  ;;  %v3086_v35 = vsel %vm767_vm8, %v3085_v43, %v3084_v62  ;;  %v3530_v9 = vsel %vm764_vm7, %v3514_v39, %v5658_v32  ;;  %v4433_v47 = vld [vmem:[#allocation2 + $0x40] ss:$0 sps:$4 sm:$0x88]   ;;  %v4434_v50 = vld [vmem:[#allocation2 + $0x4c] ss:$0 sps:$4 sm:$0x88]   ;;  %v3552_v6 = vsel %vm776_vm11, %v5263_v30, %v3550_v51  ;;  %v5342_v60 = vpop.permute.xlu0 %1502  ;;  %v5344_v62 = vpop.permute.xlu1 %2980 }
 0x2f5   : > { %v3078_v26 = vsel %vm776_vm11, %v3077_v63, %v3076_v3  ;;  %v3088_v49 = vsel %vm770_vm9, %v3087_v10, %v3086_v35  ;;  %v3532_v18 = vsel %vm767_vm8, %v5159_v56, %v3530_v9  ;;  %v3352_v12 = vunpack.c.l.b16 %v5310_v13  ;;  %v4438_v14 = vld [vmem:[#allocation2 + $0x7c] ss:$0 sps:$4 sm:$0x88]   ;;  %v4439_v42 = vld [vmem:[#allocation2 + $0x88] ss:$0 sps:$4 sm:$0x88]  }
 0x2f6   : > { %v3079_v16 = vsel %vm779_vm12, %v3058_v55, %v3078_v26  ;;  %v3090_v24 = vsel %vm773_vm10, %v3089_v17, %v3088_v49  ;;  %v4437_v55 = vld [vmem:[#allocation2 + $0x70] ss:$0 sps:$4 sm:$0x88]   ;;  %v3192_v2 = vunpack.c.l.b16 %v4429_v54  ;;  %v3193_v22 = vunpack.c.l.b16 %v4430_v40  ;;  %v4440_v34 = vld [vmem:[#allocation2 + $0x94] ss:$0 sps:$4 sm:$0x88]  }
 0x2f7   : > { %v3092_v0 = vsel %vm776_vm11, %v3091_v23, %v3090_v24  ;;  %v3081_v33 = vsel %vm5654_vm13, %v3080_v45, %v3079_v16  ;;  %v3534_v7 = vsel %vm770_vm9, %v5165_v11, %v3532_v18  ;;  %v3194_v63 = vunpack.c.l.b16 %v4431_v53  ;;  %v4441_v43 = vld [vmem:[#allocation2 + $0xa0] ss:$0 sps:$4 sm:$0x88]   ;;  %v4442_v23 = vld [vmem:[#allocation2 + $0xac] ss:$0 sps:$4 sm:$0x88]  }
 0x2f8   : > { %v3093_v57 = vsel %vm779_vm12, %v3066_v59, %v3092_v0  ;;  %v3195_v27 = vunpack.c.l.b16 %v4432_v38  ;;  %v3536_v30 = vsel %vm773_vm10, %v5187_v20, %v3534_v7  ;;  %v3196_v10 = vunpack.c.l.b16 %v4433_v47  ;;  %v5352_v16 = vld [vmem:[%s4597_s12 + $0x24] sm:$0xee]  ;;  %v4435_v24 = vld [vmem:[#allocation2 + $0x58] ss:$0 sps:$4 sm:$0x88]   ;;  %v5357_v18 = vld [vmem:[%s4597_s12 + $0x30] sm:$0xff] }
 0x2f9   : > { %v3095_v39 = vsel %vm5654_vm13, %v3094_v41, %v3093_v57  ;;  %v3197_v45 = vunpack.c.l.b16 %v4434_v50  ;;  %v3200_v17 = vunpack.c.l.b16 %v4437_v55  ;;  %v3538_v11 = vsel %vm776_vm11, %v5191_v31, %v3536_v30  ;;  %v4443_v41 = vld [vmem:[#allocation2 + $0xb8] ss:$0 sps:$4 sm:$0x88]   ;;  %v4444_v9 = vld [vmem:[#allocation2 + $0xbc] ss:$0 sps:$4 sm:$0x11]  }
 0x2fa   : > { %v3096_v56 = vpack.c.b16 %v3095_v39, %v3081_v33  ;;  %v3201_v3 = vunpack.c.l.b16 %v4438_v14  ;;  %v3202_v35 = vunpack.c.l.b16 %v4439_v42  ;;  %v3554_v20 = vsel %vm779_vm12, %v5299_v28, %v3552_v6  ;;  %v5360_v57 = vld [vmem:[%s4597_s12 + $0x3c] sm:$0x11]  ;;  %v4447_v39 = vld [vmem:[%s4597_s12 + $0x2c] ss:$12 sps:$4 sm:$0xfe]   ;;  %v2977_v14 = vpop.permute.xlu1 %2976 }
 0x2fb   : > { %v3203_v51 = vunpack.c.l.b16 %v4440_v34  ;;  %v3204_v26 = vunpack.c.l.b16 %v4441_v43  ;;  %v3208_v49 = vrot.slane %v3192_v2, 6  ;;  %v3210_v59 = vrot.slane %v3193_v22, 5  ;;  %v4448_v7 = vld [vmem:[%s4597_s12 + $0x44] ss:$0 sps:$4 sm:$0x11]  }
 0x2fc   : > { %3097 = vrot.lane.b32.xlu0 %v3096_v56, %s4526_s27  ;;  %v3205_v31 = vunpack.c.l.b16 %v4442_v23  ;;  %v3206_v54 = vunpack.c.l.b16 %v4443_v41  ;;  %v3212_v40 = vrot.slane %v3194_v63, 4  ;;  %v3214_v32 = vrot.slane %v3195_v27, 3  ;;  %v5368_v56 = vpop.permute.xlu0 %2978  ;;  %v5374_v34 = vld [vmem:[#allocation2 + $0x68] ss:$0 sps:$4 sm:$0x11]  }
 0x2fd   : > { %v3209_v0 = vsel %vm764_vm7, %v3208_v49, %v5129_v19  ;;  %v3216_v28 = vrot.slane %v3196_v10, 2  ;;  %v3218_v53 = vrot.slane %v3197_v45, 1  ;;  %v3222_v38 = vrot.slane %v3200_v17, 6  ;;  %v5376_v43 = vld [vmem:[#allocation2 + $0x60] ss:$0 sps:$4 sm:$0x11]  }
 0x2fe   : > { %v3211_v47 = vsel %vm767_vm8, %v3210_v59, %v3209_v0  ;;  %v3224_v50 = vrot.slane %v3201_v3, 5  ;;  %v3226_v6 = vrot.slane %v3202_v35, 4  ;;  %v3228_v33 = vrot.slane %v3203_v51, 3 }
 0x2ff   : > { %v3213_v55 = vsel %vm770_vm9, %v3212_v40, %v3211_v47  ;;  %v3223_v2 = vsel %vm764_vm7, %v3222_v38, %v5131_v25  ;;  %v3230_v22 = vrot.slane %v3204_v26, 2  ;;  %v3232_v19 = vrot.slane %v3205_v31, 1  ;;  %v3975_v38 = vld [vmem:[%s4597_s12 + $0x24] sm:$0xff] }
 0x300   : > { %v3215_v42 = vsel %vm773_vm10, %v3214_v32, %v3213_v55  ;;  %v3225_v63 = vsel %vm767_vm8, %v3224_v50, %v3223_v2  ;;  %v3528_v27 = vunpack.c.l.b16 %v4444_v9  ;;  %v4112_v30 = vcombine.high %v5352_v16, %v5357_v18  ;;  %v4451_v50 = vld [vmem:[#allocation2 + $0x20] ss:$0 sps:$4 sm:$0x11]   ;;  %v4452_v55 = vld [vmem:[#allocation2 + $0x2c] ss:$0 sps:$4 sm:$0x11]  }
 0x301   : > { %v3217_v25 = vsel %vm776_vm11, %v3216_v28, %v3215_v42  ;;  %v3227_v10 = vsel %vm770_vm9, %v3226_v6, %v3225_v63  ;;  %v4115_v45 = vcombine.high %v5360_v57, %v5360_v57  ;;  %v3434_v17 = vrot.slane %v4447_v39, 1  ;;  %v4453_v2 = vld [vmem:[#allocation2 + $0x38] ss:$0 sps:$4 sm:$0x11]  }
 0x302   : > { %v3198_v23 = vunpack.c.l.b16 %v4435_v24  ;;  %v3219_v41 = vsel %vm779_vm12, %v3218_v53, %v3217_v25  ;;  %v3229_v3 = vsel %vm773_vm10, %v3228_v33, %v3227_v10  ;;  %v3555_v35 = vrot.slane %v3528_v27, 2  ;;  %v5394_v53 = vpop.permute.xlu1 %1805  ;;  %v5400_v33 = vld [vmem:[%s4597_s12 + $0x18] sm:$0x11]  ;;  %v4458_v42 = vld [vmem:[#allocation2 + $0x74] ss:$0 sps:$4 sm:$0x11]  }
 0x303   : > { %v3540_v51 = vsel %vm779_vm12, %v5243_v8, %v3538_v11  ;;  %v3231_v26 = vsel %vm776_vm11, %v3230_v22, %v3229_v3  ;;  %v3431_v49 = vrot.slane %v4112_v30, 1  ;;  %v3435_v59 = vrot.slane %v4448_v7, 1  ;;  %v1501_v11 = vpop.permute.xlu0 %1500  ;;  %v4456_v7 = vld [vmem:[#allocation2 + $0x5c] ss:$0 sps:$4 sm:$0x11]  }
 0x304   : > { %v3542_v31 = vsel %vm5654_vm13, %v5279_v52, %v3540_v51  ;;  %v3220_v40 = vsel %vm5654_vm13, %v3198_v23, %v3219_v41  ;;  %v3233_v24 = vsel %vm779_vm12, %v3232_v19, %v3231_v26  ;;  %v3556_v32 = vsel %vm5654_vm13, %v3555_v35, %v3554_v20  ;;  %v4450_v52 = vld [vmem:[#allocation2 + $0x14] ss:$0 sps:$4 sm:$0x11]   ;;  %v4459_v25 = vld [vmem:[#allocation2 + $0x80] ss:$0 sps:$4 sm:$0x11]  }
 0x305   : > { %v3234_v9 = vsel %vm5654_vm13, %v3206_v54, %v3233_v24  ;;  %v3557_v0 = vpack.c.b16 %v3556_v32, %v3542_v31  ;;  %v3432_v28 = vrot.slane %v4115_v45, 1  ;;  %v3436_v8 = vsel %vm1642_vm6, %v3434_v17, %v3435_v59  ;;  %v4460_v10 = vld [vmem:[#allocation2 + $0x8c] ss:$0 sps:$4 sm:$0x11]  }
 0x306   : > { %v3235_v47 = vpack.c.b16 %v3234_v9, %v3220_v40  ;;  %3441 = vrot.lane.b32.xlu0 %v3436_v8, %s4525_s26  ;;  %v3360_v6 = vunpack.c.l.b16 %v5374_v34  ;;  %v5404_v20 = vcombine.low %v5218_v48, %v5221_v29  ;;  %v755_v54 = vunpack.c.l.b16 %v5376_v43  ;;  %v4461_v17 = vld [vmem:[#allocation2 + $0x98] ss:$0 sps:$4 sm:$0x11]   ;;  %v4462_v23 = vld [vmem:[#allocation2 + $0xa4] ss:$0 sps:$4 sm:$0x11]   ;;  %v5460_v26 = vpop.permute.xlu1 %3280 }
 0x307   : > { %3559 = vst.msk [vmem:[#allocation3 + $0x8] sm:$0xff] %vm394_vm1, %v3557_v0  ;;  %v1958_v39 = vsel %vm1642_vm6, %v5180_v21, %v5195_v58  ;;  %v5414_v22 = vsel %vm824_vm2, %v5305_v46, %v5303_v1  ;;  %v5419_v48 = vsel %vm824_vm2, %v5321_v15, %v5291_v61  ;;  %v5424_v29 = vsel %vm824_vm2, %v5291_v61, %v5273_v4  ;;  %v4454_v21 = vld [vmem:[#allocation2 + $0x44] ss:$0 sps:$4 sm:$0x11]  }
 0x308   : > { %3236 = vrot.lane.b32.xlu1 %v3235_v47, %s4525_s26  ;;  %v4455_v58 = vld [vmem:[#allocation2 + $0x50] ss:$0 sps:$4 sm:$0x11]   ;;  %v5428_v19 = vcombine.high %v3975_v38, %v5357_v18  ;;  %v5431_v46 = vcombine.low %v3975_v38, %v5357_v18  ;;  %v5436_v15 = vsel %vm824_vm2, %v5303_v1, %v5293_v37  ;;  %v5441_v4 = vsel %vm5653_vm14, %v5342_v60, %v5323_v5 }
 0x309   : > { %v3433_v61 = vsel %vm1642_vm6, %v3431_v49, %v3432_v28  ;;  %v3353_v63 = vunpack.c.l.b16 %v4450_v52  ;;  %v3354_v27 = vunpack.c.l.b16 %v4451_v50  ;;  %v5446_v30 = vsel %vm5653_vm14, %v2977_v14, %v5368_v56  ;;  %v5456_v14 = vpop.permute.xlu0 %1807  ;;  %v4464_v49 = vld [vmem:[#allocation2 + $0xbc] ss:$0 sps:$4 sm:$0x11]  }
 0x30a   : > { %v3355_v45 = vunpack.c.l.b16 %v4452_v55  ;;  %v3356_v37 = vunpack.c.l.b16 %v4453_v2  ;;  %v4111_v1 = vcombine.low %v5352_v16, %v5357_v18  ;;  %v5452_v5 = vsel %vm5653_vm14, %v1501_v11, %v5342_v60  ;;  %v4463_v16 = vld [vmem:[#allocation2 + $0xb0] ss:$0 sps:$4 sm:$0x11]  }
 0x30b   : > { %v3357_v41 = vunpack.c.l.b16 %v4454_v21  ;;  %v3358_v3 = vunpack.c.l.b16 %v4455_v58  ;;  %v4114_v35 = vcombine.low %v5360_v57, %v5360_v57  ;;  %v3783_v51 = vcombine.high %v5400_v33, %v5400_v33 }
 0x30c   : > { %3439 = vrot.lane.b32.xlu1 %v3433_v61, %s4525_s26  ;;  %v3359_v60 = vunpack.c.l.b16 %v4456_v7  ;;  %v3361_v59 = vunpack.c.l.b16 %v4458_v42  ;;  %v3362_v31 = vunpack.c.l.b16 %v4459_v25  ;;  %v3363_v40 = vunpack.c.l.b16 %v4460_v10 }
 0x30d   : > { %v3364_v24 = vunpack.c.l.b16 %v4461_v17  ;;  %v3365_v32 = vunpack.c.l.b16 %v4462_v23  ;;  %v3368_v9 = vrot.slane %v3353_v63, 7  ;;  %v3370_v0 = vrot.slane %v3354_v27, 6  ;;  %v5472_v63 = vpop.permute.xlu0 %3278  ;;  %v5474_v27 = vpop.permute.xlu1 %3276 }
 0x30e   : > { %v3366_v57 = vunpack.c.l.b16 %v4463_v16  ;;  %v3367_v28 = vunpack.c.l.b16 %v4464_v49  ;;  %v3372_v8 = vrot.slane %v3355_v45, 5  ;;  %v3374_v11 = vrot.slane %v3356_v37, 4  ;;  %v3561_v38 = vld [vmem:[#allocation3 + $0x8] sm:$0xff]  ;;  %v3977_v45 = vld [vmem:[%s4597_s12 + $0x3c] sm:$0x11] }
 0x30f   : > { %v3369_v47 = vsel %vm764_vm7, %v3368_v9, %v3352_v12  ;;  %v3376_v52 = vrot.slane %v3357_v41, 3  ;;  %v3378_v50 = vrot.slane %v3358_v3, 2  ;;  %4133 = vmatprep.mubr.msk.bf16.mxu0 %vm394_vm1, %v3561_v38  ;;  %v3782_v55 = vcombine.low %v5400_v33, %v5400_v33 }
 0x310   : > { %1965 = vrot.lane.b32.xlu1 %v1958_v39, %s4525_s26  ;;  %v3371_v2 = vsel %vm767_vm8, %v3370_v0, %v3369_v47  ;;  %v3380_v21 = vrot.slane %v3359_v60, 1  ;;  %v3382_v58 = vrot.slane %v3361_v59, 7  ;;  %v3384_v61 = vrot.slane %v3362_v31, 6 }
 0x311   : > { %v3373_v7 = vsel %vm770_vm9, %v3372_v8, %v3371_v2  ;;  %v3386_v13 = vrot.slane %v3363_v40, 5  ;;  %v3388_v42 = vrot.slane %v3364_v24, 4  ;;  %v3390_v12 = vrot.slane %v3365_v32, 3  ;;  %v4475_v8 = vld [vmem:[#allocation2 + $0xc] ss:$0 sps:$4 sm:$0x11]  }
 0x312   : > { %v3375_v25 = vsel %vm773_vm10, %v3374_v11, %v3373_v7  ;;  %v3383_v33 = vsel %vm764_vm7, %v3382_v58, %v3360_v6  ;;  %v3392_v39 = vrot.slane %v3366_v57, 2  ;;  %v3394_v10 = vrot.slane %v3367_v28, 1  ;;  %v1804_v57 = vpop.permute.xlu0 %1803  ;;  %v5495_v28 = vpop.permute.xlu1 %1967  ;;  %v5502_v2 = vld [vmem:[#allocation2 + $0x24] ss:$0 sps:$4 sm:$0x11]  }
 0x313   : > { %v3377_v37 = vsel %vm776_vm11, %v3376_v52, %v3375_v25  ;;  %v3385_v17 = vsel %vm767_vm8, %v3384_v61, %v3383_v33  ;;  %v3428_v23 = vrot.slane %v4111_v1, 1  ;;  %v1121_v41 = vshll.u32 %v5231_v44, 16 }
 0x314   : > { %v3379_v3 = vsel %vm779_vm12, %v3378_v50, %v3377_v37  ;;  %v3387_v16 = vsel %vm770_vm9, %v3386_v13, %v3385_v17  ;;  %v3429_v49 = vrot.slane %v4114_v35, 1  ;;  %v1126_v60 = vshll.u32 %v3783_v51, 16  ;;  %v5506_v13 = vld [vmem:[#allocation2 + $0x30] ss:$0 sps:$4 sm:$0x11]  }
 0x315   : > { %v3381_v34 = vsel %vm5654_vm13, %v3380_v21, %v3379_v3  ;;  %v3389_v6 = vsel %vm773_vm10, %v3388_v42, %v3387_v16  ;;  %v1123_v59 = vrot.slane %v1121_v41, 1  ;;  %v1107_v31 = vshrl.u32 %v5404_v20, 16  ;;  %v4480_v17 = vld [vmem:[#allocation2 + $0x48] ss:$0 sps:$4 sm:$0x11]  }
 0x316   : > { %v3391_v40 = vsel %vm776_vm11, %v3390_v12, %v3389_v6  ;;  %v1128_v24 = vrot.slane %v1126_v60, 1  ;;  %v1109_v1 = vshll.u32 %v5404_v20, 16  ;;  %v1114_v32 = vshll.u32 %v3782_v55, 16  ;;  %v5499_v20 = vld [vmem:[#allocation2 + $0x18] ss:$0 sps:$4 sm:$0x11]  }
 0x317   : > { %v3393_v9 = vsel %vm779_vm12, %v3392_v39, %v3391_v40  ;;  %v1124_v0 = vor.u32 %v1123_v59, %v1119_v36  ;;  %v3981_v35 = vcombine.high %v3977_v45, %v3977_v45  ;;  %v2597_v51 = vshrl.u32 %v5428_v19, 16  ;;  %v4479_v12 = vld [vmem:[#allocation2 + $0x3c] ss:$0 sps:$4 sm:$0x11]   ;;  %v5515_v39 = vld [vmem:[%s4597_s12] sm:$0xee] }
 0x318   : > { %v3395_v11 = vsel %vm5654_vm13, %v3394_v10, %v3393_v9  ;;  %v1111_v38 = vrot.slane %v1109_v1, 1  ;;  %v1116_v47 = vrot.slane %v1114_v32, 1  ;;  %v2599_v52 = vshll.u32 %v5428_v19, 16  ;;  %v5520_v41 = vld [vmem:[%s4597_s12 + $0x18] sm:$0x11] }
 0x319   : > { %v3396_v50 = vpack.c.b16 %v3395_v11, %v3381_v34  ;;  %v1129_v55 = vsel %vm1105_vm5, %v1124_v0, %v1128_v24  ;;  %v2604_v44 = vshll.u32 %v3981_v35, 16  ;;  %v3980_v36 = vcombine.low %v3977_v45, %v3977_v45  ;;  %v5530_v34 = vpop.permute.xlu1 %940  ;;  %v4484_v40 = vld [vmem:[#allocation2 + $0x78] ss:$0 sps:$4 sm:$0x11]  }
 0x31a   : > { %2117 = vmatprep.subr.bf16.mxu1 %v1129_v55  ;;  %v1112_v21 = vor.u32 %v1111_v38, %v1107_v31  ;;  %v2601_v58 = vrot.slane %v2599_v52, 1  ;;  %v2585_v61 = vshrl.u32 %v5431_v46, 16  ;;  %v2587_v7 = vshll.u32 %v5431_v46, 16  ;;  %v4483_v31 = vld [vmem:[#allocation2 + $0x6c] ss:$0 sps:$4 sm:$0x11]  }
 0x31b   : > { %3397 = vrot.lane.b32.xlu0 %v3396_v50, %s4524_s19  ;;  %v2606_v19 = vrot.slane %v2604_v44, 1  ;;  %v2592_v42 = vshll.u32 %v3980_v36, 16  ;;  %v748_v25 = vunpack.c.l.b16 %v4475_v8  ;;  %v5512_v33 = vsel %vm5653_vm14, %v5368_v56, %v5344_v62  ;;  %v1970_v62 = vpop.permute.xlu0 %1969  ;;  %v5526_v56 = vld [vmem:[#allocation2 + $0x54] ss:$0 sps:$4 sm:$0x11]   ;;  %v4514_v38 = vld [vmem:[%s4597_s12 + $0xc] sm:$0xff] }
 0x31c   : > { %v3430_v10 = vsel %vm1642_vm6, %v3428_v23, %v3429_v49  ;;  %v1117_v46 = vsel %vm1105_vm5, %v1112_v21, %v1116_v47  ;;  %v2602_v45 = vor.u32 %v2601_v58, %v2597_v51  ;;  %v2589_v37 = vrot.slane %v2587_v7, 1  ;;  %v5538_v49 = vld [vmem:[%s4597_s12 + $0x24] sm:$0xee]  ;;  %v4487_v51 = vld [vmem:[#allocation2 + $0x9c] ss:$0 sps:$4 sm:$0x11]  }
 0x31d   : > { %2118 = vmatpush1.bf16.msra.mxu1 %v1117_v46  ;;  %v2594_v3 = vrot.slane %v2592_v42, 1  ;;  %v5524_v16 = vsel %vm824_vm2, %v1804_v57, %v5394_v53  ;;  %v5528_v60 = vrot.slane %v748_v25, 7  ;;  %v5535_v23 = vsel %vm824_vm2, %v5394_v53, %v5456_v14  ;;  %v4485_v53 = vld [vmem:[#allocation2 + $0x84] ss:$0 sps:$4 sm:$0x11]   ;;  %v5564_v42 = vpop.permute.xlu1 %1084 }
 0x31e   : > { %2119 = vmatprep.subr.bf16.mxu1 %v5424_v29  ;;  %v2607_v6 = vsel %vm1105_vm5, %v2602_v45, %v2606_v19  ;;  %v2590_v59 = vor.u32 %v2589_v37, %v2585_v61  ;;  %v749_v24 = vunpack.c.l.b16 %v5499_v20  ;;  %v5545_v1 = vsel %vm5653_vm14, %v5495_v28, %v1970_v62  ;;  %v4486_v14 = vld [vmem:[#allocation2 + $0x90] ss:$0 sps:$4 sm:$0x11]   ;;  %v4488_v57 = vld [vmem:[#allocation2 + $0xa8] ss:$0 sps:$4 sm:$0x11]  }
 0x31f   : > { %3437 = vrot.lane.b32.xlu0 %v3430_v10, %s4525_s26  ;;  %3589 = vmatprep.subr.bf16.mxu0 %v2607_v6  ;;  %v750_v32 = vunpack.c.l.b16 %v5502_v2  ;;  %v751_v29 = vunpack.c.l.b16 %v5506_v13  ;;  %v752_v9 = vunpack.c.l.b16 %v4479_v12  ;;  %v753_v0 = vunpack.c.l.b16 %v4480_v17  ;;  %v4489_v52 = vld [vmem:[#allocation2 + $0xb4] ss:$0 sps:$4 sm:$0x11]   ;;  %v4490_v2 = vld [vmem:[#allocation2] ss:$0 sps:$4 sm:$0x11]  }
 0x320   : > { %v2595_v35 = vsel %vm1105_vm5, %v2590_v59, %v2594_v3  ;;  %v756_v8 = vunpack.c.l.b16 %v4483_v31  ;;  %v757_v11 = vunpack.c.l.b16 %v4484_v40  ;;  %v3845_v47 = vcombine.high %v5515_v39, %v4514_v38  ;;  %v4056_v37 = vld [vmem:[%s4597_s12 + $0x3c] sm:$0x11] }
 0x321   : > { %3590 = vmatpush1.bf16.msra.mxu0 %v2595_v35  ;;  %2120 = vmatpush1.bf16.msra.mxu1 %v5419_v48  ;;  %v754_v20 = vunpack.c.l.b16 %v5526_v56  ;;  %v758_v50 = vunpack.c.l.b16 %v4485_v53  ;;  %v759_v55 = vunpack.c.l.b16 %v4486_v14  ;;  %v3847_v44 = vcombine.high %v5520_v41, %v5520_v41  ;;  %v1244_v14 = vpop.permute.xlu1 %1243 }
 0x322   : > { %3591 = vmatprep.subr.bf16.mxu0 %v5436_v15  ;;  %2121 = vmatprep.subr.bf16.mxu1 %v5441_v4  ;;  %v760_v36 = vunpack.c.l.b16 %v4487_v51  ;;  %v3844_v21 = vcombine.low %v5515_v39, %v4514_v38  ;;  %v3846_v58 = vcombine.low %v5520_v41, %v5520_v41  ;;  %v4058_v48 = vcombine.high %v5538_v49, %v5357_v18  ;;  %v4495_v38 = vld [vmem:[#allocation2 + $0x4] ss:$0 sps:$4 sm:$0x11]  }
 0x323   : > { %v761_v61 = vunpack.c.l.b16 %v4488_v57  ;;  %v766_v7 = vrot.slane %v749_v24, 6  ;;  %v769_v13 = vrot.slane %v750_v32, 5  ;;  %v784_v19 = vrot.slane %v756_v8, 7 }
 0x324   : > { %v772_v15 = vrot.slane %v751_v29, 4  ;;  %v775_v12 = vrot.slane %v752_v9, 3  ;;  %v778_v4 = vrot.slane %v753_v0, 2  ;;  %v786_v25 = vrot.slane %v757_v11, 6 }
 0x325   : > { %3592 = vmatpush1.bf16.msra.mxu0 %v5414_v22  ;;  %v762_v39 = vunpack.c.l.b16 %v4489_v52  ;;  %v785_v10 = vsel %vm764_vm7, %v784_v19, %v755_v54  ;;  %v788_v46 = vrot.slane %v758_v50, 5  ;;  %v790_v45 = vrot.slane %v759_v55, 4  ;;  %2122 = vmatpush1.bf16.msra.mxu1 %v5452_v5  ;;  %v4497_v55 = vld [vmem:[#allocation2 + $0x1c] ss:$0 sps:$4 sm:$0x11]  }
 0x326   : > { %v787_v17 = vsel %vm767_vm8, %v786_v25, %v785_v10  ;;  %v792_v41 = vrot.slane %v760_v36, 3  ;;  %v747_v3 = vunpack.c.l.b16 %v4490_v2  ;;  %3593 = vmatprep.subr.bf16.mxu0 %v5512_v33  ;;  %v1646_v62 = vrot.slane %v3845_v47, 1  ;;  %v4498_v2 = vld [vmem:[#allocation2 + $0x28] ss:$0 sps:$4 sm:$0x11]  }
 0x327   : > { %v789_v56 = vsel %vm770_vm9, %v788_v46, %v787_v17  ;;  %v1647_v22 = vrot.slane %v3847_v44, 1  ;;  %v1643_v6 = vrot.slane %v3844_v21, 1  ;;  %v1644_v59 = vrot.slane %v3846_v58, 1  ;;  %v4499_v21 = vld [vmem:[#allocation2 + $0x34] ss:$0 sps:$4 sm:$0x11]   ;;  %v1433_v58 = vpop.permute.xlu0 %1432 }
 0x328   : > { %v781_v43 = vrot.slane %v754_v20, 1  ;;  %v791_v54 = vsel %vm773_vm10, %v790_v45, %v789_v56  ;;  %v794_v31 = vrot.slane %v761_v61, 2  ;;  %v765_v5 = vsel %vm764_vm7, %v5528_v60, %v747_v3  ;;  %v4496_v20 = vld [vmem:[#allocation2 + $0x10] ss:$0 sps:$4 sm:$0x11]  }
 0x329   : > { %v793_v40 = vsel %vm776_vm11, %v792_v41, %v791_v54  ;;  %v768_v24 = vsel %vm767_vm8, %v766_v7, %v765_v5  ;;  %v1648_v53 = vsel %vm1642_vm6, %v1646_v62, %v1647_v22  ;;  %v1645_v33 = vsel %vm1642_vm6, %v1643_v6, %v1644_v59  ;;  %3594 = vmatpush1.bf16.msra.mxu0 %v5446_v30  ;;  %v4500_v61 = vld [vmem:[#allocation2 + $0x40] ss:$0 sps:$4 sm:$0x11]   ;;  %v4503_v7 = vld [vmem:[#allocation2 + $0x64] ss:$0 sps:$4 sm:$0x11]  }
 0x32a   : > { %v795_v32 = vsel %vm779_vm12, %v794_v31, %v793_v40  ;;  %v796_v29 = vrot.slane %v762_v39, 1  ;;  %v771_v9 = vsel %vm770_vm9, %v769_v13, %v768_v24  ;;  %2123 = vmatprep.subr.bf16.mxu1 %v1648_v53  ;;  %v4060_v0 = vcombine.high %v4056_v37, %v4056_v37  ;;  %v4508_v46 = vld [vmem:[#allocation2 + $0xa0] ss:$0 sps:$4 sm:$0x11]  }
 0x32b   : > { %v774_v60 = vsel %vm773_vm10, %v772_v15, %v771_v9  ;;  %2124 = vmatpush1.bf16.msra.mxu1 %v1645_v33  ;;  %v3120_v35 = vrot.slane %v4058_v48, 1  ;;  %v4057_v51 = vcombine.low %v5538_v49, %v5357_v18  ;;  %v4059_v11 = vcombine.low %v4056_v37, %v4056_v37  ;;  %v4504_v15 = vld [vmem:[#allocation2 + $0x70] ss:$0 sps:$4 sm:$0x11]   ;;  %v1763_v56 = vpop.permute.xlu0 %1762 }
 0x32c   : > { %v797_v57 = vsel %vm5654_vm13, %v796_v29, %v795_v32  ;;  %v777_v30 = vsel %vm776_vm11, %v775_v12, %v774_v60  ;;  %2125 = vmatprep.subr.bf16.mxu1 %v5535_v23  ;;  %v3121_v8 = vrot.slane %v4060_v0, 1  ;;  %vm1246_vm3 = vcmask 523648   ;;  %v1622_v23 = vpop.permute.xlu1 %1621  ;;  %v4505_v12 = vld [vmem:[#allocation2 + $0x7c] ss:$0 sps:$4 sm:$0x11]  }
 0x32d   : > { %v780_v47 = vsel %vm779_vm12, %v778_v4, %v777_v30  ;;  %v3117_v52 = vrot.slane %v4057_v51, 1  ;;  %vm1435_vm4 = vcmask 654848   ;;  %v3118_v49 = vrot.slane %v4059_v11, 1  ;;  %v4507_v4 = vld [vmem:[#allocation2 + $0x94] ss:$0 sps:$4 sm:$0x11]  }
 0x32e   : > { %v783_v50 = vsel %vm5654_vm13, %v781_v43, %v780_v47  ;;  %v3122_v18 = vsel %vm1642_vm6, %v3120_v35, %v3121_v8  ;;  %v3283_v36 = vsel %vm824_vm2, %v5472_v63, %v5460_v26  ;;  %vm1624_vm5 = vcmask 786048   ;;  %v4509_v45 = vld [vmem:[#allocation2 + $0xac] ss:$0 sps:$4 sm:$0x11]  }
 0x32f   : > { %v798_v44 = vpack.c.b16 %v797_v57, %v783_v50  ;;  %2126 = vmatpush1.bf16.msra.mxu1 %v5524_v16  ;;  %3595 = vmatprep.subr.bf16.mxu0 %v3122_v18  ;;  %v3119_v48 = vsel %vm1642_vm6, %v3117_v52, %v3118_v49  ;;  %vm1765_vm14 = vcmask 917248   ;;  %vm1927_vm13 = vcmask 1048448   ;;  %v4501_v16 = vld [vmem:[#allocation2 + $0x4c] ss:$0 sps:$4 sm:$0x11]  }
 0x330   : > { %2127 = vmatprep.subr.bf16.mxu1 %v5545_v1  ;;  %3596 = vmatpush1.bf16.msra.mxu0 %v3119_v48  ;;  %v2237_v13 = vunpack.c.l.b16 %v4495_v38  ;;  %v2239_v19 = vunpack.c.l.b16 %v4497_v55  ;;  %v3282_v26 = vsel %vm824_vm2, %v5474_v27, %v5472_v63  ;;  %v4506_v1 = vld [vmem:[#allocation2 + $0x88] ss:$0 sps:$4 sm:$0x11]   ;;  %v2238_v25 = vunpack.c.l.b16 %v4496_v20  ;;  %v4510_v17 = vld [vmem:[#allocation2 + $0xb8] ss:$0 sps:$4 sm:$0x11]  }
 0x331   : > { %800 = vst.msk [vmem:[#allocation3] sm:$0xff] %vm394_vm1, %v798_v44  ;;  %3597 = vmatprep.subr.bf16.mxu0 %v3283_v36  ;;  %v2240_v39 = vunpack.c.l.b16 %v4498_v2  ;;  %v2241_v10 = vunpack.c.l.b16 %v4499_v21  ;;  %v2242_v37 = vunpack.c.l.b16 %v4500_v61  ;;  %v2245_v63 = vunpack.c.l.b16 %v4503_v7  ;;  %v4502_v22 = vld [vmem:[#allocation2 + $0x58] ss:$0 sps:$4 sm:$0x11]  }
 0x332   : > { %944 = vst.msk [vmem:[#allocation3] sm:$0xff] %vm943_vm15, %v5530_v34  ;;  %v2247_v27 = vunpack.c.l.b16 %v4505_v12  ;;  %v1925_v34 = vpop.permute.xlu1 %1924  ;;  %v2243_v41 = vunpack.c.l.b16 %v4501_v16  ;;  %v2246_v3 = vunpack.c.l.b16 %v4504_v15  ;;  %v2255_v62 = vrot.slane %v2239_v19, 7 }
 0x333   : > { %1088 = vst.msk [vmem:[#allocation3] sm:$0xff] %vm1087_vm0, %v5564_v42  ;;  %v2253_v42 = vrot.slane %v2237_v13, 1  ;;  %v2248_v6 = vunpack.c.l.b16 %v4506_v1  ;;  %v2249_v59 = vunpack.c.l.b16 %v4507_v4  ;;  %v2250_v43 = vunpack.c.l.b16 %v4508_v46 }
 0x334   : > { %1247 = vst.msk [vmem:[#allocation3] sm:$0xff] %vm1246_vm3, %v1244_v14  ;;  %3598 = vmatpush1.bf16.msra.mxu0 %v3282_v26  ;;  %v2251_v54 = vunpack.c.l.b16 %v4509_v45  ;;  %v2252_v31 = vunpack.c.l.b16 %v4510_v17  ;;  %v2257_v40 = vrot.slane %v2240_v39, 6  ;;  %v2259_v24 = vrot.slane %v2241_v10, 5 }
 0x335   : > { %1436 = vst.msk [vmem:[#allocation3] sm:$0xff] %vm1435_vm4, %v1433_v58  ;;  %v2254_v5 = vsel %vm764_vm7, %v2238_v25, %v2253_v42  ;;  %v2261_v33 = vrot.slane %v2242_v37, 4  ;;  %v2267_v14 = vrot.slane %v2245_v63, 1  ;;  %v2269_v32 = vrot.slane %v2247_v27, 7 }
 0x336   : > { %1625 = vst.msk [vmem:[#allocation3] sm:$0xff] %vm1624_vm5, %v1622_v23  ;;  %v2256_v53 = vsel %vm767_vm8, %v2255_v62, %v2254_v5  ;;  %v2263_v29 = vrot.slane %v2243_v41, 3  ;;  %v2244_v9 = vunpack.c.l.b16 %v4502_v22  ;;  %v2271_v35 = vrot.slane %v2248_v6, 6 }
 0x337   : > { %1766 = vst.msk [vmem:[#allocation3] sm:$0xff] %vm1765_vm14, %v1763_v56  ;;  %v2258_v0 = vsel %vm770_vm9, %v2257_v40, %v2256_v53  ;;  %v2268_v60 = vsel %vm764_vm7, %v2246_v3, %v2267_v14  ;;  %v2273_v30 = vrot.slane %v2249_v59, 5  ;;  %v2277_v8 = vrot.slane %v2251_v54, 3 }
 0x338   : > { %1928 = vst.msk [vmem:[#allocation3] sm:$0xff] %vm1927_vm13, %v1925_v34  ;;  %v2260_v51 = vsel %vm773_vm10, %v2259_v24, %v2258_v0  ;;  %v2270_v57 = vsel %vm767_vm8, %v2269_v32, %v2268_v60  ;;  %v2275_v47 = vrot.slane %v2250_v43, 4  ;;  %v2279_v52 = vrot.slane %v2252_v31, 2 }
 0x339   : > { %v2262_v11 = vsel %vm776_vm11, %v2261_v33, %v2260_v51  ;;  %v2272_v38 = vsel %vm770_vm9, %v2271_v35, %v2270_v57  ;;  %v2265_v18 = vrot.slane %v2244_v9, 2  ;;  %vm5659_vm2 = vcmask 1047559  }
 0x33a   : > { %v2264_v20 = vsel %vm779_vm12, %v2263_v29, %v2262_v11  ;;  %v2274_v50 = vsel %vm773_vm10, %v2273_v30, %v2272_v38  ;;  %vm5660_vm6 = vmmov %vm5659_vm2 }
 0x33b   : > { %v2276_v49 = vsel %vm776_vm11, %v2275_v47, %v2274_v50  ;;  %v2266_v44 = vsel %vm5659_vm2, %v2265_v18, %v2264_v20 }
 0x33c   : > { %v2278_v55 = vsel %vm779_vm12, %v2277_v8, %v2276_v49 }
 0x33d   : > { %v2280_v23 = vsel %vm5660_vm6, %v2279_v52, %v2278_v55 }
 0x33e   : > { %v2281_v2 = vpack.c.b16 %v2280_v23, %v2266_v44 }
 0x33f   : > { %v2088_v36 = vld [vmem:[#allocation3] sm:$0xff] }
 0x340   : > { %2283 = vst.msk [vmem:[#allocation3] sm:$0xff] %vm394_vm1, %v2281_v2  ;;  %vm5661_vm1 = vcmask 785408  }
 0x341   : > { %v2423_v21 = vpop.permute.xlu0 %2422  ;;  %vm5662_vm7 = vmmov %vm5661_vm1 }
 0x342   : > { %2425 = vst.msk [vmem:[#allocation3] sm:$0xff] %vm943_vm15, %v2423_v21  ;;  %vm5663_vm8 = vmmov %vm5661_vm1 }
 0x34b   : > { %v2565_v58 = vpop.permute.xlu1 %2564 }
 0x34c   : > { %2567 = vst.msk [vmem:[#allocation3] sm:$0xff] %vm1087_vm0, %v2565_v58 }
 0x357   : > { %v2722_v48 = vpop.permute.xlu0 %2721 }
 0x358   : > { %2724 = vst.msk [vmem:[#allocation3] sm:$0xff] %vm1246_vm3, %v2722_v48 }
 0x361   : > { %v2910_v61 = vpop.permute.xlu1 %2909 }
 0x362   : > { %2912 = vst.msk [vmem:[#allocation3] sm:$0xff] %vm1435_vm4, %v2910_v61 }
 0x36e   : > { %v3098_v16 = vpop.permute.xlu0 %3097 }
 0x36f   : > { %3100 = vst.msk [vmem:[#allocation3] sm:$0xff] %vm1624_vm5, %v3098_v16 }
 0x378   : > { %v3442_v13 = vpop.permute.xlu0 %3441 }
 0x37a   : > { %v3237_v7 = vpop.permute.xlu1 %3236 }
 0x37b   : > { %3239 = vst.msk [vmem:[#allocation3] sm:$0xff] %vm1765_vm14, %v3237_v7 }
 0x37e   : > { %v3440_v19 = vpop.permute.xlu1 %3439 }
 0x37f   : > { %v3444_v26 = vsel %vm5661_vm1, %v3440_v19, %v3442_v13 }
 0x380   : > { %3599 = vmatprep.subr.bf16.mxu0 %v3444_v26 }
 0x382   : > { %v1966_v15 = vpop.permute.xlu1 %1965 }
 0x383   : > { %v1971_v12 = vsel %vm5662_vm7, %v1966_v15, %v5495_v28 }
 0x384   : > { %2128 = vmatpush1.bf16.msra.mxu1 %v1971_v12 }
 0x387   : > { %2144 = vmatmul.mubr.bf16.vlgmr.msra.gmra.mrb[8].mxu1 %v2088_v36 }
 0x38d   : > { %v3398_v1 = vpop.permute.xlu0 %3397 }
 0x38e   : > { %3400 = vst.msk [vmem:[#allocation3] sm:$0xff] %vm1927_vm13, %v3398_v1 }
 0x391   : > { %v3438_v4 = vpop.permute.xlu0 %3437 }
 0x392   : > { %v3443_v25 = vsel %vm5663_vm8, %v3438_v4, %v3440_v19 }
 0x393   : > { %3600 = vmatpush1.bf16.msra.mxu0 %v3443_v25 }
 0x395   : > { %v3560_v39 = vld [vmem:[#allocation3] sm:$0xff] }
 0x396   : > { %3616 = vmatmul.mubr.bf16.vlgmr.msra.gmra.mrb[4].mxu0 %v3560_v39 }
 0x45a   : > { %v2145_v10 = vpop.f32.mrb[8].mxu1 }
 0x45b   : > { %2154 = vst [vmem:[%s271_s11] sm:$0xff] %v2145_v10  ;;  %v2147_v46 = vpop.f32.mrb[9].mxu1 }
 0x45c   : > { %2155 = vst [vmem:[%s271_s11 + $0x8] sm:$0xff] %v2147_v46  ;;  %v2149_v28 = vpop.f32.mrb[10].mxu1 }
 0x45d   : > { %2156 = vst [vmem:[%s271_s11 + $0x10] sm:$0xff] %v2149_v28  ;;  %v2151_v45 = vpop.f32.mrb[11].mxu1 }
 0x45e   : > { %2157 = vst [vmem:[%s271_s11 + $0x18] sm:$0xff] %v2151_v45 }
 0x469   : > { %v3617_v37 = vpop.f32.mrb[4].mxu0 }
 0x46a   : > { %4134 = vst [vmem:[%s271_s11 + $0x20] sm:$0xff] %v3617_v37  ;;  %v3619_v63 = vpop.f32.mrb[5].mxu0 }
 0x46b   : > { %4135 = vst [vmem:[%s271_s11 + $0x28] sm:$0xff] %v3619_v63  ;;  %v3621_v27 = vpop.f32.mrb[6].mxu0 }
 0x46c   : > { %4136 = vst [vmem:[%s271_s11 + $0x30] sm:$0xff] %v3621_v27  ;;  %v3623_v34 = vpop.f32.mrb[7].mxu0 }
 0x46d   : > { %4137 = vst [vmem:[%s271_s11 + $0x38] sm:$0xff] %v3623_v34 }
 0x46e PF: > { %s16_s21 = sadd.s32 1, %s4521_s21  }
 0x46f   : > { %p13_p4 = scmp.ge.s32.totalorder %s16_s21, 4  }
 0x471   :  { %15 = sbr.rel (!%p13_p4) target bundleno = 1 (0x1), region = 94 }

</bundles_post_ra>
